<compile_context>
chip_gen: v7x
topology: tpu7x:2x2x1
jax: 0.10.0
libtpu: 0.0.40
codegen_flags: <defaults>
</compile_context>

<pallas_src>
import math

import jax
import jax.numpy as jnp
import numpy as np
from jax.experimental import pallas as pl
from jax.experimental.pallas import tpu as pltpu

# True (torch) feature sizes and their lane-aligned (padded) sizes.
D_IN = 1
H1, H1P = 200, 256
H2, H2P = 2000, 2048
H3, H3P = 500, 512
D_OUT = 1


def mlp_kernel(x_ref,
               w1_ref, b1_ref,
               w2_ref, b2_ref,
               w3_ref, b3_ref,
               w4_ref, b4_ref,
               o_ref):
    # x arrives lane-dense as a (1, 1, tile_b) row.  One small relayout per tile
    # turns it into the (tile_b, 1) column the layer-1 broadcast needs.
    x_col = x_ref[0].T                                       # (tb, 1) f32

    # Layer 1: fan-in == 1 -> broadcasted outer product on the VPU (no MXU pass).
    h1 = jnp.maximum(x_col * w1_ref[...] + b1_ref[...], 0.0)  # (tb, 256) f32

    # Layer 2: (tb,256) @ (256,2048), bf16 MXU inputs, fp32 accumulation.
    h2 = jnp.dot(h1.astype(jnp.bfloat16), w2_ref[...],
                 preferred_element_type=jnp.float32) + b2_ref[...]
    h2 = jnp.maximum(h2, 0.0)                                 # (tb, 2048) f32

    # Layer 3: (tb,2048) @ (2048,512)
    h3 = jnp.dot(h2.astype(jnp.bfloat16), w3_ref[...],
                 preferred_element_type=jnp.float32) + b3_ref[...]
    h3 = jnp.maximum(h3, 0.0)                                 # (tb, 512) f32

    # Layer 4: single output column -> keep it off the MXU.  VPU multiply, then
    # fold 512 -> 128 lanes with cheap VALU adds of static vreg-column slices,
    # and only the final 128-lane reduction goes through the XLU.
    hw = h3 * w4_ref[...]                                     # (tb, 512) f32
    folded = (hw[:, 0:128] + hw[:, 128:256] +
              hw[:, 256:384] + hw[:, 384:512])                # (tb, 128) f32
    z = jnp.sum(folded, axis=-1, keepdims=True) + b4_ref[...]  # (tb, 1)

    # Store lane-dense: (tb,1) -> (1,tb) row into the (1, 1, tile_b) output block.
    o_ref[0] = jax.nn.sigmoid(z).T


def _device_defaults():
    """Per-chip default batch-tile cap and scoped-VMEM limit."""
    try:
        kind = jax.devices()[0].device_kind.lower()
    except Exception:
        kind = ""
    if "v7" in kind:                       # v7x: 64 MiB physical VMEM per TC
        return 1024, 48 * 1024 * 1024
    if "v5" in kind or "v6" in kind:       # v5e/v5p/v6e: 128 MiB physical VMEM
        return 2048, 80 * 1024 * 1024
    return 512, 32 * 1024 * 1024           # conservative fallback (older/unknown)


def mlp_forward(x, params, tile_b=None):
    """x: (B, 1) float32. params: flat tuple (w1,b1,w2,b2,w3,b3,w4_row,b4)."""
    w1, b1, w2, b2, w3, b3, w4, b4 = params
    B = x.shape[0]

    tile_cap, vmem_bytes = _device_defaults()
    if tile_b is None:
        tile_b = min(tile_cap, B)
        # Give the (parallel) batch axis >= 2 grid steps when the batch allows it,
        # so both v7x TensorCores get work.  Near-free on single-TC chips.
        if B >= 16 and -(-B // tile_b) < 2:
            tile_b = -(-B // 2)
    tile_b = max(8, ((tile_b + 7) // 8) * 8)   # sublane multiple

    n_tiles = -(-B // tile_b)                  # ceil div (static python ints)
    B_pad = n_tiles * tile_b

    # Lane-dense input slab: (n_tiles, 1, tile_b), padded batch rows are zero.
    x_rows = jnp.pad(x.reshape(B), (0, B_pad - B)).reshape(n_tiles, 1, tile_b)

    # Rough cost hint for XLA's scheduler.
    flops = 2 * B_pad * (H1P * H2P + H2P * H3P + H1P + H3P)
    param_bytes = sum(int(p.size) * p.dtype.itemsize for p in params)
    bytes_accessed = param_bytes + B_pad * 4 * 2
    cost = pl.CostEstimate(flops=int(flops), transcendentals=int(B_pad),
                           bytes_accessed=int(bytes_accessed))

    const = lambda i: (0, 0)   # weights/biases stay resident across batch tiles
    out = pl.pallas_call(
        mlp_kernel,
        out_shape=jax.ShapeDtypeStruct((n_tiles, 1, tile_b), jnp.float32),
        grid=(n_tiles,),
        in_specs=[
            pl.BlockSpec((1, 1, tile_b), lambda i: (i, 0, 0)),  # x   (lane-dense rows)
            pl.BlockSpec((D_IN, H1P), const),                   # w1  (1, 256)   f32
            pl.BlockSpec((1, H1P), const),                      # b1  (1, 256)   f32
            pl.BlockSpec((H1P, H2P), const),                    # w2  (256,2048) bf16
            pl.BlockSpec((1, H2P), const),                      # b2  (1, 2048)  f32
            pl.BlockSpec((H2P, H3P), const),                    # w3  (2048,512) bf16
            pl.BlockSpec((1, H3P), const),                      # b3  (1, 512)   f32
            pl.BlockSpec((1, H3P), const),                      # w4  (1, 512)   f32 (row)
            pl.BlockSpec((1, D_OUT), const),                    # b4  (1, 1)     f32
        ],
        out_specs=pl.BlockSpec((1, 1, tile_b), lambda i: (i, 0, 0)),
        compiler_params=pltpu.CompilerParams(
            dimension_semantics=("parallel",),                  # shard batch tiles on v7x's 2 TCs
            vmem_limit_bytes=vmem_bytes),
        cost_estimate=cost,
    )(x_rows, w1, b1, w2, b2, w3, b3, w4, b4)

    return out.reshape(B_pad)[:B].reshape(B, D_OUT)


def init_linear(key, in_f, out_f, in_pad, out_pad, w_dtype=jnp.bfloat16):
    """torch.nn.Linear default init: U(-1/sqrt(fan_in), 1/sqrt(fan_in)).
    Weight stored transposed as (in, out), zero-padded to (in_pad, out_pad)."""
    kw, kb = jax.random.split(key)
    bound = 1.0 / math.sqrt(in_f)
    w = jax.random.uniform(kw, (in_f, out_f), minval=-bound, maxval=bound,
                           dtype=jnp.float32)
    b = jax.random.uniform(kb, (1, out_f), minval=-bound, maxval=bound,
                           dtype=jnp.float32)
    w_pad = jnp.pad(w, ((0, in_pad - in_f), (0, out_pad - out_f))).astype(w_dtype)
    b_pad = jnp.pad(b, ((0, 0), (0, out_pad - out_f)))        # keep f32, padded lanes = 0
    return w, b, w_pad, b_pad


def reference_forward(x, raw_params):
    """Pure-JAX fp32 reference (un-padded weights) for a correctness check."""
    (w1, b1), (w2, b2), (w3, b3), (w4, b4) = raw_params
    h = jnp.maximum(x @ w1 + b1, 0.0)
    h = jnp.maximum(h @ w2 + b2, 0.0)
    h = jnp.maximum(h @ w3 + b3, 0.0)
    return jax.nn.sigmoid(h @ w4 + b4)


if __name__ == "__main__":
    key = jax.random.PRNGKey(0)
    k_in, k1, k2, k3, k4 = jax.random.split(key, 5)

    # w1 / w4 stay fp32 (tiny); w2 / w3 are bf16 for the MXU.
    w1r, b1r, w1, b1 = init_linear(k1, D_IN, H1, D_IN, H1P, w_dtype=jnp.float32)
    w2r, b2r, w2, b2 = init_linear(k2, H1, H2, H1P, H2P, w_dtype=jnp.bfloat16)
    w3r, b3r, w3, b3 = init_linear(k3, H2, H3, H2P, H3P, w_dtype=jnp.bfloat16)
    w4r, b4r, w4, b4 = init_linear(k4, H3, D_OUT, H3P, D_OUT, w_dtype=jnp.float32)
    w4_row = w4.reshape(1, H3P)                                # (512,1) -> (1,512) row

    params = (w1, b1, w2, b2, w3, b3, w4_row, b4)
    raw_params = [(w1r, b1r), (w2r, b2r), (w3r, b3r), (w4r, b4r)]

    batch = 8
    x = jax.random.normal(k_in, (batch, D_IN), dtype=jnp.float32)

    out = mlp_forward(x, params)
    out = jax.block_until_ready(out)

    assert out.shape == (batch, D_OUT)
    assert out.dtype == jnp.float32
    assert bool(jnp.all((out >= 0.0) & (out <= 1.0)))

    # Compare against the fp32 pure-JAX reference (bf16 w2/w3 => ~1e-3 deltas).
    ref = reference_forward(x, raw_params)
    np.testing.assert_allclose(np.asarray(out), np.asarray(ref), atol=5e-3, rtol=0.0)

    print("KERNEL_OK")
</pallas_src>

<mosaic_0001>
module attributes {stable_mosaic.version = 11 : i64} {
  func.func @mlp_kernel(%arg0: i32, %arg1: memref<1x1x8xf32, #tpu.memory_space<vmem>>, %arg2: memref<1x256xf32, #tpu.memory_space<vmem>>, %arg3: memref<1x256xf32, #tpu.memory_space<vmem>>, %arg4: memref<256x2048xbf16, #tpu.memory_space<vmem>>, %arg5: memref<1x2048xf32, #tpu.memory_space<vmem>>, %arg6: memref<2048x512xbf16, #tpu.memory_space<vmem>>, %arg7: memref<1x512xf32, #tpu.memory_space<vmem>>, %arg8: memref<1x512xf32, #tpu.memory_space<vmem>>, %arg9: memref<1x1xf32, #tpu.memory_space<vmem>>, %arg10: memref<1x1x8xf32, #tpu.memory_space<vmem>>) attributes {dimension_semantics = [#tpu.dimension_semantics<parallel>], iteration_bounds = array<i64: 1>, scalar_prefetch = 0 : i64, scratch_operands = 0 : i64, tpu.core_type = #tpu.core_type<tc>, window_params = [{transform_indices = @transform_0, window_bounds = array<i64: 1, 1, 8>}, {pipeline_mode = #tpu.pipeline_mode<synchronous>, transform_indices = @transform_1, window_bounds = array<i64: 1, 256>}, {pipeline_mode = #tpu.pipeline_mode<synchronous>, transform_indices = @transform_2, window_bounds = array<i64: 1, 256>}, {pipeline_mode = #tpu.pipeline_mode<synchronous>, transform_indices = @transform_3, window_bounds = array<i64: 256, 2048>}, {pipeline_mode = #tpu.pipeline_mode<synchronous>, transform_indices = @transform_4, window_bounds = array<i64: 1, 2048>}, {pipeline_mode = #tpu.pipeline_mode<synchronous>, transform_indices = @transform_5, window_bounds = array<i64: 2048, 512>}, {pipeline_mode = #tpu.pipeline_mode<synchronous>, transform_indices = @transform_6, window_bounds = array<i64: 1, 512>}, {pipeline_mode = #tpu.pipeline_mode<synchronous>, transform_indices = @transform_7, window_bounds = array<i64: 1, 512>}, {pipeline_mode = #tpu.pipeline_mode<synchronous>, transform_indices = @transform_8, window_bounds = array<i64: 1, 1>}, {transform_indices = @transform_9, window_bounds = array<i64: 1, 1, 8>}]} {
    %c0 = arith.constant 0 : index
    %c0_0 = arith.constant 0 : index
    %c0_1 = arith.constant 0 : index
    %0 = vector.load %arg1[%c0, %c0_0, %c0_1] : memref<1x1x8xf32, #tpu.memory_space<vmem>>, vector<1x1x8xf32>
    %1 = vector.shape_cast %0 : vector<1x1x8xf32> to vector<1x8xf32>
    %2 = tpu.transpose %1, [1, 0] : vector<1x8xf32> -> vector<8x1xf32>
    %c0_2 = arith.constant 0 : index
    %c0_3 = arith.constant 0 : index
    %3 = vector.load %arg2[%c0_2, %c0_3] : memref<1x256xf32, #tpu.memory_space<vmem>>, vector<1x256xf32>
    %4 = vector.broadcast %2 : vector<8x1xf32> to vector<8x256xf32>
    %5 = vector.broadcast %3 : vector<1x256xf32> to vector<8x256xf32>
    %6 = arith.mulf %4, %5 : vector<8x256xf32>
    %c0_4 = arith.constant 0 : index
    %c0_5 = arith.constant 0 : index
    %7 = vector.load %arg3[%c0_4, %c0_5] : memref<1x256xf32, #tpu.memory_space<vmem>>, vector<1x256xf32>
    %8 = vector.broadcast %7 : vector<1x256xf32> to vector<8x256xf32>
    %9 = arith.addf %6, %8 : vector<8x256xf32>
    %cst = arith.constant 0.000000e+00 : f32
    %10 = vector.broadcast %cst : f32 to vector<8x256xf32>
    %11 = arith.maximumf %9, %10 : vector<8x256xf32>
    %12 = arith.truncf %11 : vector<8x256xf32> to vector<8x256xbf16>
    %c0_6 = arith.constant 0 : index
    %c0_7 = arith.constant 0 : index
    %13 = vector.load %arg4[%c0_6, %c0_7] : memref<256x2048xbf16, #tpu.memory_space<vmem>>, vector<256x2048xbf16>
    %cst_8 = arith.constant dense<0.000000e+00> : vector<8x2048xf32>
    %14 = tpu.matmul %12, %13, %cst_8 {dimension_numbers = #tpu.dot_dimension_numbers<[1], [0], [0], [1], [0, 0, 1, 1], [], []>} : vector<8x256xbf16>, vector<256x2048xbf16>, vector<8x2048xf32> -> vector<8x2048xf32>
    %c0_9 = arith.constant 0 : index
    %c0_10 = arith.constant 0 : index
    %15 = vector.load %arg5[%c0_9, %c0_10] : memref<1x2048xf32, #tpu.memory_space<vmem>>, vector<1x2048xf32>
    %16 = vector.broadcast %15 : vector<1x2048xf32> to vector<8x2048xf32>
    %17 = arith.addf %14, %16 : vector<8x2048xf32>
    %cst_11 = arith.constant 0.000000e+00 : f32
    %18 = vector.broadcast %cst_11 : f32 to vector<8x2048xf32>
    %19 = arith.maximumf %17, %18 : vector<8x2048xf32>
    %20 = arith.truncf %19 : vector<8x2048xf32> to vector<8x2048xbf16>
    %c0_12 = arith.constant 0 : index
    %c0_13 = arith.constant 0 : index
    %21 = vector.load %arg6[%c0_12, %c0_13] : memref<2048x512xbf16, #tpu.memory_space<vmem>>, vector<2048x512xbf16>
    %cst_14 = arith.constant dense<0.000000e+00> : vector<8x512xf32>
    %22 = tpu.matmul %20, %21, %cst_14 {dimension_numbers = #tpu.dot_dimension_numbers<[1], [0], [0], [1], [0, 0, 1, 1], [], []>} : vector<8x2048xbf16>, vector<2048x512xbf16>, vector<8x512xf32> -> vector<8x512xf32>
    %c0_15 = arith.constant 0 : index
    %c0_16 = arith.constant 0 : index
    %23 = vector.load %arg7[%c0_15, %c0_16] : memref<1x512xf32, #tpu.memory_space<vmem>>, vector<1x512xf32>
    %24 = vector.broadcast %23 : vector<1x512xf32> to vector<8x512xf32>
    %25 = arith.addf %22, %24 : vector<8x512xf32>
    %cst_17 = arith.constant 0.000000e+00 : f32
    %26 = vector.broadcast %cst_17 : f32 to vector<8x512xf32>
    %27 = arith.maximumf %25, %26 : vector<8x512xf32>
    %c0_18 = arith.constant 0 : index
    %c0_19 = arith.constant 0 : index
    %28 = vector.load %arg8[%c0_18, %c0_19] : memref<1x512xf32, #tpu.memory_space<vmem>>, vector<1x512xf32>
    %29 = vector.broadcast %28 : vector<1x512xf32> to vector<8x512xf32>
    %30 = arith.mulf %27, %29 : vector<8x512xf32>
    %31 = vector.extract_strided_slice %30 {offsets = [0, 0], sizes = [8, 128], strides = [1, 1]} : vector<8x512xf32> to vector<8x128xf32>
    %32 = vector.extract_strided_slice %30 {offsets = [0, 128], sizes = [8, 128], strides = [1, 1]} : vector<8x512xf32> to vector<8x128xf32>
    %33 = arith.addf %31, %32 : vector<8x128xf32>
    %34 = vector.extract_strided_slice %30 {offsets = [0, 256], sizes = [8, 128], strides = [1, 1]} : vector<8x512xf32> to vector<8x128xf32>
    %35 = arith.addf %33, %34 : vector<8x128xf32>
    %36 = vector.extract_strided_slice %30 {offsets = [0, 384], sizes = [8, 128], strides = [1, 1]} : vector<8x512xf32> to vector<8x128xf32>
    %37 = arith.addf %35, %36 : vector<8x128xf32>
    %cst_20 = arith.constant dense<0.000000e+00> : vector<8xf32>
    %38 = vector.multi_reduction <add>, %37, %cst_20 [1] : vector<8x128xf32> to vector<8xf32>
    %39 = vector.shape_cast %38 : vector<8xf32> to vector<8x1xf32>
    %c0_21 = arith.constant 0 : index
    %c0_22 = arith.constant 0 : index
    %40 = vector.load %arg9[%c0_21, %c0_22] : memref<1x1xf32, #tpu.memory_space<vmem>>, vector<1x1xf32>
    %41 = vector.broadcast %40 : vector<1x1xf32> to vector<8x1xf32>
    %42 = arith.addf %39, %41 : vector<8x1xf32>
    %43 = arith.negf %42 : vector<8x1xf32>
    %44 = math.exp %43 : vector<8x1xf32>
    %cst_23 = arith.constant 1.000000e+00 : f32
    %45 = vector.broadcast %cst_23 : f32 to vector<8x1xf32>
    %46 = arith.addf %45, %44 : vector<8x1xf32>
    %47 = arith.divf %45, %46 : vector<8x1xf32>
    %48 = tpu.transpose %47, [1, 0] : vector<8x1xf32> -> vector<1x8xf32>
    %c0_24 = arith.constant 0 : index
    %c0_25 = arith.constant 0 : index
    %c0_26 = arith.constant 0 : index
    %49 = vector.load %arg10[%c0_24, %c0_25, %c0_26] : memref<1x1x8xf32, #tpu.memory_space<vmem>>, vector<1x1x8xf32>
    %50 = vector.shape_cast %49 : vector<1x1x8xf32> to vector<1x8xf32>
    %51 = vector.shape_cast %48 : vector<1x8xf32> to vector<1x1x8xf32>
    tpu.vector_store %arg10[%c0_24, %c0_25, %c0_26], %51 {strides = array<i32>} : memref<1x1x8xf32, #tpu.memory_space<vmem>>, vector<1x1x8xf32>,
    return
  }
  func.func @transform_0(%arg0: i32) -> (i32, i32, i32) {
    %c0_i32 = arith.constant 0 : i32
    %c0_i32_0 = arith.constant 0 : i32
    %c0_i32_1 = arith.constant 0 : i32
    return %arg0, %c0_i32, %c0_i32_0 : i32, i32, i32
  }
  func.func @transform_1(%arg0: i32) -> (i32, i32) {
    %c0_i32 = arith.constant 0 : i32
    %c0_i32_0 = arith.constant 0 : i32
    %c0_i32_1 = arith.constant 0 : i32
    return %c0_i32, %c0_i32_0 : i32, i32
  }
  func.func @transform_2(%arg0: i32) -> (i32, i32) {
    %c0_i32 = arith.constant 0 : i32
    %c0_i32_0 = arith.constant 0 : i32
    %c0_i32_1 = arith.constant 0 : i32
    return %c0_i32, %c0_i32_0 : i32, i32
  }
  func.func @transform_3(%arg0: i32) -> (i32, i32) {
    %c0_i32 = arith.constant 0 : i32
    %c0_i32_0 = arith.constant 0 : i32
    %c0_i32_1 = arith.constant 0 : i32
    return %c0_i32, %c0_i32_0 : i32, i32
  }
  func.func @transform_4(%arg0: i32) -> (i32, i32) {
    %c0_i32 = arith.constant 0 : i32
    %c0_i32_0 = arith.constant 0 : i32
    %c0_i32_1 = arith.constant 0 : i32
    return %c0_i32, %c0_i32_0 : i32, i32
  }
  func.func @transform_5(%arg0: i32) -> (i32, i32) {
    %c0_i32 = arith.constant 0 : i32
    %c0_i32_0 = arith.constant 0 : i32
    %c0_i32_1 = arith.constant 0 : i32
    return %c0_i32, %c0_i32_0 : i32, i32
  }
  func.func @transform_6(%arg0: i32) -> (i32, i32) {
    %c0_i32 = arith.constant 0 : i32
    %c0_i32_0 = arith.constant 0 : i32
    %c0_i32_1 = arith.constant 0 : i32
    return %c0_i32, %c0_i32_0 : i32, i32
  }
  func.func @transform_7(%arg0: i32) -> (i32, i32) {
    %c0_i32 = arith.constant 0 : i32
    %c0_i32_0 = arith.constant 0 : i32
    %c0_i32_1 = arith.constant 0 : i32
    return %c0_i32, %c0_i32_0 : i32, i32
  }
  func.func @transform_8(%arg0: i32) -> (i32, i32) {
    %c0_i32 = arith.constant 0 : i32
    %c0_i32_0 = arith.constant 0 : i32
    %c0_i32_1 = arith.constant 0 : i32
    return %c0_i32, %c0_i32_0 : i32, i32
  }
  func.func @transform_9(%arg0: i32) -> (i32, i32, i32) {
    %c0_i32 = arith.constant 0 : i32
    %c0_i32_0 = arith.constant 0 : i32
    %c0_i32_1 = arith.constant 0 : i32
    return %arg0, %c0_i32, %c0_i32_0 : i32, i32, i32
  }
}

</mosaic_0001>

<bundles_post_ra>
// kernel: tpu_custom_call.1
= control target key start
LH: loop header
LB: loop body
LE: loop exit
PB: predicated region body
PF: predicated region fallthrough
CT: control target
= control target key end

     0   :  { %s8183_s0 = inlined_call_operand.hbm [shape: f32[1,1,8], index: 0, kind: input, shape index: {}]   ;;  %s8184_s1 = inlined_call_operand.hbm [shape: f32[1,256], index: 1, kind: input, shape index: {}]   ;;  %s8185_s2 = inlined_call_operand.hbm [shape: f32[1,256], index: 2, kind: input, shape index: {}]   ;;  %s8186_s3 = inlined_call_operand.hbm [shape: bf16[256,2048], index: 3, kind: input, shape index: {}]   ;;  %s8187_s4 = inlined_call_operand.hbm [shape: f32[1,2048], index: 4, kind: input, shape index: {}]   ;;  %s8188_s5 = inlined_call_operand.hbm [shape: bf16[2048,512], index: 5, kind: input, shape index: {}]   ;;  %s8189_s6 = inlined_call_operand.hbm [shape: f32[1,512], index: 6, kind: input, shape index: {}]   ;;  %s8190_s7 = inlined_call_operand.hbm [shape: f32[1,512], index: 7, kind: input, shape index: {}]   ;;  %s8191_s8 = inlined_call_operand.<no memory space> [shape: f32[1,1], index: 8, kind: input, shape index: {}]   ;;  %s8192_s9 = inlined_call_operand.hbm [shape: f32[1,1,8], index: 9, kind: output, shape index: {}]  }
   0x1   :  { %v14_v0 = vstv %s8191_s8 }
   0x2   :  { %15 = vst [vmem:[#allocation2] sm:$0x1] %v14_v0 }
   0x3   :  { %16 = vsyncpa [#allocation4], 0 }
   0x4   :  { %17 = vsyncpa [#allocation7], 0 }
   0x5   :  { %18 = vsyncpa [#allocation10], 0 }
   0x6   :  { %19 = vsyncpa [#allocation13], 0 }
   0x7   :  { %20 = vsyncpa [#allocation16], 0 }
   0x8   :  { %21 = vsyncpa [#allocation5], 0  ;;  %s7864_s11 = smov [#allocation6]   ;;  %s7865_s13 = smov [#allocation9]  }
   0x9   :  { %s38_s12 = sshll.u32 %s7864_s11, 4  ;;  %s57_s14 = sshll.u32 %s7865_s13, 4  ;;  %s39_s12 = int_to_ptr.vmem [resolvable:$true] %s38_s12  ;;  %s7931_s14 = int_to_ptr.vmem [resolvable:$true] %s57_s14 }
   0xa   :  { %s7654_s17 = scalar_lea.hbm %s8184_s1, 32 }
   0xb   :  { %p7655_p0 = scmp.ne.s32.totalorder %s8184_s1, %s7654_s17  ;;  %p7658_p1 = scmp.lt.u32.totalorder %s7654_s17, %s8184_s1 }
   0xd   :  { %p7660_p2 = pnand %p7658_p1, %p7655_p0 }
   0xf   :  { %7663 = shalt.err (!%p7660_p2)
}
  0x10   :  { %s7664_s21 = scalar_lea.vmem %s39_s12, 32  ;;  %p7669_p4 = scmp.lt.s32.totalorder %s39_s12, %s39_s12 }
  0x11   :  { %p7665_p3 = scmp.ne.s32.totalorder %s39_s12, %s7664_s21  ;;  %p7670_p5 = scmp.lt.s32.totalorder %s7664_s21, %s7664_s21 }
  0x13   :  { %p7671_p6 = por %p7670_p5, %p7669_p4 }
  0x15   :  { %p7672_p7 = pnand %p7671_p6, %p7665_p3 }
  0x17   :  { %7675 = shalt.err (!%p7672_p7)
}
  0x18   :  { %41 = dma.hbm_to_vmem [thread:$0]  %s8184_s1, 32, %s39_s12, [#allocation7]  }
  0x19   :  { %s7676_s26 = scalar_lea.hbm %s8186_s3, 32768 }
  0x1a   :  { %p7677_p8 = scmp.ne.s32.totalorder %s8186_s3, %s7676_s26  ;;  %p7680_p9 = scmp.lt.u32.totalorder %s7676_s26, %s8186_s3 }
  0x1c   :  { %p7682_p10 = pnand %p7680_p9, %p7677_p8 }
  0x1e   :  { %7685 = shalt.err (!%p7682_p10)
}
  0x1f   :  { %s7686_s10 = scalar_lea.vmem %s7931_s14, 32768  ;;  %p7691_p12 = scmp.lt.s32.totalorder %s7931_s14, %s7931_s14 }
  0x20   :  { %p7687_p11 = scmp.ne.s32.totalorder %s7931_s14, %s7686_s10  ;;  %p7692_p13 = scmp.lt.s32.totalorder %s7686_s10, %s7686_s10 }
  0x22   :  { %p7693_p0 = por %p7692_p13, %p7691_p12 }
  0x24   :  { %p7694_p1 = pnand %p7693_p0, %p7687_p11 }
  0x26   :  { %7697 = shalt.err (!%p7694_p1)
}
  0x27   :  { %s7866_s1 = smov 1024   ;;  %s7867_s11 = smov 64  }
  0x28   :  { %63 = dma.hbm_to_vmem [thread:$0]  %s8186_s3, 32768, %s7931_s14, [#allocation10], %s7866_s1, %s7866_s1, %s7867_s11  }
  0x29   :  { %s7868_s15 = smov [#allocation12]   ;;  %s7698_s8 = scalar_lea.hbm %s8188_s5, 65536 }
  0x2a   :  { %s79_s16 = sshll.u32 %s7868_s15, 4  ;;  %p7699_p2 = scmp.ne.s32.totalorder %s8188_s5, %s7698_s8  ;;  %s80_s16 = int_to_ptr.vmem [resolvable:$true] %s79_s16 }
  0x2b   :  { %p7702_p3 = scmp.lt.u32.totalorder %s7698_s8, %s8188_s5 }
  0x2d   :  { %p7704_p4 = pnand %p7702_p3, %p7699_p2 }
  0x2f   :  { %7707 = shalt.err (!%p7704_p4)
}
  0x30   :  { %s7708_s23 = scalar_lea.vmem %s80_s16, 65536  ;;  %p7713_p6 = scmp.lt.s32.totalorder %s80_s16, %s80_s16 }
  0x31   :  { %p7709_p5 = scmp.ne.s32.totalorder %s80_s16, %s7708_s23  ;;  %p7714_p7 = scmp.lt.s32.totalorder %s7708_s23, %s7708_s23 }
  0x33   :  { %p7715_p8 = por %p7714_p7, %p7713_p6 }
  0x35   :  { %p7716_p9 = pnand %p7715_p8, %p7709_p5 }
  0x37   :  { %7719 = shalt.err (!%p7716_p9)
}
  0x38   :  { %s7869_s3 = smov 256   ;;  %s7870_s14 = smov 16  }
  0x39   :  { %85 = dma.hbm_to_vmem [thread:$0]  %s8188_s5, 65536, %s80_s16, [#allocation13], %s7869_s3, %s7869_s3, %s7870_s14  }
  0x3a   :  { %s7871_s26 = smov [#allocation3]   ;;  %s7872_s28 = smov [#allocation8]  }
  0x3b   :  { %s28_s27 = sshll.u32 %s7871_s26, 4  ;;  %s48_s29 = sshll.u32 %s7872_s28, 4  ;;  %s29_s27 = int_to_ptr.vmem [resolvable:$true] %s28_s27  ;;  %s49_s29 = int_to_ptr.vmem [resolvable:$true] %s48_s29 }
  0x3c   :  { %s7720_s1 = scalar_lea.hbm %s8183_s0, 16 }
  0x3d   :  { %p7721_p10 = scmp.ne.s32.totalorder %s8183_s0, %s7720_s1  ;;  %p7724_p11 = scmp.lt.u32.totalorder %s7720_s1, %s8183_s0 }
  0x3f   :  { %p7726_p12 = pnand %p7724_p11, %p7721_p10 }
  0x41   :  { %7729 = shalt.err (!%p7726_p12)
}
  0x42   :  { %s7730_s5 = scalar_lea.vmem %s29_s27, 16  ;;  %s7734_s16 = scalar_lea.vmem %s29_s27, 32 }
  0x43   :  { %p7731_p13 = scmp.ne.s32.totalorder %s29_s27, %s7730_s5  ;;  %p7735_p0 = scmp.lt.s32.totalorder %s29_s27, %s29_s27 }
  0x44   :  { %p7736_p1 = scmp.lt.s32.totalorder %s7734_s16, %s7730_s5 }
  0x46   :  { %p7737_p2 = por %p7736_p1, %p7735_p0 }
  0x48   :  { %p7738_p3 = pnand %p7737_p2, %p7731_p13 }
  0x4a   :  { %7741 = shalt.err (!%p7738_p3)
}
  0x4b   :  { %31 = dma.hbm_to_vmem [thread:$0]  %s8183_s0, 16, %s29_s27, [#allocation4]  }
  0x4c   :  { %s7742_s20 = scalar_lea.hbm %s8185_s2, 32 }
  0x4d   :  { %p7743_p4 = scmp.ne.s32.totalorder %s8185_s2, %s7742_s20  ;;  %p7746_p5 = scmp.lt.u32.totalorder %s7742_s20, %s8185_s2 }
  0x4f   :  { %p7748_p6 = pnand %p7746_p5, %p7743_p4 }
  0x51   :  { %7751 = shalt.err (!%p7748_p6)
}
  0x52   :  { %s7752_s14 = scalar_lea.vmem %s49_s29, 32  ;;  %p7757_p8 = scmp.lt.s32.totalorder %s49_s29, %s49_s29 }
  0x53   :  { %p7753_p7 = scmp.ne.s32.totalorder %s49_s29, %s7752_s14  ;;  %p7758_p9 = scmp.lt.s32.totalorder %s7752_s14, %s7752_s14 }
  0x55   :  { %p7759_p10 = por %p7758_p9, %p7757_p8 }
  0x57   :  { %p7760_p11 = pnand %p7759_p10, %p7753_p7 }
  0x59   :  { %7763 = shalt.err (!%p7760_p11)
}
  0x5a   :  { %51 = dma.hbm_to_vmem [thread:$0]  %s8185_s2, 32, %s49_s29, [#allocation7]  }
  0x5b   :  { %s7873_s25 = smov [#allocation11]   ;;  %s7874_s27 = smov [#allocation14]  }
  0x5c   :  { %s70_s26 = sshll.u32 %s7873_s25, 4  ;;  %s92_s28 = sshll.u32 %s7874_s27, 4  ;;  %s71_s26 = int_to_ptr.vmem [resolvable:$true] %s70_s26  ;;  %s93_s28 = int_to_ptr.vmem [resolvable:$true] %s92_s28 }
  0x5d   :  { %s7764_s1 = scalar_lea.hbm %s8187_s4, 256 }
  0x5e   :  { %p7765_p12 = scmp.ne.s32.totalorder %s8187_s4, %s7764_s1  ;;  %p7768_p13 = scmp.lt.u32.totalorder %s7764_s1, %s8187_s4 }
  0x60   :  { %p7770_p0 = pnand %p7768_p13, %p7765_p12 }
  0x62   :  { %7773 = shalt.err (!%p7770_p0)
}
  0x63   :  { %s7774_s2 = scalar_lea.vmem %s71_s26, 256  ;;  %p7779_p2 = scmp.lt.s32.totalorder %s71_s26, %s71_s26 }
  0x64   :  { %p7775_p1 = scmp.ne.s32.totalorder %s71_s26, %s7774_s2  ;;  %p7780_p3 = scmp.lt.s32.totalorder %s7774_s2, %s7774_s2 }
  0x66   :  { %p7781_p4 = por %p7780_p3, %p7779_p2 }
  0x68   :  { %p7782_p5 = pnand %p7781_p4, %p7775_p1 }
  0x6a   :  { %7785 = shalt.err (!%p7782_p5)
}
  0x6b   :  { %73 = dma.hbm_to_vmem [thread:$0]  %s8187_s4, 256, %s71_s26, [#allocation10]  }
  0x6c   :  { %s7786_s18 = scalar_lea.hbm %s8189_s6, 64 }
  0x6d   :  { %p7787_p6 = scmp.ne.s32.totalorder %s8189_s6, %s7786_s18  ;;  %p7790_p7 = scmp.lt.u32.totalorder %s7786_s18, %s8189_s6 }
  0x6f   :  { %p7792_p8 = pnand %p7790_p7, %p7787_p6 }
  0x71   :  { %7795 = shalt.err (!%p7792_p8)
}
  0x72   :  { %s7796_s22 = scalar_lea.vmem %s93_s28, 64  ;;  %p7801_p10 = scmp.lt.s32.totalorder %s93_s28, %s93_s28 }
  0x73   :  { %p7797_p9 = scmp.ne.s32.totalorder %s93_s28, %s7796_s22  ;;  %p7802_p11 = scmp.lt.s32.totalorder %s7796_s22, %s7796_s22 }
  0x75   :  { %p7803_p12 = por %p7802_p11, %p7801_p10 }
  0x77   :  { %p7804_p13 = pnand %p7803_p12, %p7797_p9 }
  0x79   :  { %7807 = shalt.err (!%p7804_p13)
}
  0x7a   :  { %95 = dma.hbm_to_vmem [thread:$0]  %s8189_s6, 64, %s93_s28, [#allocation13]  }
  0x7b   :  { %s7875_s3 = smov [#allocation15]   ;;  %s7808_s25 = scalar_lea.hbm %s8190_s7, 64 }
  0x7c   :  { %s102_s14 = sshll.u32 %s7875_s3, 4  ;;  %p7809_p0 = scmp.ne.s32.totalorder %s8190_s7, %s7808_s25  ;;  %s103_s14 = int_to_ptr.vmem [resolvable:$true] %s102_s14 }
  0x7d   :  { %p7812_p1 = scmp.lt.u32.totalorder %s7808_s25, %s8190_s7 }
  0x7f   :  { %p7814_p2 = pnand %p7812_p1, %p7809_p0 }
  0x81   :  { %7817 = shalt.err (!%p7814_p2)
}
  0x82   :  { %s7818_s1 = scalar_lea.vmem %s103_s14, 64  ;;  %p7823_p4 = scmp.lt.s32.totalorder %s103_s14, %s103_s14 }
  0x83   :  { %p7819_p3 = scmp.ne.s32.totalorder %s103_s14, %s7818_s1  ;;  %p7824_p5 = scmp.lt.s32.totalorder %s7818_s1, %s7818_s1 }
  0x85   :  { %p7825_p6 = por %p7824_p5, %p7823_p4 }
  0x87   :  { %p7826_p7 = pnand %p7825_p6, %p7819_p3 }
  0x89   :  { %7829 = shalt.err (!%p7826_p7)
}
  0x8a   :  { %105 = dma.hbm_to_vmem [thread:$0]  %s8190_s7, 64, %s103_s14, [#allocation16]  }
  0x8b   :  { %7852 = dma.done.wait [#allocation4], 16  }
  0x8c   :  { %7853 = vsyncadd [#allocation4], 4294967280 }
  0x8d   :  { %7854 = dma.done.wait [#allocation7], 64  }
  0x8e   :  { %7855 = vsyncadd [#allocation7], 4294967232 }
  0x8f   :  { %7856 = dma.done.wait [#allocation10], 33024  }
  0x90   :  { %7857 = vsyncadd [#allocation10], 4294934272 }
  0x91   :  { %7858 = dma.done.wait [#allocation13], 65600  }
  0x92   :  { %7859 = vsyncadd [#allocation13], 4294901696 }
  0x93   :  { %7860 = dma.done.wait [#allocation16], 64  }
  0x94   :  { %7861 = vsyncadd [#allocation16], 4294967232  ;;  %v132_v1 = vld [vmem:[#allocation3] sm:$0x1]  ;;  %v202_v2 = vld [vmem:[#allocation9] sm:$0xff]  ;;  %s7877_s7 = smov [#allocation17]  }
  0x95   :  { %133 = vxpose.xlu0.b32.start.end [1/1] (short) (narrow) %v132_v1, 8  ;;  %v210_v3 = vld [vmem:[#allocation9 + $0x40] sm:$0xff]  ;;  %v203_v4 = vld [vmem:[#allocation9 + $0x8] sm:$0xff]  ;;  %s6021_s11 = sshll.u32 %s7877_s7, 4  ;;  %vm6013_vm0 = vcmask 57344   ;;  %s6022_s11 = int_to_ptr.vmem [resolvable:$true] %s6021_s11 }
  0x96   :  { %v6035_v5 = vcombine.high %v202_v2, %v210_v3  ;;  %v211_v6 = vld [vmem:[#allocation9 + $0x48] sm:$0xff]  ;;  %v6034_v7 = vcombine.low %v202_v2, %v210_v3  ;;  %v218_v8 = vld [vmem:[#allocation9 + $0x80] sm:$0xff]  ;;  %s7830_s12 = scalar_lea.vmem %s6022_s11, 16  ;;  %s7834_s13 = scalar_lea.vmem %s6022_s11, 32 }
  0x97   :  { %v226_v9 = vld [vmem:[#allocation9 + $0xc0] sm:$0xff]  ;;  %v6037_v10 = vcombine.high %v203_v4, %v211_v6  ;;  %v6036_v11 = vcombine.low %v203_v4, %v211_v6  ;;  %v219_v13 = vld [vmem:[#allocation9 + $0x88] sm:$0xff]  ;;  %p7831_p8 = scmp.ne.s32.totalorder %s6022_s11, %s7830_s12  ;;  %p7835_p9 = scmp.lt.s32.totalorder %s6022_s11, %s6022_s11 }
  0x98   :  { %v6051_v12 = vcombine.high %v218_v8, %v226_v9  ;;  %v227_v14 = vld [vmem:[#allocation9 + $0xc8] sm:$0xff]  ;;  %v234_v15 = vld [vmem:[#allocation9 + $0x100] sm:$0xff]  ;;  %1822 = vmatprep.subr.bf16.mxu0 %v6035_v5  ;;  %v6050_v20 = vcombine.low %v218_v8, %v226_v9  ;;  %p7836_p10 = scmp.lt.s32.totalorder %s7834_s13, %s7830_s12 }
  0x99   :  { %v6053_v16 = vcombine.high %v219_v13, %v227_v14  ;;  %v242_v17 = vld [vmem:[#allocation9 + $0x140] sm:$0xff]  ;;  %v235_v18 = vld [vmem:[#allocation9 + $0x108] sm:$0xff]  ;;  %1863 = vmatprep.subr.bf16.mxu1 %v6037_v10  ;;  %1823 = vmatpush1.bf16.msra.mxu0 %v6034_v7  ;;  %v6052_v21 = vcombine.low %v219_v13, %v227_v14 }
  0x9a   :  { %v243_v19 = vld [vmem:[#allocation9 + $0x148] sm:$0xff]  ;;  %1864 = vmatpush1.bf16.msra.mxu1 %v6036_v11  ;;  %1824 = vmatprep.subr.bf16.mxu0 %v6051_v12  ;;  %v6067_v22 = vcombine.high %v234_v15, %v242_v17  ;;  %v250_v24 = vld [vmem:[#allocation9 + $0x180] sm:$0xff]  ;;  %v6066_v28 = vcombine.low %v234_v15, %v242_v17  ;;  %p7837_p11 = por %p7836_p10, %p7835_p9 }
  0x9b   :  { %1865 = vmatprep.subr.bf16.mxu1 %v6053_v16  ;;  %v6069_v23 = vcombine.high %v235_v18, %v243_v19  ;;  %v258_v25 = vld [vmem:[#allocation9 + $0x1c0] sm:$0xff]  ;;  %v251_v26 = vld [vmem:[#allocation9 + $0x188] sm:$0xff]  ;;  %v6068_v29 = vcombine.low %v235_v18, %v243_v19 }
  0x9c   :  { %v259_v27 = vld [vmem:[#allocation9 + $0x1c8] sm:$0xff]  ;;  %v6083_v30 = vcombine.high %v250_v24, %v258_v25  ;;  %v266_v32 = vld [vmem:[#allocation9 + $0x200] sm:$0xff]  ;;  %v6082_v36 = vcombine.low %v250_v24, %v258_v25  ;;  %p7838_p12 = pnand %p7837_p11, %p7831_p8 }
  0x9d   :  { %1825 = vmatpush1.bf16.msra.mxu0 %v6050_v20  ;;  %v6085_v31 = vcombine.high %v251_v26, %v259_v27  ;;  %v274_v33 = vld [vmem:[#allocation9 + $0x240] sm:$0xff]  ;;  %v267_v34 = vld [vmem:[#allocation9 + $0x208] sm:$0xff]  ;;  %v6084_v37 = vcombine.low %v251_v26, %v259_v27 }
  0x9e   :  { %1866 = vmatpush1.bf16.msra.mxu1 %v6052_v21  ;;  %1826 = vmatprep.subr.bf16.mxu0 %v6067_v22  ;;  %v275_v35 = vld [vmem:[#allocation9 + $0x248] sm:$0xff]  ;;  %v6099_v38 = vcombine.high %v266_v32, %v274_v33  ;;  %v282_v40 = vld [vmem:[#allocation9 + $0x280] sm:$0xff]  ;;  %v6098_v44 = vcombine.low %v266_v32, %v274_v33 }
  0x9f   :  { %1867 = vmatprep.subr.bf16.mxu1 %v6069_v23  ;;  %v6101_v39 = vcombine.high %v267_v34, %v275_v35  ;;  %v290_v41 = vld [vmem:[#allocation9 + $0x2c0] sm:$0xff]  ;;  %v283_v42 = vld [vmem:[#allocation9 + $0x288] sm:$0xff]  ;;  %v6100_v45 = vcombine.low %v267_v34, %v275_v35 }
  0xa0   :  { %v291_v43 = vld [vmem:[#allocation9 + $0x2c8] sm:$0xff]  ;;  %v6115_v46 = vcombine.high %v282_v40, %v290_v41  ;;  %v298_v48 = vld [vmem:[#allocation9 + $0x300] sm:$0xff]  ;;  %v6114_v52 = vcombine.low %v282_v40, %v290_v41 }
  0xa1   :  { %1827 = vmatpush1.bf16.msra.mxu0 %v6066_v28  ;;  %v6117_v47 = vcombine.high %v283_v42, %v291_v43  ;;  %v306_v49 = vld [vmem:[#allocation9 + $0x340] sm:$0xff]  ;;  %v299_v50 = vld [vmem:[#allocation9 + $0x308] sm:$0xff]  ;;  %v6116_v55 = vcombine.low %v283_v42, %v291_v43  ;;  %v7876_v28 = vmov 0  }
  0xa2   :  { %1868 = vmatpush1.bf16.msra.mxu1 %v6068_v29  ;;  %1828 = vmatprep.subr.bf16.mxu0 %v6083_v30  ;;  %v307_v51 = vld [vmem:[#allocation9 + $0x348] sm:$0xff]  ;;  %v314_v53 = vld [vmem:[#allocation9 + $0x380] sm:$0xff]  ;;  %v6131_v56 = vcombine.high %v298_v48, %v306_v49  ;;  %v6130_v60 = vcombine.low %v298_v48, %v306_v49 }
  0xa3   :  { %1869 = vmatprep.subr.bf16.mxu1 %v6085_v31  ;;  %v322_v54 = vld [vmem:[#allocation9 + $0x3c0] sm:$0xff]  ;;  %v315_v57 = vld [vmem:[#allocation9 + $0x388] sm:$0xff]  ;;  %v6133_v59 = vcombine.high %v299_v50, %v307_v51  ;;  %v6132_v63 = vcombine.low %v299_v50, %v307_v51 }
  0xa4   :  { %v323_v58 = vld [vmem:[#allocation9 + $0x3c8] sm:$0xff]  ;;  %v330_v61 = vld [vmem:[#allocation9 + $0x400] sm:$0xff]  ;;  %v6147_v0 = vcombine.high %v314_v53, %v322_v54  ;;  %v6146_v4 = vcombine.low %v314_v53, %v322_v54 }
  0xa5   :  { %1829 = vmatpush1.bf16.msra.mxu0 %v6082_v36  ;;  %v338_v62 = vld [vmem:[#allocation9 + $0x440] sm:$0xff]  ;;  %v331_v1 = vld [vmem:[#allocation9 + $0x408] sm:$0xff]  ;;  %v6149_v3 = vcombine.high %v315_v57, %v323_v58  ;;  %v6148_v7 = vcombine.low %v315_v57, %v323_v58 }
  0xa6   :  { %1870 = vmatpush1.bf16.msra.mxu1 %v6084_v37  ;;  %1830 = vmatprep.subr.bf16.mxu0 %v6099_v38  ;;  %v339_v2 = vld [vmem:[#allocation9 + $0x448] sm:$0xff]  ;;  %v346_v5 = vld [vmem:[#allocation9 + $0x480] sm:$0xff]  ;;  %v6163_v8 = vcombine.high %v330_v61, %v338_v62  ;;  %v6162_v12 = vcombine.low %v330_v61, %v338_v62 }
  0xa7   :  { %1871 = vmatprep.subr.bf16.mxu1 %v6101_v39  ;;  %v354_v6 = vld [vmem:[#allocation9 + $0x4c0] sm:$0xff]  ;;  %v347_v9 = vld [vmem:[#allocation9 + $0x488] sm:$0xff]  ;;  %v6165_v11 = vcombine.high %v331_v1, %v339_v2  ;;  %v6164_v15 = vcombine.low %v331_v1, %v339_v2 }
  0xa8   :  { %v355_v10 = vld [vmem:[#allocation9 + $0x4c8] sm:$0xff]  ;;  %v362_v13 = vld [vmem:[#allocation9 + $0x500] sm:$0xff]  ;;  %v6179_v16 = vcombine.high %v346_v5, %v354_v6  ;;  %v6178_v20 = vcombine.low %v346_v5, %v354_v6  ;;  %v212_v5 = vld [vmem:[#allocation9 + $0x50] sm:$0xff] }
  0xa9   :  { %1831 = vmatpush1.bf16.msra.mxu0 %v6098_v44  ;;  %v370_v14 = vld [vmem:[#allocation9 + $0x540] sm:$0xff]  ;;  %v363_v17 = vld [vmem:[#allocation9 + $0x508] sm:$0xff]  ;;  %v6181_v19 = vcombine.high %v347_v9, %v355_v10  ;;  %v6180_v23 = vcombine.low %v347_v9, %v355_v10  ;;  %v205_v6 = vld [vmem:[#allocation9 + $0x18] sm:$0xff] }
  0xaa   :  { %1872 = vmatpush1.bf16.msra.mxu1 %v6100_v45  ;;  %1832 = vmatprep.subr.bf16.mxu0 %v6115_v46  ;;  %v371_v18 = vld [vmem:[#allocation9 + $0x548] sm:$0xff]  ;;  %v378_v21 = vld [vmem:[#allocation9 + $0x580] sm:$0xff]  ;;  %v6195_v24 = vcombine.high %v362_v13, %v370_v14  ;;  %v6194_v29 = vcombine.low %v362_v13, %v370_v14 }
  0xab   :  { %1873 = vmatprep.subr.bf16.mxu1 %v6117_v47  ;;  %v386_v22 = vld [vmem:[#allocation9 + $0x5c0] sm:$0xff]  ;;  %v379_v25 = vld [vmem:[#allocation9 + $0x588] sm:$0xff]  ;;  %v6197_v27 = vcombine.high %v363_v17, %v371_v18  ;;  %v6196_v32 = vcombine.low %v363_v17, %v371_v18  ;;  %v184_v17 = vld [vmem:[#allocation8] sm:$0x3] }
  0xac   :  { %v387_v26 = vld [vmem:[#allocation9 + $0x5c8] sm:$0xff]  ;;  %v394_v30 = vld [vmem:[#allocation9 + $0x600] sm:$0xff]  ;;  %v6211_v33 = vcombine.high %v378_v21, %v386_v22  ;;  %v6210_v37 = vcombine.low %v378_v21, %v386_v22 }
  0xad   :  { %1833 = vmatpush1.bf16.msra.mxu0 %v6114_v52  ;;  %v402_v31 = vld [vmem:[#allocation9 + $0x640] sm:$0xff]  ;;  %v395_v34 = vld [vmem:[#allocation9 + $0x608] sm:$0xff]  ;;  %v6213_v36 = vcombine.high %v379_v25, %v387_v26  ;;  %v6212_v40 = vcombine.low %v379_v25, %v387_v26 }
  0xae   :  { %1874 = vmatpush1.bf16.msra.mxu1 %v6116_v55  ;;  %1834 = vmatprep.subr.bf16.mxu0 %v6131_v56  ;;  %v403_v35 = vld [vmem:[#allocation9 + $0x648] sm:$0xff]  ;;  %v410_v38 = vld [vmem:[#allocation9 + $0x680] sm:$0xff]  ;;  %v6227_v41 = vcombine.high %v394_v30, %v402_v31  ;;  %v6226_v45 = vcombine.low %v394_v30, %v402_v31  ;;  %v228_v30 = vld [vmem:[#allocation9 + $0xd0] sm:$0xff] }
  0xaf   :  { %1875 = vmatprep.subr.bf16.mxu1 %v6133_v59  ;;  %v418_v39 = vld [vmem:[#allocation9 + $0x6c0] sm:$0xff]  ;;  %v411_v42 = vld [vmem:[#allocation9 + $0x688] sm:$0xff]  ;;  %v6229_v44 = vcombine.high %v395_v34, %v403_v35  ;;  %v6228_v46 = vcombine.low %v395_v34, %v403_v35  ;;  %v221_v31 = vld [vmem:[#allocation9 + $0x98] sm:$0xff] }
  0xb0   :  { %v419_v43 = vld [vmem:[#allocation9 + $0x6c8] sm:$0xff]  ;;  %v6243_v47 = vcombine.high %v410_v38, %v418_v39  ;;  %v6242_v49 = vcombine.low %v410_v38, %v418_v39  ;;  %v426_v51 = vld [vmem:[#allocation9 + $0x700] sm:$0xff]  ;;  %v236_v35 = vld [vmem:[#allocation9 + $0x110] sm:$0xff] }
  0xb1   :  { %1835 = vmatpush1.bf16.msra.mxu0 %v6130_v60  ;;  %v6245_v48 = vcombine.high %v411_v42, %v419_v43  ;;  %v6244_v50 = vcombine.low %v411_v42, %v419_v43  ;;  %v434_v52 = vld [vmem:[#allocation9 + $0x740] sm:$0xff]  ;;  %v427_v53 = vld [vmem:[#allocation9 + $0x708] sm:$0xff]  ;;  %v244_v38 = vld [vmem:[#allocation9 + $0x150] sm:$0xff] }
  0xb2   :  { %1876 = vmatpush1.bf16.msra.mxu1 %v6132_v63  ;;  %1836 = vmatprep.subr.bf16.mxu0 %v6147_v0  ;;  %v6259_v54 = vcombine.high %v426_v51, %v434_v52  ;;  %v435_v55 = vld [vmem:[#allocation9 + $0x748] sm:$0xff]  ;;  %v6258_v58 = vcombine.low %v426_v51, %v434_v52  ;;  %v442_v60 = vld [vmem:[#allocation9 + $0x780] sm:$0xff]  ;;  %v237_v39 = vld [vmem:[#allocation9 + $0x118] sm:$0xff]  ;;  %v6071_v43 = vcombine.high %v236_v35, %v244_v38 }
  0xb3   :  { %1877 = vmatprep.subr.bf16.mxu1 %v6149_v3  ;;  %v6261_v57 = vcombine.high %v427_v53, %v435_v55  ;;  %v6260_v59 = vcombine.low %v427_v53, %v435_v55  ;;  %v450_v61 = vld [vmem:[#allocation9 + $0x7c0] sm:$0xff]  ;;  %v443_v62 = vld [vmem:[#allocation9 + $0x788] sm:$0xff]  ;;  %v268_v53 = vld [vmem:[#allocation9 + $0x210] sm:$0xff] }
  0xb4   :  { %v6275_v63 = vcombine.high %v442_v60, %v450_v61  ;;  %v451_v0 = vld [vmem:[#allocation9 + $0x7c8] sm:$0xff]  ;;  %v6274_v2 = vcombine.low %v442_v60, %v450_v61  ;;  %v269_v55 = vld [vmem:[#allocation9 + $0x218] sm:$0xff]  ;;  %v284_v61 = vld [vmem:[#allocation9 + $0x290] sm:$0xff] }
  0xb5   :  { %1837 = vmatpush1.bf16.msra.mxu0 %v6146_v4  ;;  %v6277_v1 = vcombine.high %v443_v62, %v451_v0  ;;  %v6276_v3 = vcombine.low %v443_v62, %v451_v0  ;;  %v204_v4 = vld [vmem:[#allocation9 + $0x10] sm:$0xff]  ;;  %v293_v0 = vld [vmem:[#allocation9 + $0x2d8] sm:$0xff] }
  0xb6   :  { %1878 = vmatpush1.bf16.msra.mxu1 %v6148_v7  ;;  %1838 = vmatprep.subr.bf16.mxu0 %v6163_v8  ;;  %v6039_v7 = vcombine.high %v204_v4, %v212_v5  ;;  %v213_v8 = vld [vmem:[#allocation9 + $0x58] sm:$0xff]  ;;  %v6038_v9 = vcombine.low %v204_v4, %v212_v5  ;;  %v292_v62 = vld [vmem:[#allocation9 + $0x2d0] sm:$0xff] }
  0xb7   :  { %1879 = vmatprep.subr.bf16.mxu1 %v6165_v11  ;;  %v6040_v10 = vcombine.low %v205_v6, %v213_v8  ;;  %v6041_v11 = vcombine.high %v205_v6, %v213_v8  ;;  %v300_v5 = vld [vmem:[#allocation9 + $0x310] sm:$0xff]  ;;  %v309_v8 = vld [vmem:[#allocation9 + $0x358] sm:$0xff] }
  0xb8   :  { %v308_v6 = vld [vmem:[#allocation9 + $0x350] sm:$0xff] }
  0xb9   :  { %1839 = vmatpush1.bf16.msra.mxu0 %v6162_v12  ;;  %v172_v12 = vlaneseq }
  0xba   :  { %1880 = vmatpush1.bf16.msra.mxu1 %v6164_v15  ;;  %1840 = vmatprep.subr.bf16.mxu0 %v6179_v16  ;;  %v165_v16 = vld [vmem:[#allocation6] sm:$0x3] }
  0xbb   :  { %1881 = vmatprep.subr.bf16.mxu1 %v6181_v19  ;;  %v8034_v13 = vshrl.u32 %v172_v12, 7 }
  0xbd   :  { %1841 = vmatpush1.bf16.msra.mxu0 %v6178_v20  ;;  %v8037_v14 = vsub.s32 0, %v8034_v13  ;;  %v8040_v15 = vsub.s32 1, %v8034_v13 }
  0xbe   :  { %6879 = vset.pattern.permute.xlu0 %v7876_v28  ;;  %1882 = vmatpush1.bf16.msra.mxu1 %v6180_v23 }
  0xbf   :  { %1842 = vmatprep.subr.bf16.mxu0 %v6195_v24  ;;  %1883 = vmatprep.subr.bf16.mxu1 %v6197_v27  ;;  %v175_v18 = vrot.slane %v165_v16, %v8037_v14  ;;  %v179_v19 = vrot.slane %v165_v16, %v8040_v15  ;;  %v189_v20 = vrot.slane %v184_v17, %v8037_v14  ;;  %v316_v16 = vld [vmem:[#allocation9 + $0x390] sm:$0xff] }
  0xc0   :  { %v193_v21 = vrot.slane %v184_v17, %v8040_v15  ;;  %v324_v17 = vld [vmem:[#allocation9 + $0x3d0] sm:$0xff] }
  0xc1   :  { %1843 = vmatpush1.bf16.msra.mxu0 %v6194_v29  ;;  %v220_v29 = vld [vmem:[#allocation9 + $0x90] sm:$0xff] }
  0xc2   :  { %1884 = vmatpush1.bf16.msra.mxu1 %v6196_v32  ;;  %1844 = vmatprep.subr.bf16.mxu0 %v6211_v33  ;;  %v229_v32 = vld [vmem:[#allocation9 + $0xd8] sm:$0xff] }
  0xc3   :  { %1885 = vmatprep.subr.bf16.mxu1 %v6213_v36  ;;  %v6055_v36 = vcombine.high %v220_v29, %v228_v30  ;;  %v6056_v42 = vcombine.low %v221_v31, %v229_v32 }
  0xc5   :  { %1845 = vmatpush1.bf16.msra.mxu0 %v6210_v37  ;;  %v6057_v37 = vcombine.high %v221_v31, %v229_v32  ;;  %v348_v32 = vld [vmem:[#allocation9 + $0x490] sm:$0xff] }
  0xc6   :  { %1886 = vmatpush1.bf16.msra.mxu1 %v6212_v40  ;;  %1846 = vmatprep.subr.bf16.mxu0 %v6227_v41  ;;  %v245_v40 = vld [vmem:[#allocation9 + $0x158] sm:$0xff]  ;;  %v6054_v41 = vcombine.low %v220_v29, %v228_v30 }
  0xc7   :  { %1887 = vmatprep.subr.bf16.mxu1 %v6229_v44  ;;  %v6073_v44 = vcombine.high %v237_v39, %v245_v40 }
  0xc9   :  { %1847 = vmatpush1.bf16.msra.mxu0 %v6226_v45  ;;  %v252_v45 = vld [vmem:[#allocation9 + $0x190] sm:$0xff] }
  0xca   :  { %1888 = vmatpush1.bf16.msra.mxu1 %v6228_v46  ;;  %1848 = vmatprep.subr.bf16.mxu0 %v6243_v47  ;;  %v260_v46 = vld [vmem:[#allocation9 + $0x1d0] sm:$0xff]  ;;  %v253_v47 = vld [vmem:[#allocation9 + $0x198] sm:$0xff] }
  0xcb   :  { %1889 = vmatprep.subr.bf16.mxu1 %v6245_v48  ;;  %v261_v48 = vld [vmem:[#allocation9 + $0x1d8] sm:$0xff]  ;;  %v6087_v51 = vcombine.high %v252_v45, %v260_v46 }
  0xcc   :  { %v6089_v52 = vcombine.high %v253_v47, %v261_v48 }
  0xcd   :  { %1849 = vmatpush1.bf16.msra.mxu0 %v6242_v49  ;;  %v6070_v49 = vcombine.low %v236_v35, %v244_v38  ;;  %v356_v35 = vld [vmem:[#allocation9 + $0x4d0] sm:$0xff] }
  0xce   :  { %1890 = vmatpush1.bf16.msra.mxu1 %v6244_v50  ;;  %1850 = vmatprep.subr.bf16.mxu0 %v6259_v54  ;;  %v6072_v50 = vcombine.low %v237_v39, %v245_v40  ;;  %v276_v54 = vld [vmem:[#allocation9 + $0x250] sm:$0xff]  ;;  %v6183_v40 = vcombine.high %v348_v32, %v356_v35 }
  0xcf   :  { %1891 = vmatprep.subr.bf16.mxu1 %v6261_v57  ;;  %v6086_v57 = vcombine.low %v252_v45, %v260_v46  ;;  %v373_v45 = vld [vmem:[#allocation9 + $0x558] sm:$0xff]  ;;  %v6182_v46 = vcombine.low %v348_v32, %v356_v35  ;;  %v215_v32 = vld [vmem:[#allocation9 + $0x68] sm:$0xff] }
  0xd1   :  { %1851 = vmatpush1.bf16.msra.mxu0 %v6258_v58  ;;  %v6088_v58 = vcombine.low %v253_v47, %v261_v48 }
  0xd2   :  { %1892 = vmatpush1.bf16.msra.mxu1 %v6260_v59  ;;  %1852 = vmatprep.subr.bf16.mxu0 %v6275_v63  ;;  %v6103_v59 = vcombine.high %v268_v53, %v276_v54  ;;  %v285_v63 = vld [vmem:[#allocation9 + $0x298] sm:$0xff] }
  0xd3   :  { %1893 = vmatprep.subr.bf16.mxu1 %v6277_v1  ;;  %v6102_v1 = vcombine.low %v268_v53, %v276_v54  ;;  %v6121_v4 = vcombine.high %v285_v63, %v293_v0  ;;  %v389_v53 = vld [vmem:[#allocation9 + $0x5d8] sm:$0xff] }
  0xd5   :  { %1853 = vmatpush1.bf16.msra.mxu0 %v6274_v2 }
  0xd6   :  { %1894 = vmatpush1.bf16.msra.mxu1 %v6276_v3  ;;  %1904 = vmatprep.subr.bf16.mxu0 %v6039_v7  ;;  %v6119_v3 = vcombine.high %v284_v61, %v292_v62  ;;  %v301_v7 = vld [vmem:[#allocation9 + $0x318] sm:$0xff] }
  0xd7   :  { %1945 = vmatprep.subr.bf16.mxu1 %v6041_v11  ;;  %v6135_v11 = vcombine.high %v300_v5, %v308_v6  ;;  %v6137_v12 = vcombine.high %v301_v7, %v309_v8 }
 0x115   :  { %v149_v56 = vpop.trf.xlu0 }
 0x116   :  { %168 = vperm.xlu0 %6879, %v149_v56   ;;  %v277_v56 = vld [vmem:[#allocation9 + $0x258] sm:$0xff] }
 0x117   :  { %v6105_v60 = vcombine.high %v269_v55, %v277_v56  ;;  %v6104_v2 = vcombine.low %v269_v55, %v277_v56 }
 0x195   :  { %v169_v22 = vpop.permute.xlu0 %168 }
 0x196   :  { %v182_v23 = vmul.f32 %v175_v18, %v169_v22  ;;  %v183_v24 = vmul.f32 %v179_v19, %v169_v22  ;;  %v317_v18 = vld [vmem:[#allocation9 + $0x398] sm:$0xff]  ;;  %v6151_v22 = vcombine.high %v316_v16, %v324_v17 }
 0x197   :  { %v325_v19 = vld [vmem:[#allocation9 + $0x3d8] sm:$0xff] }
 0x198   :  { %v196_v25 = vadd.f32 %v189_v20, %v182_v23  ;;  %v197_v26 = vadd.f32 %v193_v21, %v183_v24  ;;  %v6134_v20 = vcombine.low %v300_v5, %v308_v6  ;;  %v6136_v21 = vcombine.low %v301_v7, %v309_v8  ;;  %v332_v24 = vld [vmem:[#allocation9 + $0x410] sm:$0xff]  ;;  %v421_v5 = vld [vmem:[#allocation9 + $0x6d8] sm:$0xff] }
 0x199   :  { %v6153_v23 = vcombine.high %v317_v18, %v325_v19  ;;  %v6152_v29 = vcombine.low %v317_v18, %v325_v19 }
 0x19a   :  { %v198_v27 = vmax.f32 %v196_v25, 0.0  ;;  %v199_v28 = vmax.f32 %v197_v26, 0.0  ;;  %v340_v25 = vld [vmem:[#allocation9 + $0x450] sm:$0xff]  ;;  %v333_v26 = vld [vmem:[#allocation9 + $0x418] sm:$0xff] }
 0x19b   :  { %v6167_v30 = vcombine.high %v332_v24, %v340_v25  ;;  %v6166_v38 = vcombine.low %v332_v24, %v340_v25  ;;  %v453_v24 = vld [vmem:[#allocation9 + $0x7d8] sm:$0xff] }
 0x19c   :  { %v8046_v33 = vpack.c.bf16 %v198_v27, %v198_v27  ;;  %v8048_v34 = vpack.c.bf16 %v199_v28, %v199_v28  ;;  %v341_v27 = vld [vmem:[#allocation9 + $0x458] sm:$0xff]  ;;  %v6150_v28 = vcombine.low %v316_v16, %v324_v17 }
 0x19d   :  { %v6169_v31 = vcombine.high %v333_v26, %v341_v27  ;;  %v6168_v39 = vcombine.low %v333_v26, %v341_v27  ;;  %v437_v16 = vld [vmem:[#allocation9 + $0x758] sm:$0xff] }
 0x19e   :  { %1854 = vmatprep.mubr.bf16.mxu0 %v8048_v34  ;;  %1895 = vmatprep.mubr.bf16.mxu1 %v8048_v34 }
 0x19f   :  { %1855 = vmatmul.mubr.bf16.vlgmr.msra.gmra.mrb[0].mxu0 %v8046_v33  ;;  %1896 = vmatmul.mubr.bf16.vlgmr.msra.gmra.mrb[0].mxu1 %v8046_v33 }
 0x1a0   :  { %1905 = vmatpush1.bf16.msra.mxu0 %v6038_v9  ;;  %1946 = vmatpush1.bf16.msra.mxu1 %v6040_v10  ;;  %v6118_v9 = vcombine.low %v284_v61, %v292_v62  ;;  %v6120_v10 = vcombine.low %v285_v63, %v293_v0  ;;  %v405_v61 = vld [vmem:[#allocation9 + $0x658] sm:$0xff] }
 0x1a1   :  { %1936 = vmatprep.mubr.bf16.mxu0 %v8048_v34  ;;  %1977 = vmatprep.mubr.bf16.mxu1 %v8048_v34 }
 0x1a2   :  { %1906 = vmatprep.subr.bf16.mxu0 %v6055_v36  ;;  %1947 = vmatprep.subr.bf16.mxu1 %v6057_v37  ;;  %v349_v36 = vld [vmem:[#allocation9 + $0x498] sm:$0xff] }
 0x1a3   :  { %v357_v37 = vld [vmem:[#allocation9 + $0x4d8] sm:$0xff] }
 0x1a4   :  { %1907 = vmatpush1.bf16.msra.mxu0 %v6054_v41  ;;  %1948 = vmatpush1.bf16.msra.mxu1 %v6056_v42  ;;  %v6185_v41 = vcombine.high %v349_v36, %v357_v37  ;;  %v364_v42 = vld [vmem:[#allocation9 + $0x510] sm:$0xff]  ;;  %v6184_v47 = vcombine.low %v349_v36, %v357_v37 }
 0x1a5   :  { %1908 = vmatprep.subr.bf16.mxu0 %v6071_v43  ;;  %1949 = vmatprep.subr.bf16.mxu1 %v6073_v44  ;;  %v372_v43 = vld [vmem:[#allocation9 + $0x550] sm:$0xff]  ;;  %v365_v44 = vld [vmem:[#allocation9 + $0x518] sm:$0xff] }
 0x1a6   :  { %v6199_v48 = vcombine.high %v364_v42, %v372_v43  ;;  %v6198_v54 = vcombine.low %v364_v42, %v372_v43  ;;  %v6200_v55 = vcombine.low %v365_v44, %v373_v45  ;;  %v231_v42 = vld [vmem:[#allocation9 + $0xe8] sm:$0xff] }
 0x1a8   :  { %1909 = vmatpush1.bf16.msra.mxu0 %v6070_v49  ;;  %1950 = vmatpush1.bf16.msra.mxu1 %v6072_v50  ;;  %v6201_v49 = vcombine.high %v365_v44, %v373_v45  ;;  %v380_v50 = vld [vmem:[#allocation9 + $0x590] sm:$0xff] }
 0x1a9   :  { %1910 = vmatprep.subr.bf16.mxu0 %v6087_v51  ;;  %1951 = vmatprep.subr.bf16.mxu1 %v6089_v52  ;;  %v388_v51 = vld [vmem:[#allocation9 + $0x5d0] sm:$0xff]  ;;  %v381_v52 = vld [vmem:[#allocation9 + $0x598] sm:$0xff] }
 0x1aa   :  { %v6215_v56 = vcombine.high %v380_v50, %v388_v51  ;;  %v6214_v62 = vcombine.low %v380_v50, %v388_v51  ;;  %v6216_v63 = vcombine.low %v381_v52, %v389_v53  ;;  %v247_v50 = vld [vmem:[#allocation9 + $0x168] sm:$0xff] }
 0x1ac   :  { %1911 = vmatpush1.bf16.msra.mxu0 %v6086_v57  ;;  %1952 = vmatpush1.bf16.msra.mxu1 %v6088_v58  ;;  %v6217_v57 = vcombine.high %v381_v52, %v389_v53  ;;  %v396_v58 = vld [vmem:[#allocation9 + $0x610] sm:$0xff] }
 0x1ad   :  { %1912 = vmatprep.subr.bf16.mxu0 %v6103_v59  ;;  %1953 = vmatprep.subr.bf16.mxu1 %v6105_v60  ;;  %v404_v59 = vld [vmem:[#allocation9 + $0x650] sm:$0xff]  ;;  %v397_v60 = vld [vmem:[#allocation9 + $0x618] sm:$0xff] }
 0x1ae   :  { %v6231_v0 = vcombine.high %v396_v58, %v404_v59  ;;  %v6230_v6 = vcombine.low %v396_v58, %v404_v59  ;;  %v6232_v7 = vcombine.low %v397_v60, %v405_v61  ;;  %v263_v58 = vld [vmem:[#allocation9 + $0x1e8] sm:$0xff] }
 0x1b0   :  { %1913 = vmatpush1.bf16.msra.mxu0 %v6102_v1  ;;  %1954 = vmatpush1.bf16.msra.mxu1 %v6104_v2  ;;  %v6233_v1 = vcombine.high %v397_v60, %v405_v61  ;;  %v412_v2 = vld [vmem:[#allocation9 + $0x690] sm:$0xff] }
 0x1b1   :  { %1914 = vmatprep.subr.bf16.mxu0 %v6119_v3  ;;  %1955 = vmatprep.subr.bf16.mxu1 %v6121_v4  ;;  %v420_v3 = vld [vmem:[#allocation9 + $0x6d0] sm:$0xff]  ;;  %v413_v4 = vld [vmem:[#allocation9 + $0x698] sm:$0xff] }
 0x1b2   :  { %v6247_v8 = vcombine.high %v412_v2, %v420_v3  ;;  %v6246_v17 = vcombine.low %v412_v2, %v420_v3  ;;  %v6248_v18 = vcombine.low %v413_v4, %v421_v5  ;;  %v279_v2 = vld [vmem:[#allocation9 + $0x268] sm:$0xff] }
 0x1b4   :  { %1915 = vmatpush1.bf16.msra.mxu0 %v6118_v9  ;;  %1956 = vmatpush1.bf16.msra.mxu1 %v6120_v10  ;;  %v6249_v9 = vcombine.high %v413_v4, %v421_v5  ;;  %v428_v10 = vld [vmem:[#allocation9 + $0x710] sm:$0xff] }
 0x1b5   :  { %1916 = vmatprep.subr.bf16.mxu0 %v6135_v11  ;;  %1957 = vmatprep.subr.bf16.mxu1 %v6137_v12  ;;  %v436_v11 = vld [vmem:[#allocation9 + $0x750] sm:$0xff]  ;;  %v429_v12 = vld [vmem:[#allocation9 + $0x718] sm:$0xff] }
 0x1b6   :  { %v6263_v19 = vcombine.high %v428_v10, %v436_v11  ;;  %v6262_v25 = vcombine.low %v428_v10, %v436_v11  ;;  %v6264_v26 = vcombine.low %v429_v12, %v437_v16  ;;  %v295_v10 = vld [vmem:[#allocation9 + $0x2e8] sm:$0xff] }
 0x1b8   :  { %1917 = vmatpush1.bf16.msra.mxu0 %v6134_v20  ;;  %1958 = vmatpush1.bf16.msra.mxu1 %v6136_v21  ;;  %v6265_v20 = vcombine.high %v429_v12, %v437_v16  ;;  %v444_v21 = vld [vmem:[#allocation9 + $0x790] sm:$0xff] }
 0x1b9   :  { %1918 = vmatprep.subr.bf16.mxu0 %v6151_v22  ;;  %1959 = vmatprep.subr.bf16.mxu1 %v6153_v23  ;;  %v452_v22 = vld [vmem:[#allocation9 + $0x7d0] sm:$0xff]  ;;  %v445_v23 = vld [vmem:[#allocation9 + $0x798] sm:$0xff] }
 0x1ba   :  { %v6279_v27 = vcombine.high %v444_v21, %v452_v22  ;;  %v6278_v35 = vcombine.low %v444_v21, %v452_v22  ;;  %v6280_v36 = vcombine.low %v445_v23, %v453_v24  ;;  %v311_v21 = vld [vmem:[#allocation9 + $0x368] sm:$0xff] }
 0x1bc   :  { %1919 = vmatpush1.bf16.msra.mxu0 %v6150_v28  ;;  %1960 = vmatpush1.bf16.msra.mxu1 %v6152_v29  ;;  %v6281_v28 = vcombine.high %v445_v23, %v453_v24  ;;  %v206_v29 = vld [vmem:[#allocation9 + $0x20] sm:$0xff] }
 0x1bd   :  { %1920 = vmatprep.subr.bf16.mxu0 %v6167_v30  ;;  %1961 = vmatprep.subr.bf16.mxu1 %v6169_v31  ;;  %v214_v30 = vld [vmem:[#allocation9 + $0x60] sm:$0xff]  ;;  %v207_v31 = vld [vmem:[#allocation9 + $0x28] sm:$0xff] }
 0x1be   :  { %v6043_v37 = vcombine.high %v206_v29, %v214_v30  ;;  %v6042_v43 = vcombine.low %v206_v29, %v214_v30  ;;  %v6044_v44 = vcombine.low %v207_v31, %v215_v32  ;;  %v327_v29 = vld [vmem:[#allocation9 + $0x3e8] sm:$0xff] }
 0x1c0   :  { %1921 = vmatpush1.bf16.msra.mxu0 %v6166_v38  ;;  %1962 = vmatpush1.bf16.msra.mxu1 %v6168_v39  ;;  %v6045_v38 = vcombine.high %v207_v31, %v215_v32  ;;  %v222_v39 = vld [vmem:[#allocation9 + $0xa0] sm:$0xff] }
 0x1c1   :  { %1922 = vmatprep.subr.bf16.mxu0 %v6183_v40  ;;  %1963 = vmatprep.subr.bf16.mxu1 %v6185_v41  ;;  %v230_v40 = vld [vmem:[#allocation9 + $0xe0] sm:$0xff]  ;;  %v223_v41 = vld [vmem:[#allocation9 + $0xa8] sm:$0xff] }
 0x1c2   :  { %v6059_v45 = vcombine.high %v222_v39, %v230_v40  ;;  %v6058_v51 = vcombine.low %v222_v39, %v230_v40  ;;  %v6060_v52 = vcombine.low %v223_v41, %v231_v42  ;;  %v343_v39 = vld [vmem:[#allocation9 + $0x468] sm:$0xff] }
 0x1c4   :  { %1923 = vmatpush1.bf16.msra.mxu0 %v6182_v46  ;;  %1964 = vmatpush1.bf16.msra.mxu1 %v6184_v47  ;;  %v6061_v46 = vcombine.high %v223_v41, %v231_v42  ;;  %v238_v47 = vld [vmem:[#allocation9 + $0x120] sm:$0xff] }
 0x1c5   :  { %1924 = vmatprep.subr.bf16.mxu0 %v6199_v48  ;;  %1965 = vmatprep.subr.bf16.mxu1 %v6201_v49  ;;  %v246_v48 = vld [vmem:[#allocation9 + $0x160] sm:$0xff]  ;;  %v239_v49 = vld [vmem:[#allocation9 + $0x128] sm:$0xff] }
 0x1c6   :  { %v6075_v53 = vcombine.high %v238_v47, %v246_v48  ;;  %v6074_v59 = vcombine.low %v238_v47, %v246_v48  ;;  %v6076_v60 = vcombine.low %v239_v49, %v247_v50  ;;  %v359_v47 = vld [vmem:[#allocation9 + $0x4e8] sm:$0xff] }
 0x1c8   :  { %1925 = vmatpush1.bf16.msra.mxu0 %v6198_v54  ;;  %1966 = vmatpush1.bf16.msra.mxu1 %v6200_v55  ;;  %v6077_v54 = vcombine.high %v239_v49, %v247_v50  ;;  %v254_v55 = vld [vmem:[#allocation9 + $0x1a0] sm:$0xff] }
 0x1c9   :  { %1926 = vmatprep.subr.bf16.mxu0 %v6215_v56  ;;  %1967 = vmatprep.subr.bf16.mxu1 %v6217_v57  ;;  %v262_v56 = vld [vmem:[#allocation9 + $0x1e0] sm:$0xff]  ;;  %v255_v57 = vld [vmem:[#allocation9 + $0x1a8] sm:$0xff] }
 0x1ca   :  { %v6091_v61 = vcombine.high %v254_v55, %v262_v56  ;;  %v6090_v3 = vcombine.low %v254_v55, %v262_v56  ;;  %v6092_v4 = vcombine.low %v255_v57, %v263_v58  ;;  %v375_v55 = vld [vmem:[#allocation9 + $0x568] sm:$0xff] }
 0x1cc   :  { %1927 = vmatpush1.bf16.msra.mxu0 %v6214_v62  ;;  %1968 = vmatpush1.bf16.msra.mxu1 %v6216_v63  ;;  %v6093_v62 = vcombine.high %v255_v57, %v263_v58  ;;  %v270_v63 = vld [vmem:[#allocation9 + $0x220] sm:$0xff] }
 0x1cd   :  { %1928 = vmatprep.subr.bf16.mxu0 %v6231_v0  ;;  %1969 = vmatprep.subr.bf16.mxu1 %v6233_v1  ;;  %v278_v0 = vld [vmem:[#allocation9 + $0x260] sm:$0xff]  ;;  %v271_v1 = vld [vmem:[#allocation9 + $0x228] sm:$0xff] }
 0x1ce   :  { %v6107_v5 = vcombine.high %v270_v63, %v278_v0  ;;  %v6106_v11 = vcombine.low %v270_v63, %v278_v0  ;;  %v6108_v12 = vcombine.low %v271_v1, %v279_v2  ;;  %v391_v63 = vld [vmem:[#allocation9 + $0x5e8] sm:$0xff] }
 0x1d0   :  { %1929 = vmatpush1.bf16.msra.mxu0 %v6230_v6  ;;  %1970 = vmatpush1.bf16.msra.mxu1 %v6232_v7  ;;  %v6109_v6 = vcombine.high %v271_v1, %v279_v2  ;;  %v286_v7 = vld [vmem:[#allocation9 + $0x2a0] sm:$0xff] }
 0x1d1   :  { %1930 = vmatprep.subr.bf16.mxu0 %v6247_v8  ;;  %1971 = vmatprep.subr.bf16.mxu1 %v6249_v9  ;;  %v294_v8 = vld [vmem:[#allocation9 + $0x2e0] sm:$0xff]  ;;  %v287_v9 = vld [vmem:[#allocation9 + $0x2a8] sm:$0xff] }
 0x1d2   :  { %v6123_v16 = vcombine.high %v286_v7, %v294_v8  ;;  %v6122_v22 = vcombine.low %v286_v7, %v294_v8  ;;  %v6124_v23 = vcombine.low %v287_v9, %v295_v10  ;;  %v407_v7 = vld [vmem:[#allocation9 + $0x668] sm:$0xff] }
 0x1d4   :  { %1931 = vmatpush1.bf16.msra.mxu0 %v6246_v17  ;;  %1972 = vmatpush1.bf16.msra.mxu1 %v6248_v18  ;;  %v6125_v17 = vcombine.high %v287_v9, %v295_v10  ;;  %v302_v18 = vld [vmem:[#allocation9 + $0x320] sm:$0xff] }
 0x1d5   :  { %1932 = vmatprep.subr.bf16.mxu0 %v6263_v19  ;;  %1973 = vmatprep.subr.bf16.mxu1 %v6265_v20  ;;  %v310_v19 = vld [vmem:[#allocation9 + $0x360] sm:$0xff]  ;;  %v303_v20 = vld [vmem:[#allocation9 + $0x328] sm:$0xff] }
 0x1d6   :  { %v6139_v24 = vcombine.high %v302_v18, %v310_v19  ;;  %v6138_v30 = vcombine.low %v302_v18, %v310_v19  ;;  %v6140_v31 = vcombine.low %v303_v20, %v311_v21  ;;  %v423_v18 = vld [vmem:[#allocation9 + $0x6e8] sm:$0xff] }
 0x1d8   :  { %1933 = vmatpush1.bf16.msra.mxu0 %v6262_v25  ;;  %1974 = vmatpush1.bf16.msra.mxu1 %v6264_v26  ;;  %v6141_v25 = vcombine.high %v303_v20, %v311_v21  ;;  %v318_v26 = vld [vmem:[#allocation9 + $0x3a0] sm:$0xff] }
 0x1d9   :  { %1934 = vmatprep.subr.bf16.mxu0 %v6279_v27  ;;  %1975 = vmatprep.subr.bf16.mxu1 %v6281_v28  ;;  %v326_v27 = vld [vmem:[#allocation9 + $0x3e0] sm:$0xff]  ;;  %v319_v28 = vld [vmem:[#allocation9 + $0x3a8] sm:$0xff] }
 0x1da   :  { %v6155_v32 = vcombine.high %v318_v26, %v326_v27  ;;  %v6154_v40 = vcombine.low %v318_v26, %v326_v27  ;;  %v6156_v41 = vcombine.low %v319_v28, %v327_v29  ;;  %v439_v26 = vld [vmem:[#allocation9 + $0x768] sm:$0xff] }
 0x1dc   :  { %1935 = vmatpush1.bf16.msra.mxu0 %v6278_v35  ;;  %1976 = vmatpush1.bf16.msra.mxu1 %v6280_v36  ;;  %v6157_v35 = vcombine.high %v319_v28, %v327_v29  ;;  %v334_v36 = vld [vmem:[#allocation9 + $0x420] sm:$0xff] }
 0x1dd   :  { %1986 = vmatprep.subr.bf16.mxu0 %v6043_v37  ;;  %2027 = vmatprep.subr.bf16.mxu1 %v6045_v38  ;;  %v342_v37 = vld [vmem:[#allocation9 + $0x460] sm:$0xff]  ;;  %v335_v38 = vld [vmem:[#allocation9 + $0x428] sm:$0xff] }
 0x1de   :  { %v6171_v42 = vcombine.high %v334_v36, %v342_v37  ;;  %v6170_v48 = vcombine.low %v334_v36, %v342_v37  ;;  %v6172_v49 = vcombine.low %v335_v38, %v343_v39  ;;  %v455_v36 = vld [vmem:[#allocation9 + $0x7e8] sm:$0xff] }
 0x1df   :  { %1937 = vmatmul.mubr.bf16.vlgmr.msra.gmra.mrb[4].mxu0 %v8046_v33  ;;  %1978 = vmatmul.mubr.bf16.vlgmr.msra.gmra.mrb[4].mxu1 %v8046_v33 }
 0x1e0   :  { %1987 = vmatpush1.bf16.msra.mxu0 %v6042_v43  ;;  %2018 = vmatprep.mubr.bf16.mxu0 %v8048_v34  ;;  %v6173_v43 = vcombine.high %v335_v38, %v343_v39 }
 0x1e1   :  { %2028 = vmatpush1.bf16.msra.mxu1 %v6044_v44  ;;  %2059 = vmatprep.mubr.bf16.mxu1 %v8048_v34  ;;  %v350_v44 = vld [vmem:[#allocation9 + $0x4a0] sm:$0xff] }
 0x1e2   :  { %1988 = vmatprep.subr.bf16.mxu0 %v6059_v45  ;;  %2029 = vmatprep.subr.bf16.mxu1 %v6061_v46  ;;  %v358_v45 = vld [vmem:[#allocation9 + $0x4e0] sm:$0xff]  ;;  %v351_v46 = vld [vmem:[#allocation9 + $0x4a8] sm:$0xff] }
 0x1e3   :  { %v6187_v50 = vcombine.high %v350_v44, %v358_v45  ;;  %v6186_v56 = vcombine.low %v350_v44, %v358_v45  ;;  %v6188_v57 = vcombine.low %v351_v46, %v359_v47  ;;  %v217_v44 = vld [vmem:[#allocation9 + $0x78] sm:$0xff] }
 0x1e4   :  { %1989 = vmatpush1.bf16.msra.mxu0 %v6058_v51  ;;  %v6189_v51 = vcombine.high %v351_v46, %v359_v47 }
 0x1e5   :  { %2030 = vmatpush1.bf16.msra.mxu1 %v6060_v52  ;;  %1990 = vmatprep.subr.bf16.mxu0 %v6075_v53  ;;  %v366_v52 = vld [vmem:[#allocation9 + $0x520] sm:$0xff] }
 0x1e6   :  { %2031 = vmatprep.subr.bf16.mxu1 %v6077_v54  ;;  %v374_v53 = vld [vmem:[#allocation9 + $0x560] sm:$0xff]  ;;  %v367_v54 = vld [vmem:[#allocation9 + $0x528] sm:$0xff] }
 0x1e7   :  { %v6203_v58 = vcombine.high %v366_v52, %v374_v53  ;;  %v6202_v0 = vcombine.low %v366_v52, %v374_v53  ;;  %v6204_v1 = vcombine.low %v367_v54, %v375_v55  ;;  %v225_v52 = vld [vmem:[#allocation9 + $0xb8] sm:$0xff] }
 0x1e8   :  { %1991 = vmatpush1.bf16.msra.mxu0 %v6074_v59  ;;  %v6205_v59 = vcombine.high %v367_v54, %v375_v55  ;;  %v233_v53 = vld [vmem:[#allocation9 + $0xf8] sm:$0xff] }
 0x1e9   :  { %2032 = vmatpush1.bf16.msra.mxu1 %v6076_v60  ;;  %1992 = vmatprep.subr.bf16.mxu0 %v6091_v61  ;;  %v382_v60 = vld [vmem:[#allocation9 + $0x5a0] sm:$0xff] }
 0x1ea   :  { %2033 = vmatprep.subr.bf16.mxu1 %v6093_v62  ;;  %v390_v61 = vld [vmem:[#allocation9 + $0x5e0] sm:$0xff]  ;;  %v383_v62 = vld [vmem:[#allocation9 + $0x5a8] sm:$0xff] }
 0x1eb   :  { %v6219_v2 = vcombine.high %v382_v60, %v390_v61  ;;  %v6218_v8 = vcombine.low %v382_v60, %v390_v61  ;;  %v6220_v9 = vcombine.low %v383_v62, %v391_v63  ;;  %v249_v60 = vld [vmem:[#allocation9 + $0x178] sm:$0xff] }
 0x1ec   :  { %1993 = vmatpush1.bf16.msra.mxu0 %v6090_v3  ;;  %v6221_v3 = vcombine.high %v383_v62, %v391_v63  ;;  %v6064_v62 = vcombine.low %v225_v52, %v233_v53 }
 0x1ed   :  { %2034 = vmatpush1.bf16.msra.mxu1 %v6092_v4  ;;  %1994 = vmatprep.subr.bf16.mxu0 %v6107_v5  ;;  %v398_v4 = vld [vmem:[#allocation9 + $0x620] sm:$0xff] }
 0x1ee   :  { %2035 = vmatprep.subr.bf16.mxu1 %v6109_v6  ;;  %v406_v5 = vld [vmem:[#allocation9 + $0x660] sm:$0xff]  ;;  %v399_v6 = vld [vmem:[#allocation9 + $0x628] sm:$0xff] }
 0x1ef   :  { %v6235_v10 = vcombine.high %v398_v4, %v406_v5  ;;  %v6234_v19 = vcombine.low %v398_v4, %v406_v5  ;;  %v6236_v20 = vcombine.low %v399_v6, %v407_v7  ;;  %v265_v4 = vld [vmem:[#allocation9 + $0x1f8] sm:$0xff] }
 0x1f0   :  { %1995 = vmatpush1.bf16.msra.mxu0 %v6106_v11  ;;  %v6237_v11 = vcombine.high %v399_v6, %v407_v7 }
 0x1f1   :  { %2036 = vmatpush1.bf16.msra.mxu1 %v6108_v12  ;;  %1996 = vmatprep.subr.bf16.mxu0 %v6123_v16  ;;  %v414_v12 = vld [vmem:[#allocation9 + $0x6a0] sm:$0xff] }
 0x1f2   :  { %2037 = vmatprep.subr.bf16.mxu1 %v6125_v17  ;;  %v422_v16 = vld [vmem:[#allocation9 + $0x6e0] sm:$0xff]  ;;  %v415_v17 = vld [vmem:[#allocation9 + $0x6a8] sm:$0xff] }
 0x1f3   :  { %v6251_v21 = vcombine.high %v414_v12, %v422_v16  ;;  %v6250_v27 = vcombine.low %v414_v12, %v422_v16  ;;  %v6252_v28 = vcombine.low %v415_v17, %v423_v18  ;;  %v281_v12 = vld [vmem:[#allocation9 + $0x278] sm:$0xff] }
 0x1f4   :  { %1997 = vmatpush1.bf16.msra.mxu0 %v6122_v22  ;;  %v6253_v22 = vcombine.high %v415_v17, %v423_v18 }
 0x1f5   :  { %2038 = vmatpush1.bf16.msra.mxu1 %v6124_v23  ;;  %1998 = vmatprep.subr.bf16.mxu0 %v6139_v24  ;;  %v430_v23 = vld [vmem:[#allocation9 + $0x720] sm:$0xff] }
 0x1f6   :  { %2039 = vmatprep.subr.bf16.mxu1 %v6141_v25  ;;  %v438_v24 = vld [vmem:[#allocation9 + $0x760] sm:$0xff]  ;;  %v431_v25 = vld [vmem:[#allocation9 + $0x728] sm:$0xff] }
 0x1f7   :  { %v6267_v29 = vcombine.high %v430_v23, %v438_v24  ;;  %v6266_v37 = vcombine.low %v430_v23, %v438_v24  ;;  %v6268_v38 = vcombine.low %v431_v25, %v439_v26 }
 0x1f8   :  { %1999 = vmatpush1.bf16.msra.mxu0 %v6138_v30  ;;  %v6269_v30 = vcombine.high %v431_v25, %v439_v26 }
 0x1f9   :  { %2040 = vmatpush1.bf16.msra.mxu1 %v6140_v31  ;;  %2000 = vmatprep.subr.bf16.mxu0 %v6155_v32  ;;  %v446_v31 = vld [vmem:[#allocation9 + $0x7a0] sm:$0xff] }
 0x1fa   :  { %2041 = vmatprep.subr.bf16.mxu1 %v6157_v35  ;;  %v454_v32 = vld [vmem:[#allocation9 + $0x7e0] sm:$0xff]  ;;  %v447_v35 = vld [vmem:[#allocation9 + $0x7a8] sm:$0xff] }
 0x1fb   :  { %v6283_v39 = vcombine.high %v446_v31, %v454_v32  ;;  %v6282_v45 = vcombine.low %v446_v31, %v454_v32  ;;  %v6284_v46 = vcombine.low %v447_v35, %v455_v36 }
 0x1fc   :  { %2001 = vmatpush1.bf16.msra.mxu0 %v6154_v40  ;;  %v6285_v40 = vcombine.high %v447_v35, %v455_v36 }
 0x1fd   :  { %2042 = vmatpush1.bf16.msra.mxu1 %v6156_v41  ;;  %2002 = vmatprep.subr.bf16.mxu0 %v6171_v42  ;;  %v208_v41 = vld [vmem:[#allocation9 + $0x30] sm:$0xff] }
 0x1fe   :  { %2043 = vmatprep.subr.bf16.mxu1 %v6173_v43  ;;  %v216_v42 = vld [vmem:[#allocation9 + $0x70] sm:$0xff]  ;;  %v209_v43 = vld [vmem:[#allocation9 + $0x38] sm:$0xff] }
 0x1ff   :  { %v6047_v47 = vcombine.high %v208_v41, %v216_v42  ;;  %v6048_v54 = vcombine.low %v209_v43, %v217_v44 }
 0x200   :  { %2003 = vmatpush1.bf16.msra.mxu0 %v6170_v48  ;;  %v6049_v48 = vcombine.high %v209_v43, %v217_v44 }
 0x201   :  { %2044 = vmatpush1.bf16.msra.mxu1 %v6172_v49  ;;  %2004 = vmatprep.subr.bf16.mxu0 %v6187_v50  ;;  %v224_v49 = vld [vmem:[#allocation9 + $0xb0] sm:$0xff] }
 0x202   :  { %2045 = vmatprep.subr.bf16.mxu1 %v6189_v51  ;;  %v232_v50 = vld [vmem:[#allocation9 + $0xf0] sm:$0xff]  ;;  %v6046_v51 = vcombine.low %v208_v41, %v216_v42 }
 0x203   :  { %v6063_v55 = vcombine.high %v224_v49, %v232_v50  ;;  %v6062_v61 = vcombine.low %v224_v49, %v232_v50 }
 0x204   :  { %2005 = vmatpush1.bf16.msra.mxu0 %v6186_v56  ;;  %v240_v56 = vld [vmem:[#allocation9 + $0x130] sm:$0xff] }
 0x205   :  { %2046 = vmatpush1.bf16.msra.mxu1 %v6188_v57  ;;  %2006 = vmatprep.subr.bf16.mxu0 %v6203_v58  ;;  %v248_v57 = vld [vmem:[#allocation9 + $0x170] sm:$0xff]  ;;  %v6065_v58 = vcombine.high %v225_v52, %v233_v53 }
 0x206   :  { %2047 = vmatprep.subr.bf16.mxu1 %v6205_v59  ;;  %v241_v59 = vld [vmem:[#allocation9 + $0x138] sm:$0xff]  ;;  %v6079_v63 = vcombine.high %v240_v56, %v248_v57  ;;  %v6078_v5 = vcombine.low %v240_v56, %v248_v57  ;;  %v352_v53 = vld [vmem:[#allocation9 + $0x4b0] sm:$0xff] }
 0x207   :  { %v6080_v6 = vcombine.low %v241_v59, %v249_v60  ;;  %v361_v56 = vld [vmem:[#allocation9 + $0x4f8] sm:$0xff] }
 0x208   :  { %2007 = vmatpush1.bf16.msra.mxu0 %v6202_v0  ;;  %v6081_v0 = vcombine.high %v241_v59, %v249_v60 }
 0x209   :  { %2048 = vmatpush1.bf16.msra.mxu1 %v6204_v1  ;;  %2008 = vmatprep.subr.bf16.mxu0 %v6219_v2  ;;  %v256_v1 = vld [vmem:[#allocation9 + $0x1b0] sm:$0xff] }
 0x20a   :  { %2049 = vmatprep.subr.bf16.mxu1 %v6221_v3  ;;  %v264_v2 = vld [vmem:[#allocation9 + $0x1f0] sm:$0xff]  ;;  %v257_v3 = vld [vmem:[#allocation9 + $0x1b8] sm:$0xff] }
 0x20b   :  { %v6095_v7 = vcombine.high %v256_v1, %v264_v2  ;;  %v6096_v16 = vcombine.low %v257_v3, %v265_v4 }
 0x20c   :  { %2009 = vmatpush1.bf16.msra.mxu0 %v6218_v8  ;;  %v6097_v8 = vcombine.high %v257_v3, %v265_v4 }
 0x20d   :  { %2050 = vmatpush1.bf16.msra.mxu1 %v6220_v9  ;;  %2010 = vmatprep.subr.bf16.mxu0 %v6235_v10  ;;  %v272_v9 = vld [vmem:[#allocation9 + $0x230] sm:$0xff] }
 0x20e   :  { %2051 = vmatprep.subr.bf16.mxu1 %v6237_v11  ;;  %v280_v10 = vld [vmem:[#allocation9 + $0x270] sm:$0xff]  ;;  %v273_v11 = vld [vmem:[#allocation9 + $0x238] sm:$0xff] }
 0x20f   :  { %v6111_v17 = vcombine.high %v272_v9, %v280_v10  ;;  %v6113_v18 = vcombine.high %v273_v11, %v281_v12  ;;  %v6110_v23 = vcombine.low %v272_v9, %v280_v10  ;;  %v6112_v24 = vcombine.low %v273_v11, %v281_v12 }
 0x210   :  { %2011 = vmatpush1.bf16.msra.mxu0 %v6234_v19  ;;  %v288_v19 = vld [vmem:[#allocation9 + $0x2b0] sm:$0xff] }
 0x211   :  { %2052 = vmatpush1.bf16.msra.mxu1 %v6236_v20  ;;  %2012 = vmatprep.subr.bf16.mxu0 %v6251_v21  ;;  %v296_v20 = vld [vmem:[#allocation9 + $0x2f0] sm:$0xff]  ;;  %v289_v21 = vld [vmem:[#allocation9 + $0x2b8] sm:$0xff] }
 0x212   :  { %2053 = vmatprep.subr.bf16.mxu1 %v6253_v22  ;;  %v297_v22 = vld [vmem:[#allocation9 + $0x2f8] sm:$0xff]  ;;  %v6127_v25 = vcombine.high %v288_v19, %v296_v20  ;;  %v6126_v31 = vcombine.low %v288_v19, %v296_v20 }
 0x213   :  { %v6129_v26 = vcombine.high %v289_v21, %v297_v22  ;;  %v6128_v32 = vcombine.low %v289_v21, %v297_v22 }
 0x214   :  { %2013 = vmatpush1.bf16.msra.mxu0 %v6250_v27  ;;  %v304_v27 = vld [vmem:[#allocation9 + $0x330] sm:$0xff] }
 0x215   :  { %2054 = vmatpush1.bf16.msra.mxu1 %v6252_v28  ;;  %2014 = vmatprep.subr.bf16.mxu0 %v6267_v29  ;;  %v312_v28 = vld [vmem:[#allocation9 + $0x370] sm:$0xff]  ;;  %v305_v29 = vld [vmem:[#allocation9 + $0x338] sm:$0xff] }
 0x216   :  { %2055 = vmatprep.subr.bf16.mxu1 %v6269_v30  ;;  %v313_v30 = vld [vmem:[#allocation9 + $0x378] sm:$0xff]  ;;  %v6143_v35 = vcombine.high %v304_v27, %v312_v28  ;;  %v6142_v41 = vcombine.low %v304_v27, %v312_v28 }
 0x217   :  { %v6145_v36 = vcombine.high %v305_v29, %v313_v30  ;;  %v6144_v42 = vcombine.low %v305_v29, %v313_v30 }
 0x218   :  { %2015 = vmatpush1.bf16.msra.mxu0 %v6266_v37  ;;  %v320_v37 = vld [vmem:[#allocation9 + $0x3b0] sm:$0xff] }
 0x219   :  { %2056 = vmatpush1.bf16.msra.mxu1 %v6268_v38  ;;  %2016 = vmatprep.subr.bf16.mxu0 %v6283_v39  ;;  %v328_v38 = vld [vmem:[#allocation9 + $0x3f0] sm:$0xff]  ;;  %v321_v39 = vld [vmem:[#allocation9 + $0x3b8] sm:$0xff] }
 0x21a   :  { %2057 = vmatprep.subr.bf16.mxu1 %v6285_v40  ;;  %v329_v40 = vld [vmem:[#allocation9 + $0x3f8] sm:$0xff]  ;;  %v6159_v43 = vcombine.high %v320_v37, %v328_v38  ;;  %v6158_v49 = vcombine.low %v320_v37, %v328_v38 }
 0x21b   :  { %v6161_v44 = vcombine.high %v321_v39, %v329_v40  ;;  %v6160_v50 = vcombine.low %v321_v39, %v329_v40 }
 0x21c   :  { %2017 = vmatpush1.bf16.msra.mxu0 %v6282_v45  ;;  %v336_v45 = vld [vmem:[#allocation9 + $0x430] sm:$0xff] }
 0x21d   :  { %2058 = vmatpush1.bf16.msra.mxu1 %v6284_v46  ;;  %2068 = vmatprep.subr.bf16.mxu0 %v6047_v47  ;;  %v344_v46 = vld [vmem:[#allocation9 + $0x470] sm:$0xff]  ;;  %v337_v47 = vld [vmem:[#allocation9 + $0x438] sm:$0xff] }
 0x21e   :  { %2109 = vmatprep.subr.bf16.mxu1 %v6049_v48  ;;  %v345_v48 = vld [vmem:[#allocation9 + $0x478] sm:$0xff]  ;;  %v6174_v57 = vcombine.low %v336_v45, %v344_v46 }
 0x21f   :  { %2019 = vmatmul.mubr.bf16.vlgmr.msra.gmra.mrb[8].mxu0 %v8046_v33  ;;  %v6177_v52 = vcombine.high %v337_v47, %v345_v48 }
 0x220   :  { %2060 = vmatmul.mubr.bf16.vlgmr.msra.gmra.mrb[8].mxu1 %v8046_v33  ;;  %2069 = vmatpush1.bf16.msra.mxu0 %v6046_v51  ;;  %v6175_v51 = vcombine.high %v336_v45, %v344_v46 }
 0x221   :  { %2100 = vmatprep.mubr.bf16.mxu0 %v8048_v34  ;;  %2110 = vmatpush1.bf16.msra.mxu1 %v6048_v54  ;;  %v360_v54 = vld [vmem:[#allocation9 + $0x4f0] sm:$0xff] }
 0x222   :  { %2141 = vmatprep.mubr.bf16.mxu1 %v8048_v34  ;;  %2070 = vmatprep.subr.bf16.mxu0 %v6063_v55  ;;  %v6094_v34 = vcombine.low %v256_v1, %v264_v2  ;;  %v353_v55 = vld [vmem:[#allocation9 + $0x4b8] sm:$0xff]  ;;  %v6191_v59 = vcombine.high %v352_v53, %v360_v54  ;;  %v6190_v1 = vcombine.low %v352_v53, %v360_v54  ;;  %v6880_v53 = vld [vmem:[#allocation12] ss:$16 sps:$4 sm:$0xff]  }
 0x223   :  { %2111 = vmatprep.subr.bf16.mxu1 %v6065_v58  ;;  %v6176_v58 = vcombine.low %v337_v47, %v345_v48  ;;  %v6193_v60 = vcombine.high %v353_v55, %v361_v56  ;;  %v6192_v2 = vcombine.low %v353_v55, %v361_v56  ;;  %v6883_v54 = vld [vmem:[#allocation12 + $0x8] ss:$16 sps:$4 sm:$0xff]   ;;  %v6888_v55 = vld [vmem:[#allocation12 + $0x24] ss:$16 sps:$4 sm:$0xff]   ;;  %v6891_v56 = vld [vmem:[#allocation12 + $0x2c] ss:$16 sps:$4 sm:$0xff]  }
 0x224   :  { %2071 = vmatpush1.bf16.msra.mxu0 %v6062_v61  ;;  %v368_v61 = vld [vmem:[#allocation9 + $0x530] sm:$0xff] }
 0x225   :  { %2112 = vmatpush1.bf16.msra.mxu1 %v6064_v62  ;;  %2072 = vmatprep.subr.bf16.mxu0 %v6079_v63  ;;  %v376_v62 = vld [vmem:[#allocation9 + $0x570] sm:$0xff]  ;;  %v369_v63 = vld [vmem:[#allocation9 + $0x538] sm:$0xff] }
 0x226   :  { %2113 = vmatprep.subr.bf16.mxu1 %v6081_v0  ;;  %v377_v0 = vld [vmem:[#allocation9 + $0x578] sm:$0xff]  ;;  %v6207_v3 = vcombine.high %v368_v61, %v376_v62  ;;  %v6206_v9 = vcombine.low %v368_v61, %v376_v62  ;;  %v6892_v61 = vld [vmem:[#allocation12 + $0x40] ss:$16 sps:$4 sm:$0xff]  }
 0x227   :  { %v6209_v4 = vcombine.high %v369_v63, %v377_v0  ;;  %v6208_v10 = vcombine.low %v369_v63, %v377_v0  ;;  %v6895_v62 = vld [vmem:[#allocation12 + $0x48] ss:$16 sps:$4 sm:$0xff]   ;;  %v6900_v63 = vld [vmem:[#allocation12 + $0x64] ss:$16 sps:$4 sm:$0xff]   ;;  %v6903_v0 = vld [vmem:[#allocation12 + $0x6c] ss:$16 sps:$4 sm:$0xff]  }
 0x228   :  { %2073 = vmatpush1.bf16.msra.mxu0 %v6078_v5  ;;  %v384_v5 = vld [vmem:[#allocation9 + $0x5b0] sm:$0xff] }
 0x229   :  { %2114 = vmatpush1.bf16.msra.mxu1 %v6080_v6  ;;  %2074 = vmatprep.subr.bf16.mxu0 %v6095_v7  ;;  %v392_v6 = vld [vmem:[#allocation9 + $0x5f0] sm:$0xff]  ;;  %v385_v7 = vld [vmem:[#allocation9 + $0x5b8] sm:$0xff] }
 0x22a   :  { %2115 = vmatprep.subr.bf16.mxu1 %v6097_v8  ;;  %v393_v8 = vld [vmem:[#allocation9 + $0x5f8] sm:$0xff]  ;;  %v6223_v11 = vcombine.high %v384_v5, %v392_v6  ;;  %v6222_v19 = vcombine.low %v384_v5, %v392_v6  ;;  %v8066_v6 = vld [vmem:[#allocation11] sm:$0xff] }
 0x22b   :  { %v6225_v12 = vcombine.high %v385_v7, %v393_v8  ;;  %v6224_v20 = vcombine.low %v385_v7, %v393_v8  ;;  %v6907_v5 = vld [vmem:[#allocation12 + $0x88] ss:$16 sps:$4 sm:$0xff]   ;;  %v6912_v7 = vld [vmem:[#allocation12 + $0xa4] ss:$16 sps:$4 sm:$0xff]   ;;  %v6915_v8 = vld [vmem:[#allocation12 + $0xac] ss:$16 sps:$4 sm:$0xff]  }
 0x22c   :  { %2075 = vmatpush1.bf16.msra.mxu0 %v6094_v34  ;;  %v400_v34 = vld [vmem:[#allocation9 + $0x630] sm:$0xff] }
 0x22d   :  { %2116 = vmatpush1.bf16.msra.mxu1 %v6096_v16  ;;  %2076 = vmatprep.subr.bf16.mxu0 %v6111_v17  ;;  %v408_v16 = vld [vmem:[#allocation9 + $0x670] sm:$0xff]  ;;  %v401_v17 = vld [vmem:[#allocation9 + $0x638] sm:$0xff] }
 0x22e   :  { %2117 = vmatprep.subr.bf16.mxu1 %v6113_v18  ;;  %v409_v18 = vld [vmem:[#allocation9 + $0x678] sm:$0xff]  ;;  %v6239_v21 = vcombine.high %v400_v34, %v408_v16  ;;  %v6238_v27 = vcombine.low %v400_v34, %v408_v16 }
 0x22f   :  { %v6241_v22 = vcombine.high %v401_v17, %v409_v18  ;;  %v6240_v28 = vcombine.low %v401_v17, %v409_v18  ;;  %v6921_v17 = vld [vmem:[#allocation12 + $0xcc] ss:$16 sps:$4 sm:$0xff]  }
 0x230   :  { %2077 = vmatpush1.bf16.msra.mxu0 %v6110_v23  ;;  %v416_v23 = vld [vmem:[#allocation9 + $0x6b0] sm:$0xff] }
 0x231   :  { %2118 = vmatpush1.bf16.msra.mxu1 %v6112_v24  ;;  %2078 = vmatprep.subr.bf16.mxu0 %v6127_v25  ;;  %v424_v24 = vld [vmem:[#allocation9 + $0x6f0] sm:$0xff]  ;;  %v417_v25 = vld [vmem:[#allocation9 + $0x6b8] sm:$0xff] }
 0x232   :  { %2119 = vmatprep.subr.bf16.mxu1 %v6129_v26  ;;  %v425_v26 = vld [vmem:[#allocation9 + $0x6f8] sm:$0xff]  ;;  %v6255_v29 = vcombine.high %v416_v23, %v424_v24  ;;  %v6254_v37 = vcombine.low %v416_v23, %v424_v24  ;;  %v6916_v23 = vld [vmem:[#allocation12 + $0xc0] ss:$16 sps:$4 sm:$0xff]  }
 0x233   :  { %v6257_v30 = vcombine.high %v417_v25, %v425_v26  ;;  %v6256_v38 = vcombine.low %v417_v25, %v425_v26  ;;  %v6919_v26 = vld [vmem:[#allocation12 + $0xc8] ss:$16 sps:$4 sm:$0xff]  }
 0x234   :  { %2079 = vmatpush1.bf16.msra.mxu0 %v6126_v31  ;;  %v432_v31 = vld [vmem:[#allocation9 + $0x730] sm:$0xff] }
 0x235   :  { %2120 = vmatpush1.bf16.msra.mxu1 %v6128_v32  ;;  %2080 = vmatprep.subr.bf16.mxu0 %v6143_v35  ;;  %v440_v32 = vld [vmem:[#allocation9 + $0x770] sm:$0xff]  ;;  %v433_v35 = vld [vmem:[#allocation9 + $0x738] sm:$0xff] }
 0x236   :  { %2121 = vmatprep.subr.bf16.mxu1 %v6145_v36  ;;  %v441_v36 = vld [vmem:[#allocation9 + $0x778] sm:$0xff]  ;;  %v6271_v39 = vcombine.high %v432_v31, %v440_v32  ;;  %v6270_v45 = vcombine.low %v432_v31, %v440_v32  ;;  %v6922_v31 = vld [vmem:[#allocation12 + $0xe0] ss:$16 sps:$4 sm:$0xff]  }
 0x237   :  { %v6273_v40 = vcombine.high %v433_v35, %v441_v36  ;;  %v6272_v46 = vcombine.low %v433_v35, %v441_v36  ;;  %v6925_v32 = vld [vmem:[#allocation12 + $0xe8] ss:$16 sps:$4 sm:$0xff]   ;;  %v6930_v35 = vld [vmem:[#allocation12 + $0x104] ss:$16 sps:$4 sm:$0xff]   ;;  %v6933_v36 = vld [vmem:[#allocation12 + $0x10c] ss:$16 sps:$4 sm:$0xff]  }
 0x238   :  { %2081 = vmatpush1.bf16.msra.mxu0 %v6142_v41  ;;  %v448_v41 = vld [vmem:[#allocation9 + $0x7b0] sm:$0xff] }
 0x239   :  { %2122 = vmatpush1.bf16.msra.mxu1 %v6144_v42  ;;  %2082 = vmatprep.subr.bf16.mxu0 %v6159_v43  ;;  %v456_v42 = vld [vmem:[#allocation9 + $0x7f0] sm:$0xff]  ;;  %v449_v43 = vld [vmem:[#allocation9 + $0x7b8] sm:$0xff] }
 0x23a   :  { %2123 = vmatprep.subr.bf16.mxu1 %v6161_v44  ;;  %v457_v44 = vld [vmem:[#allocation9 + $0x7f8] sm:$0xff]  ;;  %v6287_v47 = vcombine.high %v448_v41, %v456_v42 }
 0x23b   :  { %v6289_v48 = vcombine.high %v449_v43, %v457_v44 }
 0x23c   :  { %2083 = vmatpush1.bf16.msra.mxu0 %v6158_v49  ;;  %v6286_v49 = vcombine.low %v448_v41, %v456_v42  ;;  %v6934_v41 = vld [vmem:[#allocation12 + $0x120] ss:$16 sps:$4 sm:$0xff]   ;;  %v6937_v42 = vld [vmem:[#allocation12 + $0x128] ss:$16 sps:$4 sm:$0xff]  }
 0x23d   :  { %2124 = vmatpush1.bf16.msra.mxu1 %v6160_v50  ;;  %2084 = vmatprep.subr.bf16.mxu0 %v6175_v51  ;;  %v6288_v50 = vcombine.low %v449_v43, %v457_v44  ;;  %v6882_v51 = vld [vmem:[#allocation12 + $0x4] ss:$16 sps:$4 sm:$0xff]   ;;  %v6945_v44 = vld [vmem:[#allocation12 + $0x14c] ss:$16 sps:$4 sm:$0xff]  }
 0x23e   :  { %2125 = vmatprep.subr.bf16.mxu1 %v6177_v52  ;;  %v6885_v52 = vld [vmem:[#allocation12 + $0xc] ss:$16 sps:$4 sm:$0xff]   ;;  %v6942_v43 = vld [vmem:[#allocation12 + $0x144] ss:$16 sps:$4 sm:$0xff]  }
 0x240   :  { %2085 = vmatpush1.bf16.msra.mxu0 %v6174_v57  ;;  %v6886_v57 = vld [vmem:[#allocation12 + $0x20] ss:$16 sps:$4 sm:$0xff]  }
 0x241   :  { %2126 = vmatpush1.bf16.msra.mxu1 %v6176_v58  ;;  %2086 = vmatprep.subr.bf16.mxu0 %v6191_v59  ;;  %v6889_v58 = vld [vmem:[#allocation12 + $0x28] ss:$16 sps:$4 sm:$0xff]   ;;  %v6894_v59 = vld [vmem:[#allocation12 + $0x44] ss:$16 sps:$4 sm:$0xff]  }
 0x242   :  { %2127 = vmatprep.subr.bf16.mxu1 %v6193_v60  ;;  %v6897_v60 = vld [vmem:[#allocation12 + $0x4c] ss:$16 sps:$4 sm:$0xff]  }
 0x244   :  { %2087 = vmatpush1.bf16.msra.mxu0 %v6190_v1  ;;  %v6898_v1 = vld [vmem:[#allocation12 + $0x60] ss:$16 sps:$4 sm:$0xff]  }
 0x245   :  { %2128 = vmatpush1.bf16.msra.mxu1 %v6192_v2  ;;  %2088 = vmatprep.subr.bf16.mxu0 %v6207_v3  ;;  %v6906_v2 = vld [vmem:[#allocation12 + $0x84] ss:$16 sps:$4 sm:$0xff]   ;;  %v6909_v3 = vld [vmem:[#allocation12 + $0x8c] ss:$16 sps:$4 sm:$0xff]  }
 0x246   :  { %2129 = vmatprep.subr.bf16.mxu1 %v6209_v4  ;;  %v6904_v4 = vld [vmem:[#allocation12 + $0x80] ss:$16 sps:$4 sm:$0xff]  }
 0x248   :  { %2089 = vmatpush1.bf16.msra.mxu0 %v6206_v9  ;;  %v6910_v9 = vld [vmem:[#allocation12 + $0xa0] ss:$16 sps:$4 sm:$0xff]  }
 0x249   :  { %2130 = vmatpush1.bf16.msra.mxu1 %v6208_v10  ;;  %2090 = vmatprep.subr.bf16.mxu0 %v6223_v11  ;;  %v469_v10 = vrot.slane %v8066_v6, %v8040_v15  ;;  %v6913_v11 = vld [vmem:[#allocation12 + $0xa8] ss:$16 sps:$4 sm:$0xff]  }
 0x24a   :  { %2131 = vmatprep.subr.bf16.mxu1 %v6225_v12  ;;  %v6918_v12 = vld [vmem:[#allocation12 + $0xc4] ss:$16 sps:$4 sm:$0xff]  }
 0x24c   :  { %2091 = vmatpush1.bf16.msra.mxu0 %v6222_v19 }
 0x24d   :  { %2132 = vmatpush1.bf16.msra.mxu1 %v6224_v20  ;;  %2092 = vmatprep.subr.bf16.mxu0 %v6239_v21 }
 0x24e   :  { %2133 = vmatprep.subr.bf16.mxu1 %v6241_v22 }
 0x250   :  { %2093 = vmatpush1.bf16.msra.mxu0 %v6238_v27  ;;  %v6924_v27 = vld [vmem:[#allocation12 + $0xe4] ss:$16 sps:$4 sm:$0xff]  }
 0x251   :  { %2134 = vmatpush1.bf16.msra.mxu1 %v6240_v28  ;;  %2094 = vmatprep.subr.bf16.mxu0 %v6255_v29  ;;  %v6927_v29 = vld [vmem:[#allocation12 + $0xec] ss:$16 sps:$4 sm:$0xff]  }
 0x252   :  { %2135 = vmatprep.subr.bf16.mxu1 %v6257_v30 }
 0x254   :  { %2095 = vmatpush1.bf16.msra.mxu0 %v6254_v37  ;;  %v6928_v37 = vld [vmem:[#allocation12 + $0x100] ss:$16 sps:$4 sm:$0xff]  }
 0x255   :  { %2136 = vmatpush1.bf16.msra.mxu1 %v6256_v38  ;;  %2096 = vmatprep.subr.bf16.mxu0 %v6271_v39  ;;  %v6931_v38 = vld [vmem:[#allocation12 + $0x108] ss:$16 sps:$4 sm:$0xff]   ;;  %v6936_v39 = vld [vmem:[#allocation12 + $0x124] ss:$16 sps:$4 sm:$0xff]  }
 0x256   :  { %2137 = vmatprep.subr.bf16.mxu1 %v6273_v40  ;;  %v6939_v40 = vld [vmem:[#allocation12 + $0x12c] ss:$16 sps:$4 sm:$0xff]  }
 0x258   :  { %2097 = vmatpush1.bf16.msra.mxu0 %v6270_v45  ;;  %v6940_v45 = vld [vmem:[#allocation12 + $0x140] ss:$16 sps:$4 sm:$0xff]  }
 0x259   :  { %2138 = vmatpush1.bf16.msra.mxu1 %v6272_v46  ;;  %2098 = vmatprep.subr.bf16.mxu0 %v6287_v47  ;;  %v6943_v46 = vld [vmem:[#allocation12 + $0x148] ss:$16 sps:$4 sm:$0xff]   ;;  %v6948_v47 = vld [vmem:[#allocation12 + $0x164] ss:$16 sps:$4 sm:$0xff]  }
 0x25a   :  { %2139 = vmatprep.subr.bf16.mxu1 %v6289_v48  ;;  %v6951_v48 = vld [vmem:[#allocation12 + $0x16c] ss:$16 sps:$4 sm:$0xff]  }
 0x25c   :  { %2099 = vmatpush1.bf16.msra.mxu0 %v6286_v49  ;;  %v6946_v49 = vld [vmem:[#allocation12 + $0x160] ss:$16 sps:$4 sm:$0xff]  }
 0x25d   :  { %2140 = vmatpush1.bf16.msra.mxu1 %v6288_v50  ;;  %5276 = vmatprep.subr.bf16.mxu0 %v6882_v51  ;;  %v6949_v50 = vld [vmem:[#allocation12 + $0x168] ss:$16 sps:$4 sm:$0xff]   ;;  %v6954_v51 = vld [vmem:[#allocation12 + $0x184] ss:$16 sps:$4 sm:$0xff]  }
 0x25e   :  { %5604 = vmatprep.subr.bf16.mxu1 %v6885_v52  ;;  %v6957_v52 = vld [vmem:[#allocation12 + $0x18c] ss:$16 sps:$4 sm:$0xff]  }
 0x25f   :  { %2101 = vmatmul.mubr.bf16.vlgmr.msra.gmra.mrb[12].mxu0 %v8046_v33 }
 0x260   :  { %2142 = vmatmul.mubr.bf16.vlgmr.msra.gmra.mrb[12].mxu1 %v8046_v33  ;;  %5277 = vmatpush1.bf16.msra.mxu0 %v6880_v53  ;;  %v6901_v33 = vld [vmem:[#allocation12 + $0x68] ss:$16 sps:$4 sm:$0xff]   ;;  %v6952_v53 = vld [vmem:[#allocation12 + $0x180] ss:$16 sps:$4 sm:$0xff]  }
 0x261   :  { %5605 = vmatpush1.bf16.msra.mxu1 %v6883_v54  ;;  %5278 = vmatprep.subr.bf16.mxu0 %v6888_v55  ;;  %v6955_v54 = vld [vmem:[#allocation12 + $0x188] ss:$16 sps:$4 sm:$0xff]   ;;  %v6960_v55 = vld [vmem:[#allocation12 + $0x1a4] ss:$16 sps:$4 sm:$0xff]  }
 0x262   :  { %5606 = vmatprep.subr.bf16.mxu1 %v6891_v56  ;;  %v6963_v56 = vld [vmem:[#allocation12 + $0x1ac] ss:$16 sps:$4 sm:$0xff]  }
 0x264   :  { %5279 = vmatpush1.bf16.msra.mxu0 %v6886_v57  ;;  %v8077_v57 = vsub.s32 3, %v8034_v13 }
 0x265   :  { %5607 = vmatpush1.bf16.msra.mxu1 %v6889_v58  ;;  %5280 = vmatprep.subr.bf16.mxu0 %v6894_v59  ;;  %v6958_v58 = vld [vmem:[#allocation12 + $0x1a0] ss:$16 sps:$4 sm:$0xff]   ;;  %v465_v59 = vrot.slane %v8066_v6, %v8037_v14 }
 0x266   :  { %5608 = vmatprep.subr.bf16.mxu1 %v6897_v60  ;;  %v6961_v60 = vld [vmem:[#allocation12 + $0x1a8] ss:$16 sps:$4 sm:$0xff]  }
 0x268   :  { %5281 = vmatpush1.bf16.msra.mxu0 %v6892_v61  ;;  %v6966_v61 = vld [vmem:[#allocation12 + $0x1c4] ss:$16 sps:$4 sm:$0xff]  }
 0x269   :  { %5609 = vmatpush1.bf16.msra.mxu1 %v6895_v62  ;;  %5282 = vmatprep.subr.bf16.mxu0 %v6900_v63  ;;  %v6969_v62 = vld [vmem:[#allocation12 + $0x1cc] ss:$16 sps:$4 sm:$0xff]   ;;  %v477_v63 = vrot.slane %v8066_v6, %v8077_v57 }
 0x26a   :  { %5610 = vmatprep.subr.bf16.mxu1 %v6903_v0  ;;  %v6964_v0 = vld [vmem:[#allocation12 + $0x1c0] ss:$16 sps:$4 sm:$0xff]  }
 0x26c   :  { %5283 = vmatpush1.bf16.msra.mxu0 %v6898_v1 }
 0x26d   :  { %5611 = vmatpush1.bf16.msra.mxu1 %v6901_v33  ;;  %5284 = vmatprep.subr.bf16.mxu0 %v6906_v2  ;;  %v6967_v33 = vld [vmem:[#allocation12 + $0x1c8] ss:$16 sps:$4 sm:$0xff]   ;;  %v6972_v2 = vld [vmem:[#allocation12 + $0x1e4] ss:$16 sps:$4 sm:$0xff]  }
 0x26e   :  { %5612 = vmatprep.subr.bf16.mxu1 %v6909_v3  ;;  %v6975_v3 = vld [vmem:[#allocation12 + $0x1ec] ss:$16 sps:$4 sm:$0xff]  }
 0x270   :  { %5285 = vmatpush1.bf16.msra.mxu0 %v6904_v4 }
 0x271   :  { %5613 = vmatpush1.bf16.msra.mxu1 %v6907_v5  ;;  %5286 = vmatprep.subr.bf16.mxu0 %v6912_v7  ;;  %v6970_v5 = vld [vmem:[#allocation12 + $0x1e0] ss:$16 sps:$4 sm:$0xff]  }
 0x272   :  { %v8070_v34 = vpop.f32.mrb[0].mxu0  ;;  %v8072_v16 = vpop.f32.mrb[0].mxu1  ;;  %5614 = vmatprep.subr.bf16.mxu1 %v6915_v8  ;;  %v6973_v8 = vld [vmem:[#allocation12 + $0x1e8] ss:$16 sps:$4 sm:$0xff]  }
 0x273   :  { %v1858_v18 = vpop.f32.mrb[1].mxu0  ;;  %v8074_v19 = vpop.f32.mrb[1].mxu1  ;;  %v1857_v1 = vadd.f32 %v8070_v34, %v465_v59  ;;  %v7029_v59 = vld [vmem:[#allocation12 + $0x30c] ss:$16 sps:$4 sm:$0xff]  }
 0x274   :  { %v1859_v20 = vadd.f32 %v1858_v18, %v469_v10  ;;  %5287 = vmatpush1.bf16.msra.mxu0 %v6910_v9  ;;  %v1860_v21 = vpop.f32.mrb[2].mxu0  ;;  %v1901_v22 = vpop.f32.mrb[2].mxu1  ;;  %v1900_v4 = vadd.f32 %v8074_v19, %v477_v63  ;;  %v6978_v9 = vld [vmem:[#allocation12 + $0x204] ss:$16 sps:$4 sm:$0xff]   ;;  %v6981_v10 = vld [vmem:[#allocation12 + $0x20c] ss:$16 sps:$4 sm:$0xff]  }
 0x275   :  { %5615 = vmatpush1.bf16.msra.mxu1 %v6913_v11  ;;  %v1861_v24 = vpop.f32.mrb[3].mxu0  ;;  %v1902_v25 = vpop.f32.mrb[3].mxu1  ;;  %5288 = vmatprep.subr.bf16.mxu0 %v6918_v12  ;;  %v2150_v7 = vmax.f32 %v1857_v1, 0.0  ;;  %v6976_v12 = vld [vmem:[#allocation12 + $0x200] ss:$16 sps:$4 sm:$0xff]  }
 0x276   :  { %v2151_v28 = vmax.f32 %v1859_v20, 0.0  ;;  %5616 = vmatprep.subr.bf16.mxu1 %v6921_v17  ;;  %v2153_v11 = vmax.f32 %v1900_v4, 0.0  ;;  %v6979_v17 = vld [vmem:[#allocation12 + $0x208] ss:$16 sps:$4 sm:$0xff]   ;;  %v6984_v18 = vld [vmem:[#allocation12 + $0x224] ss:$16 sps:$4 sm:$0xff]  }
 0x277   :  { %v2166_v34 = vpack.c.bf16 %v2150_v7, %v2150_v7  ;;  %v6987_v19 = vld [vmem:[#allocation12 + $0x22c] ss:$16 sps:$4 sm:$0xff]   ;;  %v6982_v21 = vld [vmem:[#allocation12 + $0x220] ss:$16 sps:$4 sm:$0xff]   ;;  %v6985_v22 = vld [vmem:[#allocation12 + $0x228] ss:$16 sps:$4 sm:$0xff]  }
 0x278   :  { %v2167_v30 = vpack.c.bf16 %v2151_v28, %v2151_v28  ;;  %5289 = vmatpush1.bf16.msra.mxu0 %v6916_v23  ;;  %v2169_v20 = vpack.c.bf16 %v2153_v11, %v2153_v11  ;;  %v6990_v23 = vld [vmem:[#allocation12 + $0x244] ss:$16 sps:$4 sm:$0xff]   ;;  %v6993_v24 = vld [vmem:[#allocation12 + $0x24c] ss:$16 sps:$4 sm:$0xff]   ;;  %v6988_v25 = vld [vmem:[#allocation12 + $0x240] ss:$16 sps:$4 sm:$0xff]  }
 0x279   :  { %5617 = vmatpush1.bf16.msra.mxu1 %v6919_v26  ;;  %5290 = vmatprep.subr.bf16.mxu0 %v6924_v27  ;;  %v6991_v26 = vld [vmem:[#allocation12 + $0x248] ss:$16 sps:$4 sm:$0xff]   ;;  %v6996_v27 = vld [vmem:[#allocation12 + $0x264] ss:$16 sps:$4 sm:$0xff]   ;;  %v6999_v28 = vld [vmem:[#allocation12 + $0x26c] ss:$16 sps:$4 sm:$0xff]  }
 0x27a   :  { %5308 = vmatprep.mubr.bf16.mxu0 %v2167_v30  ;;  %5618 = vmatprep.subr.bf16.mxu1 %v6927_v29  ;;  %v6994_v29 = vld [vmem:[#allocation12 + $0x260] ss:$16 sps:$4 sm:$0xff]   ;;  %v7035_v63 = vld [vmem:[#allocation12 + $0x32c] ss:$16 sps:$4 sm:$0xff]   ;;  %v7033_v1 = vld [vmem:[#allocation12 + $0x328] ss:$16 sps:$4 sm:$0xff]  }
 0x27b   :  { %5636 = vmatprep.mubr.bf16.mxu1 %v2167_v30  ;;  %v6997_v30 = vld [vmem:[#allocation12 + $0x268] ss:$16 sps:$4 sm:$0xff]   ;;  %v7047_v7 = vld [vmem:[#allocation12 + $0x36c] ss:$16 sps:$4 sm:$0xff]  }
 0x27c   :  { %5291 = vmatpush1.bf16.msra.mxu0 %v6922_v31  ;;  %v7002_v31 = vld [vmem:[#allocation12 + $0x284] ss:$16 sps:$4 sm:$0xff]   ;;  %v7039_v4 = vld [vmem:[#allocation12 + $0x348] ss:$16 sps:$4 sm:$0xff]   ;;  %v7053_v11 = vld [vmem:[#allocation12 + $0x38c] ss:$16 sps:$4 sm:$0xff]  }
 0x27d   :  { %5619 = vmatpush1.bf16.msra.mxu1 %v6925_v32  ;;  %5292 = vmatprep.subr.bf16.mxu0 %v6930_v35  ;;  %v7005_v32 = vld [vmem:[#allocation12 + $0x28c] ss:$16 sps:$4 sm:$0xff]   ;;  %v7000_v35 = vld [vmem:[#allocation12 + $0x280] ss:$16 sps:$4 sm:$0xff]  }
 0x27e   :  { %5620 = vmatprep.subr.bf16.mxu1 %v6933_v36  ;;  %v7003_v36 = vld [vmem:[#allocation12 + $0x288] ss:$16 sps:$4 sm:$0xff]  }
 0x280   :  { %5293 = vmatpush1.bf16.msra.mxu0 %v6928_v37  ;;  %v7008_v37 = vld [vmem:[#allocation12 + $0x2a4] ss:$16 sps:$4 sm:$0xff]  }
 0x281   :  { %5621 = vmatpush1.bf16.msra.mxu1 %v6931_v38  ;;  %5294 = vmatprep.subr.bf16.mxu0 %v6936_v39  ;;  %v7011_v38 = vld [vmem:[#allocation12 + $0x2ac] ss:$16 sps:$4 sm:$0xff]   ;;  %v7006_v39 = vld [vmem:[#allocation12 + $0x2a0] ss:$16 sps:$4 sm:$0xff]  }
 0x282   :  { %5622 = vmatprep.subr.bf16.mxu1 %v6939_v40  ;;  %v7009_v40 = vld [vmem:[#allocation12 + $0x2a8] ss:$16 sps:$4 sm:$0xff]  }
 0x284   :  { %5295 = vmatpush1.bf16.msra.mxu0 %v6934_v41  ;;  %v7014_v41 = vld [vmem:[#allocation12 + $0x2c4] ss:$16 sps:$4 sm:$0xff]  }
 0x285   :  { %5623 = vmatpush1.bf16.msra.mxu1 %v6937_v42  ;;  %5296 = vmatprep.subr.bf16.mxu0 %v6942_v43 }
 0x286   :  { %5624 = vmatprep.subr.bf16.mxu1 %v6945_v44  ;;  %v7017_v44 = vld [vmem:[#allocation12 + $0x2cc] ss:$16 sps:$4 sm:$0xff]  }
 0x288   :  { %5297 = vmatpush1.bf16.msra.mxu0 %v6940_v45 }
 0x289   :  { %5625 = vmatpush1.bf16.msra.mxu1 %v6943_v46  ;;  %5298 = vmatprep.subr.bf16.mxu0 %v6948_v47 }
 0x28a   :  { %5626 = vmatprep.subr.bf16.mxu1 %v6951_v48 }
 0x28c   :  { %5299 = vmatpush1.bf16.msra.mxu0 %v6946_v49  ;;  %v7012_v49 = vld [vmem:[#allocation12 + $0x2c0] ss:$16 sps:$4 sm:$0xff]  }
 0x28d   :  { %5627 = vmatpush1.bf16.msra.mxu1 %v6949_v50  ;;  %5300 = vmatprep.subr.bf16.mxu0 %v6954_v51 }
 0x28e   :  { %5628 = vmatprep.subr.bf16.mxu1 %v6957_v52  ;;  %v7015_v52 = vld [vmem:[#allocation12 + $0x2c8] ss:$16 sps:$4 sm:$0xff]  }
 0x290   :  { %5301 = vmatpush1.bf16.msra.mxu0 %v6952_v53  ;;  %v7020_v53 = vld [vmem:[#allocation12 + $0x2e4] ss:$16 sps:$4 sm:$0xff]  }
 0x291   :  { %5629 = vmatpush1.bf16.msra.mxu1 %v6955_v54  ;;  %5302 = vmatprep.subr.bf16.mxu0 %v6960_v55  ;;  %v7023_v54 = vld [vmem:[#allocation12 + $0x2ec] ss:$16 sps:$4 sm:$0xff]   ;;  %v7018_v55 = vld [vmem:[#allocation12 + $0x2e0] ss:$16 sps:$4 sm:$0xff]  }
 0x292   :  { %5630 = vmatprep.subr.bf16.mxu1 %v6963_v56  ;;  %v7021_v56 = vld [vmem:[#allocation12 + $0x2e8] ss:$16 sps:$4 sm:$0xff]  }
 0x294   :  { %5303 = vmatpush1.bf16.msra.mxu0 %v6958_v58  ;;  %v7026_v58 = vld [vmem:[#allocation12 + $0x304] ss:$16 sps:$4 sm:$0xff]  }
 0x295   :  { %5631 = vmatpush1.bf16.msra.mxu1 %v6961_v60  ;;  %5304 = vmatprep.subr.bf16.mxu0 %v6966_v61  ;;  %v7024_v60 = vld [vmem:[#allocation12 + $0x300] ss:$16 sps:$4 sm:$0xff]   ;;  %v7027_v61 = vld [vmem:[#allocation12 + $0x308] ss:$16 sps:$4 sm:$0xff]  }
 0x296   :  { %5632 = vmatprep.subr.bf16.mxu1 %v6969_v62  ;;  %v7032_v62 = vld [vmem:[#allocation12 + $0x324] ss:$16 sps:$4 sm:$0xff]  }
 0x298   :  { %5305 = vmatpush1.bf16.msra.mxu0 %v6964_v0  ;;  %v7030_v0 = vld [vmem:[#allocation12 + $0x320] ss:$16 sps:$4 sm:$0xff]  }
 0x299   :  { %5633 = vmatpush1.bf16.msra.mxu1 %v6967_v33  ;;  %5306 = vmatprep.subr.bf16.mxu0 %v6972_v2  ;;  %v7038_v33 = vld [vmem:[#allocation12 + $0x344] ss:$16 sps:$4 sm:$0xff]   ;;  %v7041_v2 = vld [vmem:[#allocation12 + $0x34c] ss:$16 sps:$4 sm:$0xff]  }
 0x29a   :  { %5634 = vmatprep.subr.bf16.mxu1 %v6975_v3  ;;  %v7036_v3 = vld [vmem:[#allocation12 + $0x340] ss:$16 sps:$4 sm:$0xff]  }
 0x29c   :  { %5307 = vmatpush1.bf16.msra.mxu0 %v6970_v5  ;;  %v7044_v5 = vld [vmem:[#allocation12 + $0x364] ss:$16 sps:$4 sm:$0xff]  }
 0x29d   :  { %5635 = vmatpush1.bf16.msra.mxu1 %v6973_v8  ;;  %5317 = vmatprep.subr.bf16.mxu0 %v6978_v9  ;;  %v7042_v8 = vld [vmem:[#allocation12 + $0x360] ss:$16 sps:$4 sm:$0xff]   ;;  %v7045_v9 = vld [vmem:[#allocation12 + $0x368] ss:$16 sps:$4 sm:$0xff]  }
 0x29e   :  { %5645 = vmatprep.subr.bf16.mxu1 %v6981_v10  ;;  %v7050_v10 = vld [vmem:[#allocation12 + $0x384] ss:$16 sps:$4 sm:$0xff]  }
 0x29f   :  { %5309 = vmatmul.mubr.bf16.vlgmr.msra.gmra.mrb[16].mxu0 %v2166_v34 }
 0x2a0   :  { %5637 = vmatmul.mubr.bf16.vlgmr.msra.gmra.mrb[16].mxu1 %v2166_v34  ;;  %5318 = vmatpush1.bf16.msra.mxu0 %v6976_v12  ;;  %v7048_v12 = vld [vmem:[#allocation12 + $0x380] ss:$16 sps:$4 sm:$0xff]   ;;  %v8094_v34 = vsub.s32 2, %v8034_v13 }
 0x2a1   :  { %5349 = vmatprep.mubr.bf16.mxu0 %v2169_v20  ;;  %5646 = vmatpush1.bf16.msra.mxu1 %v6979_v17  ;;  %v7051_v17 = vld [vmem:[#allocation12 + $0x388] ss:$16 sps:$4 sm:$0xff]  }
 0x2a2   :  { %5677 = vmatprep.mubr.bf16.mxu1 %v2169_v20  ;;  %5319 = vmatprep.subr.bf16.mxu0 %v6984_v18  ;;  %v7056_v18 = vld [vmem:[#allocation12 + $0x3a4] ss:$16 sps:$4 sm:$0xff]   ;;  %v7059_v20 = vld [vmem:[#allocation12 + $0x3ac] ss:$16 sps:$4 sm:$0xff]  }
 0x2a3   :  { %5647 = vmatprep.subr.bf16.mxu1 %v6987_v19  ;;  %v484_v19 = vsub.s32 5, %v8034_v13 }
 0x2a4   :  { %5320 = vmatpush1.bf16.msra.mxu0 %v6982_v21  ;;  %v7054_v21 = vld [vmem:[#allocation12 + $0x3a0] ss:$16 sps:$4 sm:$0xff]  }
 0x2a5   :  { %5648 = vmatpush1.bf16.msra.mxu1 %v6985_v22  ;;  %5321 = vmatprep.subr.bf16.mxu0 %v6990_v23  ;;  %v473_v22 = vrot.slane %v8066_v6, %v8094_v34  ;;  %v7057_v23 = vld [vmem:[#allocation12 + $0x3a8] ss:$16 sps:$4 sm:$0xff]  }
 0x2a6   :  { %5649 = vmatprep.subr.bf16.mxu1 %v6993_v24  ;;  %v7062_v24 = vld [vmem:[#allocation12 + $0x3c4] ss:$16 sps:$4 sm:$0xff]  }
 0x2a8   :  { %5322 = vmatpush1.bf16.msra.mxu0 %v6988_v25  ;;  %v7065_v25 = vld [vmem:[#allocation12 + $0x3cc] ss:$16 sps:$4 sm:$0xff]  }
 0x2a9   :  { %5650 = vmatpush1.bf16.msra.mxu1 %v6991_v26  ;;  %5323 = vmatprep.subr.bf16.mxu0 %v6996_v27  ;;  %v485_v26 = vrot.slane %v8066_v6, %v484_v19  ;;  %v7060_v27 = vld [vmem:[#allocation12 + $0x3c0] ss:$16 sps:$4 sm:$0xff]  }
 0x2aa   :  { %5651 = vmatprep.subr.bf16.mxu1 %v6999_v28  ;;  %v1898_v28 = vadd.f32 %v8072_v16, %v473_v22  ;;  %v7072_v16 = vld [vmem:[#allocation12 + $0x400] ss:$16 sps:$4 sm:$0xff]   ;;  %v7119_v22 = vld [vmem:[#allocation12 + $0x4ec] ss:$16 sps:$4 sm:$0xff]  }
 0x2ac   :  { %5324 = vmatpush1.bf16.msra.mxu0 %v6994_v29  ;;  %v7063_v29 = vld [vmem:[#allocation12 + $0x3c8] ss:$16 sps:$4 sm:$0xff]  }
 0x2ad   :  { %5652 = vmatpush1.bf16.msra.mxu1 %v6997_v30  ;;  %5325 = vmatprep.subr.bf16.mxu0 %v7002_v31  ;;  %v7068_v30 = vld [vmem:[#allocation12 + $0x3e4] ss:$16 sps:$4 sm:$0xff]   ;;  %v7071_v31 = vld [vmem:[#allocation12 + $0x3ec] ss:$16 sps:$4 sm:$0xff]  }
 0x2ae   :  { %5653 = vmatprep.subr.bf16.mxu1 %v7005_v32 }
 0x2b0   :  { %5326 = vmatpush1.bf16.msra.mxu0 %v7000_v35  ;;  %v7066_v35 = vld [vmem:[#allocation12 + $0x3e0] ss:$16 sps:$4 sm:$0xff]  }
 0x2b1   :  { %5654 = vmatpush1.bf16.msra.mxu1 %v7003_v36  ;;  %5327 = vmatprep.subr.bf16.mxu0 %v7008_v37  ;;  %v2152_v36 = vmax.f32 %v1898_v28, 0.0  ;;  %v7069_v37 = vld [vmem:[#allocation12 + $0x3e8] ss:$16 sps:$4 sm:$0xff]  }
 0x2b2   :  { %v8085_v42 = vpop.f32.mrb[4].mxu0  ;;  %v8087_v43 = vpop.f32.mrb[4].mxu1  ;;  %5655 = vmatprep.subr.bf16.mxu1 %v7011_v38  ;;  %v7074_v38 = vld [vmem:[#allocation12 + $0x404] ss:$16 sps:$4 sm:$0xff]   ;;  %v7123_v28 = vld [vmem:[#allocation12 + $0x508] ss:$16 sps:$4 sm:$0xff]  }
 0x2b3   :  { %v8089_v45 = vpop.f32.mrb[5].mxu0  ;;  %v8091_v46 = vpop.f32.mrb[5].mxu1 }
 0x2b4   :  { %v1942_v47 = vpop.f32.mrb[6].mxu0  ;;  %v1983_v48 = vpop.f32.mrb[6].mxu1  ;;  %5328 = vmatpush1.bf16.msra.mxu0 %v7006_v39  ;;  %v1941_v32 = vadd.f32 %v8089_v45, %v485_v26  ;;  %v7077_v39 = vld [vmem:[#allocation12 + $0x40c] ss:$16 sps:$4 sm:$0xff]  }
 0x2b5   :  { %5656 = vmatpush1.bf16.msra.mxu1 %v7009_v40  ;;  %v1943_v50 = vpop.f32.mrb[7].mxu0  ;;  %v1984_v51 = vpop.f32.mrb[7].mxu1  ;;  %5329 = vmatprep.subr.bf16.mxu0 %v7014_v41  ;;  %v2168_v41 = vpack.c.bf16 %v2152_v36, %v2152_v36  ;;  %v7080_v47 = vld [vmem:[#allocation12 + $0x424] ss:$16 sps:$4 sm:$0xff]   ;;  %v7083_v45 = vld [vmem:[#allocation12 + $0x42c] ss:$16 sps:$4 sm:$0xff]  }
 0x2b6   :  { %5657 = vmatprep.subr.bf16.mxu1 %v7017_v44  ;;  %v2155_v40 = vmax.f32 %v1941_v32, 0.0  ;;  %v7075_v44 = vld [vmem:[#allocation12 + $0x408] ss:$16 sps:$4 sm:$0xff]   ;;  %v7086_v51 = vld [vmem:[#allocation12 + $0x444] ss:$16 sps:$4 sm:$0xff]  }
 0x2b7   :  { %v7081_v50 = vld [vmem:[#allocation12 + $0x428] ss:$16 sps:$4 sm:$0xff]   ;;  %v7125_v26 = vld [vmem:[#allocation12 + $0x50c] ss:$16 sps:$4 sm:$0xff]  }
 0x2b8   :  { %5330 = vmatpush1.bf16.msra.mxu0 %v7012_v49  ;;  %v2171_v48 = vpack.c.bf16 %v2155_v40, %v2155_v40  ;;  %v7078_v49 = vld [vmem:[#allocation12 + $0x420] ss:$16 sps:$4 sm:$0xff]   ;;  %v7129_v32 = vld [vmem:[#allocation12 + $0x528] ss:$16 sps:$4 sm:$0xff]   ;;  %v7137_v36 = vld [vmem:[#allocation12 + $0x54c] ss:$16 sps:$4 sm:$0xff]  }
 0x2b9   :  { %5658 = vmatpush1.bf16.msra.mxu1 %v7015_v52  ;;  %5331 = vmatprep.subr.bf16.mxu0 %v7020_v53  ;;  %v7089_v52 = vld [vmem:[#allocation12 + $0x44c] ss:$16 sps:$4 sm:$0xff]   ;;  %v7084_v53 = vld [vmem:[#allocation12 + $0x440] ss:$16 sps:$4 sm:$0xff]  }
 0x2ba   :  { %5659 = vmatprep.subr.bf16.mxu1 %v7023_v54  ;;  %v7087_v54 = vld [vmem:[#allocation12 + $0x448] ss:$16 sps:$4 sm:$0xff]   ;;  %v7143_v40 = vld [vmem:[#allocation12 + $0x56c] ss:$16 sps:$4 sm:$0xff]  }
 0x2bc   :  { %5332 = vmatpush1.bf16.msra.mxu0 %v7018_v55  ;;  %v7092_v55 = vld [vmem:[#allocation12 + $0x464] ss:$16 sps:$4 sm:$0xff]  }
 0x2bd   :  { %5660 = vmatpush1.bf16.msra.mxu1 %v7021_v56  ;;  %5333 = vmatprep.subr.bf16.mxu0 %v7026_v58  ;;  %v7095_v56 = vld [vmem:[#allocation12 + $0x46c] ss:$16 sps:$4 sm:$0xff]   ;;  %v7090_v58 = vld [vmem:[#allocation12 + $0x460] ss:$16 sps:$4 sm:$0xff]  }
 0x2be   :  { %5661 = vmatprep.subr.bf16.mxu1 %v7029_v59  ;;  %v7093_v59 = vld [vmem:[#allocation12 + $0x468] ss:$16 sps:$4 sm:$0xff]  }
 0x2c0   :  { %5334 = vmatpush1.bf16.msra.mxu0 %v7024_v60  ;;  %v7098_v60 = vld [vmem:[#allocation12 + $0x484] ss:$16 sps:$4 sm:$0xff]  }
 0x2c1   :  { %5662 = vmatpush1.bf16.msra.mxu1 %v7027_v61  ;;  %5335 = vmatprep.subr.bf16.mxu0 %v7032_v62  ;;  %v7101_v61 = vld [vmem:[#allocation12 + $0x48c] ss:$16 sps:$4 sm:$0xff]   ;;  %v7096_v62 = vld [vmem:[#allocation12 + $0x480] ss:$16 sps:$4 sm:$0xff]  }
 0x2c2   :  { %5663 = vmatprep.subr.bf16.mxu1 %v7035_v63  ;;  %v7099_v63 = vld [vmem:[#allocation12 + $0x488] ss:$16 sps:$4 sm:$0xff]  }
 0x2c4   :  { %5336 = vmatpush1.bf16.msra.mxu0 %v7030_v0  ;;  %v7104_v0 = vld [vmem:[#allocation12 + $0x4a4] ss:$16 sps:$4 sm:$0xff]  }
 0x2c5   :  { %5664 = vmatpush1.bf16.msra.mxu1 %v7033_v1  ;;  %5337 = vmatprep.subr.bf16.mxu0 %v7038_v33  ;;  %v7107_v1 = vld [vmem:[#allocation12 + $0x4ac] ss:$16 sps:$4 sm:$0xff]   ;;  %v7102_v33 = vld [vmem:[#allocation12 + $0x4a0] ss:$16 sps:$4 sm:$0xff]  }
 0x2c6   :  { %5665 = vmatprep.subr.bf16.mxu1 %v7041_v2  ;;  %v7105_v2 = vld [vmem:[#allocation12 + $0x4a8] ss:$16 sps:$4 sm:$0xff]  }
 0x2c8   :  { %5338 = vmatpush1.bf16.msra.mxu0 %v7036_v3  ;;  %v7110_v3 = vld [vmem:[#allocation12 + $0x4c4] ss:$16 sps:$4 sm:$0xff]  }
 0x2c9   :  { %5666 = vmatpush1.bf16.msra.mxu1 %v7039_v4  ;;  %5339 = vmatprep.subr.bf16.mxu0 %v7044_v5  ;;  %v7113_v5 = vld [vmem:[#allocation12 + $0x4cc] ss:$16 sps:$4 sm:$0xff]  }
 0x2ca   :  { %5667 = vmatprep.subr.bf16.mxu1 %v7047_v7 }
 0x2cc   :  { %5340 = vmatpush1.bf16.msra.mxu0 %v7042_v8 }
 0x2cd   :  { %5668 = vmatpush1.bf16.msra.mxu1 %v7045_v9  ;;  %5341 = vmatprep.subr.bf16.mxu0 %v7050_v10 }
 0x2ce   :  { %5669 = vmatprep.subr.bf16.mxu1 %v7053_v11  ;;  %v7108_v11 = vld [vmem:[#allocation12 + $0x4c0] ss:$16 sps:$4 sm:$0xff]  }
 0x2d0   :  { %5342 = vmatpush1.bf16.msra.mxu0 %v7048_v12 }
 0x2d1   :  { %5670 = vmatpush1.bf16.msra.mxu1 %v7051_v17  ;;  %5343 = vmatprep.subr.bf16.mxu0 %v7056_v18  ;;  %v7111_v18 = vld [vmem:[#allocation12 + $0x4c8] ss:$16 sps:$4 sm:$0xff]  }
 0x2d2   :  { %5671 = vmatprep.subr.bf16.mxu1 %v7059_v20  ;;  %v7116_v20 = vld [vmem:[#allocation12 + $0x4e4] ss:$16 sps:$4 sm:$0xff]  }
 0x2d4   :  { %5344 = vmatpush1.bf16.msra.mxu0 %v7054_v21 }
 0x2d5   :  { %5672 = vmatpush1.bf16.msra.mxu1 %v7057_v23  ;;  %5345 = vmatprep.subr.bf16.mxu0 %v7062_v24  ;;  %v7114_v23 = vld [vmem:[#allocation12 + $0x4e0] ss:$16 sps:$4 sm:$0xff]   ;;  %v7117_v24 = vld [vmem:[#allocation12 + $0x4e8] ss:$16 sps:$4 sm:$0xff]  }
 0x2d6   :  { %5673 = vmatprep.subr.bf16.mxu1 %v7065_v25  ;;  %v7122_v25 = vld [vmem:[#allocation12 + $0x504] ss:$16 sps:$4 sm:$0xff]  }
 0x2d8   :  { %5346 = vmatpush1.bf16.msra.mxu0 %v7060_v27  ;;  %v7120_v27 = vld [vmem:[#allocation12 + $0x500] ss:$16 sps:$4 sm:$0xff]  }
 0x2d9   :  { %5674 = vmatpush1.bf16.msra.mxu1 %v7063_v29  ;;  %5347 = vmatprep.subr.bf16.mxu0 %v7068_v30  ;;  %v7128_v29 = vld [vmem:[#allocation12 + $0x524] ss:$16 sps:$4 sm:$0xff]   ;;  %v7131_v30 = vld [vmem:[#allocation12 + $0x52c] ss:$16 sps:$4 sm:$0xff]  }
 0x2da   :  { %5675 = vmatprep.subr.bf16.mxu1 %v7071_v31  ;;  %v7126_v31 = vld [vmem:[#allocation12 + $0x520] ss:$16 sps:$4 sm:$0xff]  }
 0x2dc   :  { %5348 = vmatpush1.bf16.msra.mxu0 %v7066_v35  ;;  %v7134_v35 = vld [vmem:[#allocation12 + $0x544] ss:$16 sps:$4 sm:$0xff]  }
 0x2dd   :  { %5676 = vmatpush1.bf16.msra.mxu1 %v7069_v37  ;;  %5358 = vmatprep.subr.bf16.mxu0 %v7074_v38  ;;  %v7132_v37 = vld [vmem:[#allocation12 + $0x540] ss:$16 sps:$4 sm:$0xff]   ;;  %v7135_v38 = vld [vmem:[#allocation12 + $0x548] ss:$16 sps:$4 sm:$0xff]  }
 0x2de   :  { %5686 = vmatprep.subr.bf16.mxu1 %v7077_v39  ;;  %v7140_v39 = vld [vmem:[#allocation12 + $0x564] ss:$16 sps:$4 sm:$0xff]  }
 0x2df   :  { %5350 = vmatmul.mubr.bf16.vlgmr.msra.gmra.mrb[16].mxu0 %v2168_v41 }
 0x2e0   :  { %5678 = vmatmul.mubr.bf16.vlgmr.msra.gmra.mrb[16].mxu1 %v2168_v41  ;;  %5359 = vmatpush1.bf16.msra.mxu0 %v7072_v16  ;;  %v7138_v16 = vld [vmem:[#allocation12 + $0x560] ss:$16 sps:$4 sm:$0xff]   ;;  %v7141_v41 = vld [vmem:[#allocation12 + $0x568] ss:$16 sps:$4 sm:$0xff]  }
 0x2e1   :  { %5390 = vmatprep.mubr.bf16.mxu0 %v2171_v48  ;;  %5687 = vmatpush1.bf16.msra.mxu1 %v7075_v44  ;;  %v7146_v44 = vld [vmem:[#allocation12 + $0x584] ss:$16 sps:$4 sm:$0xff]  }
 0x2e2   :  { %5718 = vmatprep.mubr.bf16.mxu1 %v2171_v48  ;;  %5360 = vmatprep.subr.bf16.mxu0 %v7080_v47  ;;  %v7149_v47 = vld [vmem:[#allocation12 + $0x58c] ss:$16 sps:$4 sm:$0xff]   ;;  %v7144_v48 = vld [vmem:[#allocation12 + $0x580] ss:$16 sps:$4 sm:$0xff]  }
 0x2e3   :  { %5688 = vmatprep.subr.bf16.mxu1 %v7083_v45  ;;  %v480_v45 = vsub.s32 4, %v8034_v13 }
 0x2e4   :  { %5361 = vmatpush1.bf16.msra.mxu0 %v7078_v49  ;;  %v7147_v49 = vld [vmem:[#allocation12 + $0x588] ss:$16 sps:$4 sm:$0xff]  }
 0x2e5   :  { %5689 = vmatpush1.bf16.msra.mxu1 %v7081_v50  ;;  %5362 = vmatprep.subr.bf16.mxu0 %v7086_v51  ;;  %v7152_v50 = vld [vmem:[#allocation12 + $0x5a4] ss:$16 sps:$4 sm:$0xff]   ;;  %v7155_v51 = vld [vmem:[#allocation12 + $0x5ac] ss:$16 sps:$4 sm:$0xff]  }
 0x2e6   :  { %5690 = vmatprep.subr.bf16.mxu1 %v7089_v52  ;;  %v492_v52 = vsub.s32 7, %v8034_v13 }
 0x2e8   :  { %5363 = vmatpush1.bf16.msra.mxu0 %v7084_v53  ;;  %v7150_v53 = vld [vmem:[#allocation12 + $0x5a0] ss:$16 sps:$4 sm:$0xff]  }
 0x2e9   :  { %5691 = vmatpush1.bf16.msra.mxu1 %v7087_v54  ;;  %5364 = vmatprep.subr.bf16.mxu0 %v7092_v55  ;;  %v481_v54 = vrot.slane %v8066_v6, %v480_v45  ;;  %v7153_v55 = vld [vmem:[#allocation12 + $0x5a8] ss:$16 sps:$4 sm:$0xff]  }
 0x2ea   :  { %5692 = vmatprep.subr.bf16.mxu1 %v7095_v56  ;;  %v7158_v56 = vld [vmem:[#allocation12 + $0x5c4] ss:$16 sps:$4 sm:$0xff]  }
 0x2ec   :  { %5365 = vmatpush1.bf16.msra.mxu0 %v7090_v58  ;;  %v7161_v58 = vld [vmem:[#allocation12 + $0x5cc] ss:$16 sps:$4 sm:$0xff]  }
 0x2ed   :  { %5693 = vmatpush1.bf16.msra.mxu1 %v7093_v59  ;;  %5366 = vmatprep.subr.bf16.mxu0 %v7098_v60  ;;  %v493_v59 = vrot.slane %v8066_v6, %v492_v52  ;;  %v7156_v60 = vld [vmem:[#allocation12 + $0x5c0] ss:$16 sps:$4 sm:$0xff]   ;;  %v7173_v6 = vld [vmem:[#allocation12 + $0x60c] ss:$16 sps:$4 sm:$0xff]  }
 0x2ee   :  { %5694 = vmatprep.subr.bf16.mxu1 %v7101_v61  ;;  %v1939_v61 = vadd.f32 %v8085_v42, %v481_v54  ;;  %v7168_v42 = vld [vmem:[#allocation12 + $0x600] ss:$16 sps:$4 sm:$0xff]   ;;  %v7207_v54 = vld [vmem:[#allocation12 + $0x6c8] ss:$16 sps:$4 sm:$0xff]  }
 0x2f0   :  { %5367 = vmatpush1.bf16.msra.mxu0 %v7096_v62  ;;  %v7159_v62 = vld [vmem:[#allocation12 + $0x5c8] ss:$16 sps:$4 sm:$0xff]  }
 0x2f1   :  { %5695 = vmatpush1.bf16.msra.mxu1 %v7099_v63  ;;  %5368 = vmatprep.subr.bf16.mxu0 %v7104_v0  ;;  %v7164_v63 = vld [vmem:[#allocation12 + $0x5e4] ss:$16 sps:$4 sm:$0xff]   ;;  %v7167_v0 = vld [vmem:[#allocation12 + $0x5ec] ss:$16 sps:$4 sm:$0xff]  }
 0x2f2   :  { %v8104_v4 = vpop.f32.mrb[8].mxu0  ;;  %5696 = vmatprep.subr.bf16.mxu1 %v7107_v1  ;;  %v1982_v1 = vadd.f32 %v8091_v46, %v493_v59  ;;  %v7179_v46 = vld [vmem:[#allocation12 + $0x62c] ss:$16 sps:$4 sm:$0xff]   ;;  %v7210_v59 = vld [vmem:[#allocation12 + $0x6e0] ss:$16 sps:$4 sm:$0xff]  }
 0x2f3   :  { %v8106_v7 = vpop.f32.mrb[8].mxu1  ;;  %v8108_v8 = vpop.f32.mrb[9].mxu0 }
 0x2f4   :  { %v8110_v9 = vpop.f32.mrb[9].mxu1  ;;  %v2024_v10 = vpop.f32.mrb[10].mxu0  ;;  %5369 = vmatpush1.bf16.msra.mxu0 %v7102_v33  ;;  %v7162_v33 = vld [vmem:[#allocation12 + $0x5e0] ss:$16 sps:$4 sm:$0xff]  }
 0x2f5   :  { %v2065_v12 = vpop.f32.mrb[10].mxu1  ;;  %5697 = vmatpush1.bf16.msra.mxu1 %v7105_v2  ;;  %v2025_v17 = vpop.f32.mrb[11].mxu0  ;;  %5370 = vmatprep.subr.bf16.mxu0 %v7110_v3  ;;  %v2154_v2 = vmax.f32 %v1939_v61, 0.0  ;;  %v7165_v3 = vld [vmem:[#allocation12 + $0x5e8] ss:$16 sps:$4 sm:$0xff]   ;;  %v2157_v10 = vmax.f32 %v1982_v1, 0.0 }
 0x2f6   :  { %v2066_v21 = vpop.f32.mrb[11].mxu1  ;;  %5698 = vmatprep.subr.bf16.mxu1 %v7113_v5  ;;  %v7170_v5 = vld [vmem:[#allocation12 + $0x604] ss:$16 sps:$4 sm:$0xff]   ;;  %v7171_v12 = vld [vmem:[#allocation12 + $0x608] ss:$16 sps:$4 sm:$0xff]  }
 0x2f7   :  { %v7176_v17 = vld [vmem:[#allocation12 + $0x624] ss:$16 sps:$4 sm:$0xff]   ;;  %v7177_v21 = vld [vmem:[#allocation12 + $0x628] ss:$16 sps:$4 sm:$0xff]  }
 0x2f8   :  { %5371 = vmatpush1.bf16.msra.mxu0 %v7108_v11  ;;  %v2170_v11 = vpack.c.bf16 %v2154_v2, %v2154_v2  ;;  %v7218_v61 = vld [vmem:[#allocation12 + $0x704] ss:$16 sps:$4 sm:$0xff]   ;;  %v7222_v2 = vld [vmem:[#allocation12 + $0x720] ss:$16 sps:$4 sm:$0xff]  }
 0x2f9   :  { %5699 = vmatpush1.bf16.msra.mxu1 %v7111_v18  ;;  %5372 = vmatprep.subr.bf16.mxu0 %v7116_v20  ;;  %v2173_v18 = vpack.c.bf16 %v2157_v10, %v2157_v10  ;;  %v7174_v20 = vld [vmem:[#allocation12 + $0x620] ss:$16 sps:$4 sm:$0xff]   ;;  %v7224_v1 = vld [vmem:[#allocation12 + $0x724] ss:$16 sps:$4 sm:$0xff]  }
 0x2fa   :  { %5700 = vmatprep.subr.bf16.mxu1 %v7119_v22  ;;  %v7182_v22 = vld [vmem:[#allocation12 + $0x644] ss:$16 sps:$4 sm:$0xff]   ;;  %v7228_v10 = vld [vmem:[#allocation12 + $0x740] ss:$16 sps:$4 sm:$0xff]  }
 0x2fc   :  { %5373 = vmatpush1.bf16.msra.mxu0 %v7114_v23  ;;  %v7185_v23 = vld [vmem:[#allocation12 + $0x64c] ss:$16 sps:$4 sm:$0xff]  }
 0x2fd   :  { %5701 = vmatpush1.bf16.msra.mxu1 %v7117_v24  ;;  %5374 = vmatprep.subr.bf16.mxu0 %v7122_v25  ;;  %v7180_v24 = vld [vmem:[#allocation12 + $0x640] ss:$16 sps:$4 sm:$0xff]   ;;  %v7183_v25 = vld [vmem:[#allocation12 + $0x648] ss:$16 sps:$4 sm:$0xff]  }
 0x2fe   :  { %5702 = vmatprep.subr.bf16.mxu1 %v7125_v26  ;;  %v7188_v26 = vld [vmem:[#allocation12 + $0x664] ss:$16 sps:$4 sm:$0xff]  }
 0x300   :  { %5375 = vmatpush1.bf16.msra.mxu0 %v7120_v27  ;;  %v7191_v27 = vld [vmem:[#allocation12 + $0x66c] ss:$16 sps:$4 sm:$0xff]  }
 0x301   :  { %5703 = vmatpush1.bf16.msra.mxu1 %v7123_v28  ;;  %5376 = vmatprep.subr.bf16.mxu0 %v7128_v29  ;;  %v7186_v28 = vld [vmem:[#allocation12 + $0x660] ss:$16 sps:$4 sm:$0xff]   ;;  %v7189_v29 = vld [vmem:[#allocation12 + $0x668] ss:$16 sps:$4 sm:$0xff]  }
 0x302   :  { %5704 = vmatprep.subr.bf16.mxu1 %v7131_v30  ;;  %v7194_v30 = vld [vmem:[#allocation12 + $0x684] ss:$16 sps:$4 sm:$0xff]  }
 0x304   :  { %5377 = vmatpush1.bf16.msra.mxu0 %v7126_v31  ;;  %v7197_v31 = vld [vmem:[#allocation12 + $0x68c] ss:$16 sps:$4 sm:$0xff]  }
 0x305   :  { %5705 = vmatpush1.bf16.msra.mxu1 %v7129_v32  ;;  %5378 = vmatprep.subr.bf16.mxu0 %v7134_v35  ;;  %v7192_v32 = vld [vmem:[#allocation12 + $0x680] ss:$16 sps:$4 sm:$0xff]   ;;  %v7195_v35 = vld [vmem:[#allocation12 + $0x688] ss:$16 sps:$4 sm:$0xff]  }
 0x306   :  { %5706 = vmatprep.subr.bf16.mxu1 %v7137_v36  ;;  %v7200_v36 = vld [vmem:[#allocation12 + $0x6a4] ss:$16 sps:$4 sm:$0xff]  }
 0x308   :  { %5379 = vmatpush1.bf16.msra.mxu0 %v7132_v37  ;;  %v7203_v37 = vld [vmem:[#allocation12 + $0x6ac] ss:$16 sps:$4 sm:$0xff]  }
 0x309   :  { %5707 = vmatpush1.bf16.msra.mxu1 %v7135_v38  ;;  %5380 = vmatprep.subr.bf16.mxu0 %v7140_v39  ;;  %v7198_v38 = vld [vmem:[#allocation12 + $0x6a0] ss:$16 sps:$4 sm:$0xff]   ;;  %v7201_v39 = vld [vmem:[#allocation12 + $0x6a8] ss:$16 sps:$4 sm:$0xff]  }
 0x30a   :  { %5708 = vmatprep.subr.bf16.mxu1 %v7143_v40  ;;  %v7206_v40 = vld [vmem:[#allocation12 + $0x6c4] ss:$16 sps:$4 sm:$0xff]  }
 0x30c   :  { %5381 = vmatpush1.bf16.msra.mxu0 %v7138_v16 }
 0x30d   :  { %5709 = vmatpush1.bf16.msra.mxu1 %v7141_v41  ;;  %5382 = vmatprep.subr.bf16.mxu0 %v7146_v44  ;;  %v7209_v41 = vld [vmem:[#allocation12 + $0x6cc] ss:$16 sps:$4 sm:$0xff]  }
 0x30e   :  { %5710 = vmatprep.subr.bf16.mxu1 %v7149_v47 }
 0x310   :  { %5383 = vmatpush1.bf16.msra.mxu0 %v7144_v48 }
 0x311   :  { %5711 = vmatpush1.bf16.msra.mxu1 %v7147_v49  ;;  %5384 = vmatprep.subr.bf16.mxu0 %v7152_v50  ;;  %v7204_v50 = vld [vmem:[#allocation12 + $0x6c0] ss:$16 sps:$4 sm:$0xff]  }
 0x312   :  { %5712 = vmatprep.subr.bf16.mxu1 %v7155_v51 }
 0x314   :  { %5385 = vmatpush1.bf16.msra.mxu0 %v7150_v53 }
 0x315   :  { %5713 = vmatpush1.bf16.msra.mxu1 %v7153_v55  ;;  %5386 = vmatprep.subr.bf16.mxu0 %v7158_v56  ;;  %v7212_v55 = vld [vmem:[#allocation12 + $0x6e4] ss:$16 sps:$4 sm:$0xff]  }
 0x316   :  { %5714 = vmatprep.subr.bf16.mxu1 %v7161_v58  ;;  %v7215_v58 = vld [vmem:[#allocation12 + $0x6ec] ss:$16 sps:$4 sm:$0xff]  }
 0x318   :  { %5387 = vmatpush1.bf16.msra.mxu0 %v7156_v60  ;;  %v7213_v60 = vld [vmem:[#allocation12 + $0x6e8] ss:$16 sps:$4 sm:$0xff]  }
 0x319   :  { %5715 = vmatpush1.bf16.msra.mxu1 %v7159_v62  ;;  %5388 = vmatprep.subr.bf16.mxu0 %v7164_v63  ;;  %v7221_v62 = vld [vmem:[#allocation12 + $0x70c] ss:$16 sps:$4 sm:$0xff]   ;;  %v7216_v63 = vld [vmem:[#allocation12 + $0x700] ss:$16 sps:$4 sm:$0xff]  }
 0x31a   :  { %5716 = vmatprep.subr.bf16.mxu1 %v7167_v0  ;;  %v7219_v0 = vld [vmem:[#allocation12 + $0x708] ss:$16 sps:$4 sm:$0xff]  }
 0x31c   :  { %5389 = vmatpush1.bf16.msra.mxu0 %v7162_v33  ;;  %v7227_v33 = vld [vmem:[#allocation12 + $0x72c] ss:$16 sps:$4 sm:$0xff]  }
 0x31d   :  { %5717 = vmatpush1.bf16.msra.mxu1 %v7165_v3  ;;  %5399 = vmatprep.subr.bf16.mxu0 %v7170_v5  ;;  %v7225_v3 = vld [vmem:[#allocation12 + $0x728] ss:$16 sps:$4 sm:$0xff]   ;;  %v7230_v5 = vld [vmem:[#allocation12 + $0x744] ss:$16 sps:$4 sm:$0xff]  }
 0x31e   :  { %5727 = vmatprep.subr.bf16.mxu1 %v7173_v6  ;;  %v7233_v6 = vld [vmem:[#allocation12 + $0x74c] ss:$16 sps:$4 sm:$0xff]  }
 0x31f   :  { %5391 = vmatmul.mubr.bf16.vlgmr.msra.gmra.mrb[16].mxu0 %v2170_v11 }
 0x320   :  { %5719 = vmatmul.mubr.bf16.vlgmr.msra.gmra.mrb[16].mxu1 %v2170_v11  ;;  %5400 = vmatpush1.bf16.msra.mxu0 %v7168_v42  ;;  %v7231_v42 = vld [vmem:[#allocation12 + $0x748] ss:$16 sps:$4 sm:$0xff]   ;;  %v7236_v11 = vld [vmem:[#allocation12 + $0x764] ss:$16 sps:$4 sm:$0xff]  }
 0x321   :  { %5431 = vmatprep.mubr.bf16.mxu0 %v2173_v18  ;;  %5728 = vmatpush1.bf16.msra.mxu1 %v7171_v12  ;;  %v7239_v12 = vld [vmem:[#allocation12 + $0x76c] ss:$16 sps:$4 sm:$0xff]  }
 0x322   :  { %5759 = vmatprep.mubr.bf16.mxu1 %v2173_v18  ;;  %5401 = vmatprep.subr.bf16.mxu0 %v7176_v17  ;;  %v7234_v17 = vld [vmem:[#allocation12 + $0x760] ss:$16 sps:$4 sm:$0xff]   ;;  %v7237_v18 = vld [vmem:[#allocation12 + $0x768] ss:$16 sps:$4 sm:$0xff]  }
 0x323   :  { %5729 = vmatprep.subr.bf16.mxu1 %v7179_v46  ;;  %v7242_v46 = vld [vmem:[#allocation12 + $0x784] ss:$16 sps:$4 sm:$0xff]  }
 0x324   :  { %5402 = vmatpush1.bf16.msra.mxu0 %v7174_v20  ;;  %v7245_v20 = vld [vmem:[#allocation12 + $0x78c] ss:$16 sps:$4 sm:$0xff]  }
 0x325   :  { %5730 = vmatpush1.bf16.msra.mxu1 %v7177_v21  ;;  %5403 = vmatprep.subr.bf16.mxu0 %v7182_v22  ;;  %v7240_v21 = vld [vmem:[#allocation12 + $0x780] ss:$16 sps:$4 sm:$0xff]   ;;  %v488_v22 = vsub.s32 6, %v8034_v13 }
 0x326   :  { %5731 = vmatprep.subr.bf16.mxu1 %v7185_v23  ;;  %v7243_v23 = vld [vmem:[#allocation12 + $0x788] ss:$16 sps:$4 sm:$0xff]  }
 0x328   :  { %5404 = vmatpush1.bf16.msra.mxu0 %v7180_v24  ;;  %v7248_v24 = vld [vmem:[#allocation12 + $0x7a4] ss:$16 sps:$4 sm:$0xff]  }
 0x329   :  { %5732 = vmatpush1.bf16.msra.mxu1 %v7183_v25  ;;  %5405 = vmatprep.subr.bf16.mxu0 %v7188_v26  ;;  %v7251_v25 = vld [vmem:[#allocation12 + $0x7ac] ss:$16 sps:$4 sm:$0xff]  }
 0x32a   :  { %5733 = vmatprep.subr.bf16.mxu1 %v7191_v27  ;;  %v8131_v26 = vld [vmem:[#allocation11 + $0x8] sm:$0xff]  ;;  %v7246_v27 = vld [vmem:[#allocation12 + $0x7a0] ss:$16 sps:$4 sm:$0xff]  }
 0x32c   :  { %5406 = vmatpush1.bf16.msra.mxu0 %v7186_v28  ;;  %v7652_v28 = vld [vmem:[#allocation11] sm:$0xff] }
 0x32d   :  { %5734 = vmatpush1.bf16.msra.mxu1 %v7189_v29  ;;  %5407 = vmatprep.subr.bf16.mxu0 %v7194_v30  ;;  %v489_v29 = vrot.slane %v7652_v28, %v488_v22  ;;  %v7249_v30 = vld [vmem:[#allocation12 + $0x7a8] ss:$16 sps:$4 sm:$0xff]   ;;  %v7311_v28 = vld [vmem:[#allocation12 + $0x8ec] ss:$16 sps:$4 sm:$0xff]  }
 0x32e   :  { %5735 = vmatprep.subr.bf16.mxu1 %v7197_v31  ;;  %v7254_v31 = vld [vmem:[#allocation12 + $0x7c4] ss:$16 sps:$4 sm:$0xff]  }
 0x330   :  { %5408 = vmatpush1.bf16.msra.mxu0 %v7192_v32  ;;  %v7257_v32 = vld [vmem:[#allocation12 + $0x7cc] ss:$16 sps:$4 sm:$0xff]  }
 0x331   :  { %5736 = vmatpush1.bf16.msra.mxu1 %v7195_v35  ;;  %5409 = vmatprep.subr.bf16.mxu0 %v7200_v36  ;;  %v501_v35 = vrot.slane %v8131_v26, %v8040_v15  ;;  %v7252_v36 = vld [vmem:[#allocation12 + $0x7c0] ss:$16 sps:$4 sm:$0xff]  }
 0x332   :  { %v8122_v16 = vpop.f32.mrb[12].mxu0  ;;  %5737 = vmatprep.subr.bf16.mxu1 %v7203_v37  ;;  %v1980_v37 = vadd.f32 %v8087_v43, %v489_v29  ;;  %v7264_v43 = vld [vmem:[#allocation12 + $0x800] ss:$16 sps:$4 sm:$0xff]  }
 0x333   :  { %v8124_v44 = vpop.f32.mrb[12].mxu1  ;;  %v8126_v47 = vpop.f32.mrb[13].mxu0  ;;  %v7306_v29 = vld [vmem:[#allocation12 + $0x8e0] ss:$16 sps:$4 sm:$0xff]  }
 0x334   :  { %v8128_v48 = vpop.f32.mrb[13].mxu1  ;;  %v2106_v49 = vpop.f32.mrb[14].mxu0  ;;  %5410 = vmatpush1.bf16.msra.mxu0 %v7198_v38  ;;  %v7255_v38 = vld [vmem:[#allocation12 + $0x7c8] ss:$16 sps:$4 sm:$0xff]  }
 0x335   :  { %v2147_v51 = vpop.f32.mrb[14].mxu1  ;;  %5738 = vmatpush1.bf16.msra.mxu1 %v7201_v39  ;;  %v2107_v53 = vpop.f32.mrb[15].mxu0  ;;  %5411 = vmatprep.subr.bf16.mxu0 %v7206_v40  ;;  %v7260_v39 = vld [vmem:[#allocation12 + $0x7e4] ss:$16 sps:$4 sm:$0xff]   ;;  %v7263_v40 = vld [vmem:[#allocation12 + $0x7ec] ss:$16 sps:$4 sm:$0xff]  }
 0x336   :  { %v2148_v56 = vpop.f32.mrb[15].mxu1  ;;  %5739 = vmatprep.subr.bf16.mxu1 %v7209_v41  ;;  %v2023_v41 = vadd.f32 %v8108_v8, %v501_v35  ;;  %v7258_v49 = vld [vmem:[#allocation12 + $0x7e0] ss:$16 sps:$4 sm:$0xff]   ;;  %v7261_v51 = vld [vmem:[#allocation12 + $0x7e8] ss:$16 sps:$4 sm:$0xff]  }
 0x337   :  { %v7266_v53 = vld [vmem:[#allocation12 + $0x804] ss:$16 sps:$4 sm:$0xff]   ;;  %v7275_v8 = vld [vmem:[#allocation12 + $0x82c] ss:$16 sps:$4 sm:$0xff]   ;;  %v7312_v35 = vld [vmem:[#allocation12 + $0x900] ss:$16 sps:$4 sm:$0xff]  }
 0x338   :  { %5412 = vmatpush1.bf16.msra.mxu0 %v7204_v50  ;;  %v2156_v50 = vmax.f32 %v1980_v37, 0.0  ;;  %v7320_v37 = vld [vmem:[#allocation12 + $0x924] ss:$16 sps:$4 sm:$0xff]  }
 0x339   :  { %5740 = vmatpush1.bf16.msra.mxu1 %v7207_v54  ;;  %5413 = vmatprep.subr.bf16.mxu0 %v7212_v55  ;;  %v7269_v54 = vld [vmem:[#allocation12 + $0x80c] ss:$16 sps:$4 sm:$0xff]   ;;  %v2159_v55 = vmax.f32 %v2023_v41, 0.0  ;;  %v7326_v41 = vld [vmem:[#allocation12 + $0x944] ss:$16 sps:$4 sm:$0xff]  }
 0x33a   :  { %5741 = vmatprep.subr.bf16.mxu1 %v7215_v58  ;;  %v2172_v56 = vpack.c.bf16 %v2156_v50, %v2156_v50  ;;  %v7267_v58 = vld [vmem:[#allocation12 + $0x808] ss:$16 sps:$4 sm:$0xff]   ;;  %v7324_v50 = vld [vmem:[#allocation12 + $0x940] ss:$16 sps:$4 sm:$0xff]  }
 0x33c   :  { %5414 = vmatpush1.bf16.msra.mxu0 %v7210_v59  ;;  %v7272_v59 = vld [vmem:[#allocation12 + $0x824] ss:$16 sps:$4 sm:$0xff]  }
 0x33d   :  { %5742 = vmatpush1.bf16.msra.mxu1 %v7213_v60  ;;  %5415 = vmatprep.subr.bf16.mxu0 %v7218_v61  ;;  %v2175_v60 = vpack.c.bf16 %v2159_v55, %v2159_v55  ;;  %v7270_v61 = vld [vmem:[#allocation12 + $0x820] ss:$16 sps:$4 sm:$0xff]  }
 0x33e   :  { %5743 = vmatprep.subr.bf16.mxu1 %v7221_v62  ;;  %v7273_v62 = vld [vmem:[#allocation12 + $0x828] ss:$16 sps:$4 sm:$0xff]   ;;  %v7330_v55 = vld [vmem:[#allocation12 + $0x960] ss:$16 sps:$4 sm:$0xff]  }
 0x340   :  { %5416 = vmatpush1.bf16.msra.mxu0 %v7216_v63  ;;  %v7278_v63 = vld [vmem:[#allocation12 + $0x844] ss:$16 sps:$4 sm:$0xff]  }
 0x341   :  { %5744 = vmatpush1.bf16.msra.mxu1 %v7219_v0  ;;  %5417 = vmatprep.subr.bf16.mxu0 %v7224_v1  ;;  %v7281_v0 = vld [vmem:[#allocation12 + $0x84c] ss:$16 sps:$4 sm:$0xff]   ;;  %v7276_v1 = vld [vmem:[#allocation12 + $0x840] ss:$16 sps:$4 sm:$0xff]  }
 0x342   :  { %5745 = vmatprep.subr.bf16.mxu1 %v7227_v33  ;;  %v7279_v33 = vld [vmem:[#allocation12 + $0x848] ss:$16 sps:$4 sm:$0xff]  }
 0x344   :  { %5418 = vmatpush1.bf16.msra.mxu0 %v7222_v2  ;;  %v7284_v2 = vld [vmem:[#allocation12 + $0x864] ss:$16 sps:$4 sm:$0xff]  }
 0x345   :  { %5746 = vmatpush1.bf16.msra.mxu1 %v7225_v3  ;;  %5419 = vmatprep.subr.bf16.mxu0 %v7230_v5  ;;  %v7287_v3 = vld [vmem:[#allocation12 + $0x86c] ss:$16 sps:$4 sm:$0xff]   ;;  %v7282_v5 = vld [vmem:[#allocation12 + $0x860] ss:$16 sps:$4 sm:$0xff]  }
 0x346   :  { %5747 = vmatprep.subr.bf16.mxu1 %v7233_v6  ;;  %v7285_v6 = vld [vmem:[#allocation12 + $0x868] ss:$16 sps:$4 sm:$0xff]  }
 0x348   :  { %5420 = vmatpush1.bf16.msra.mxu0 %v7228_v10  ;;  %v7290_v10 = vld [vmem:[#allocation12 + $0x884] ss:$16 sps:$4 sm:$0xff]  }
 0x349   :  { %5748 = vmatpush1.bf16.msra.mxu1 %v7231_v42  ;;  %5421 = vmatprep.subr.bf16.mxu0 %v7236_v11  ;;  %v7293_v42 = vld [vmem:[#allocation12 + $0x88c] ss:$16 sps:$4 sm:$0xff]   ;;  %v7288_v11 = vld [vmem:[#allocation12 + $0x880] ss:$16 sps:$4 sm:$0xff]  }
 0x34a   :  { %5749 = vmatprep.subr.bf16.mxu1 %v7239_v12  ;;  %v7291_v12 = vld [vmem:[#allocation12 + $0x888] ss:$16 sps:$4 sm:$0xff]  }
 0x34c   :  { %5422 = vmatpush1.bf16.msra.mxu0 %v7234_v17  ;;  %v7296_v17 = vld [vmem:[#allocation12 + $0x8a4] ss:$16 sps:$4 sm:$0xff]  }
 0x34d   :  { %5750 = vmatpush1.bf16.msra.mxu1 %v7237_v18  ;;  %5423 = vmatprep.subr.bf16.mxu0 %v7242_v46  ;;  %v7299_v18 = vld [vmem:[#allocation12 + $0x8ac] ss:$16 sps:$4 sm:$0xff]   ;;  %v7294_v46 = vld [vmem:[#allocation12 + $0x8a0] ss:$16 sps:$4 sm:$0xff]  }
 0x34e   :  { %5751 = vmatprep.subr.bf16.mxu1 %v7245_v20  ;;  %v7297_v20 = vld [vmem:[#allocation12 + $0x8a8] ss:$16 sps:$4 sm:$0xff]  }
 0x350   :  { %5424 = vmatpush1.bf16.msra.mxu0 %v7240_v21  ;;  %v7302_v21 = vld [vmem:[#allocation12 + $0x8c4] ss:$16 sps:$4 sm:$0xff]  }
 0x351   :  { %5752 = vmatpush1.bf16.msra.mxu1 %v7243_v23  ;;  %5425 = vmatprep.subr.bf16.mxu0 %v7248_v24  ;;  %v7305_v23 = vld [vmem:[#allocation12 + $0x8cc] ss:$16 sps:$4 sm:$0xff]   ;;  %v7300_v24 = vld [vmem:[#allocation12 + $0x8c0] ss:$16 sps:$4 sm:$0xff]  }
 0x352   :  { %5753 = vmatprep.subr.bf16.mxu1 %v7251_v25  ;;  %v7303_v25 = vld [vmem:[#allocation12 + $0x8c8] ss:$16 sps:$4 sm:$0xff]  }
 0x354   :  { %5426 = vmatpush1.bf16.msra.mxu0 %v7246_v27  ;;  %v7308_v27 = vld [vmem:[#allocation12 + $0x8e4] ss:$16 sps:$4 sm:$0xff]  }
 0x355   :  { %5754 = vmatpush1.bf16.msra.mxu1 %v7249_v30  ;;  %5427 = vmatprep.subr.bf16.mxu0 %v7254_v31  ;;  %v7309_v30 = vld [vmem:[#allocation12 + $0x8e8] ss:$16 sps:$4 sm:$0xff]   ;;  %v7314_v31 = vld [vmem:[#allocation12 + $0x904] ss:$16 sps:$4 sm:$0xff]  }
 0x356   :  { %5755 = vmatprep.subr.bf16.mxu1 %v7257_v32  ;;  %v7317_v32 = vld [vmem:[#allocation12 + $0x90c] ss:$16 sps:$4 sm:$0xff]  }
 0x358   :  { %5428 = vmatpush1.bf16.msra.mxu0 %v7252_v36  ;;  %v7315_v36 = vld [vmem:[#allocation12 + $0x908] ss:$16 sps:$4 sm:$0xff]  }
 0x359   :  { %5756 = vmatpush1.bf16.msra.mxu1 %v7255_v38  ;;  %5429 = vmatprep.subr.bf16.mxu0 %v7260_v39  ;;  %v7323_v38 = vld [vmem:[#allocation12 + $0x92c] ss:$16 sps:$4 sm:$0xff]   ;;  %v7318_v39 = vld [vmem:[#allocation12 + $0x920] ss:$16 sps:$4 sm:$0xff]  }
 0x35a   :  { %5757 = vmatprep.subr.bf16.mxu1 %v7263_v40  ;;  %v7321_v40 = vld [vmem:[#allocation12 + $0x928] ss:$16 sps:$4 sm:$0xff]  }
 0x35c   :  { %5430 = vmatpush1.bf16.msra.mxu0 %v7258_v49  ;;  %v7329_v49 = vld [vmem:[#allocation12 + $0x94c] ss:$16 sps:$4 sm:$0xff]  }
 0x35d   :  { %5758 = vmatpush1.bf16.msra.mxu1 %v7261_v51  ;;  %5440 = vmatprep.subr.bf16.mxu0 %v7266_v53  ;;  %v7327_v51 = vld [vmem:[#allocation12 + $0x948] ss:$16 sps:$4 sm:$0xff]   ;;  %v7332_v53 = vld [vmem:[#allocation12 + $0x964] ss:$16 sps:$4 sm:$0xff]  }
 0x35e   :  { %5768 = vmatprep.subr.bf16.mxu1 %v7269_v54  ;;  %v7335_v54 = vld [vmem:[#allocation12 + $0x96c] ss:$16 sps:$4 sm:$0xff]  }
 0x35f   :  { %5432 = vmatmul.mubr.bf16.vlgmr.msra.gmra.mrb[16].mxu0 %v2172_v56 }
 0x360   :  { %5760 = vmatmul.mubr.bf16.vlgmr.msra.gmra.mrb[16].mxu1 %v2172_v56  ;;  %5441 = vmatpush1.bf16.msra.mxu0 %v7264_v43  ;;  %v7333_v43 = vld [vmem:[#allocation12 + $0x968] ss:$16 sps:$4 sm:$0xff]   ;;  %v7338_v56 = vld [vmem:[#allocation12 + $0x984] ss:$16 sps:$4 sm:$0xff]  }
 0x361   :  { %5472 = vmatprep.mubr.bf16.mxu0 %v2175_v60  ;;  %5769 = vmatpush1.bf16.msra.mxu1 %v7267_v58  ;;  %v7341_v58 = vld [vmem:[#allocation12 + $0x98c] ss:$16 sps:$4 sm:$0xff]  }
 0x362   :  { %5800 = vmatprep.mubr.bf16.mxu1 %v2175_v60  ;;  %5442 = vmatprep.subr.bf16.mxu0 %v7272_v59  ;;  %v7336_v59 = vld [vmem:[#allocation12 + $0x980] ss:$16 sps:$4 sm:$0xff]   ;;  %v7339_v60 = vld [vmem:[#allocation12 + $0x988] ss:$16 sps:$4 sm:$0xff]  }
 0x363   :  { %5770 = vmatprep.subr.bf16.mxu1 %v7275_v8  ;;  %v7344_v8 = vld [vmem:[#allocation12 + $0x9a4] ss:$16 sps:$4 sm:$0xff]  }
 0x364   :  { %5443 = vmatpush1.bf16.msra.mxu0 %v7270_v61  ;;  %v7347_v61 = vld [vmem:[#allocation12 + $0x9ac] ss:$16 sps:$4 sm:$0xff]  }
 0x365   :  { %5771 = vmatpush1.bf16.msra.mxu1 %v7273_v62  ;;  %5444 = vmatprep.subr.bf16.mxu0 %v7278_v63  ;;  %v7342_v62 = vld [vmem:[#allocation12 + $0x9a0] ss:$16 sps:$4 sm:$0xff]   ;;  %v497_v63 = vrot.slane %v8131_v26, %v8037_v14 }
 0x366   :  { %5772 = vmatprep.subr.bf16.mxu1 %v7281_v0  ;;  %v7345_v0 = vld [vmem:[#allocation12 + $0x9a8] ss:$16 sps:$4 sm:$0xff]  }
 0x368   :  { %5445 = vmatpush1.bf16.msra.mxu0 %v7276_v1  ;;  %v7350_v1 = vld [vmem:[#allocation12 + $0x9c4] ss:$16 sps:$4 sm:$0xff]  }
 0x369   :  { %5773 = vmatpush1.bf16.msra.mxu1 %v7279_v33  ;;  %5446 = vmatprep.subr.bf16.mxu0 %v7284_v2  ;;  %v7353_v33 = vld [vmem:[#allocation12 + $0x9cc] ss:$16 sps:$4 sm:$0xff]   ;;  %v509_v2 = vrot.slane %v8131_v26, %v8077_v57 }
 0x36a   :  { %5774 = vmatprep.subr.bf16.mxu1 %v7287_v3  ;;  %v7348_v3 = vld [vmem:[#allocation12 + $0x9c0] ss:$16 sps:$4 sm:$0xff]  }
 0x36c   :  { %5447 = vmatpush1.bf16.msra.mxu0 %v7282_v5  ;;  %v2021_v5 = vadd.f32 %v8104_v4, %v497_v63  ;;  %v7360_v4 = vld [vmem:[#allocation12 + $0xa00] ss:$16 sps:$4 sm:$0xff]   ;;  %v7410_v63 = vld [vmem:[#allocation12 + $0xb04] ss:$16 sps:$4 sm:$0xff]  }
 0x36d   :  { %5775 = vmatpush1.bf16.msra.mxu1 %v7285_v6  ;;  %5448 = vmatprep.subr.bf16.mxu0 %v7290_v10  ;;  %v7351_v6 = vld [vmem:[#allocation12 + $0x9c8] ss:$16 sps:$4 sm:$0xff]   ;;  %v7356_v10 = vld [vmem:[#allocation12 + $0x9e4] ss:$16 sps:$4 sm:$0xff]  }
 0x36e   :  { %5776 = vmatprep.subr.bf16.mxu1 %v7293_v42  ;;  %v7359_v42 = vld [vmem:[#allocation12 + $0x9ec] ss:$16 sps:$4 sm:$0xff]  }
 0x370   :  { %5449 = vmatpush1.bf16.msra.mxu0 %v7288_v11  ;;  %v2064_v11 = vadd.f32 %v8110_v9, %v509_v2  ;;  %v7371_v9 = vld [vmem:[#allocation12 + $0xa2c] ss:$16 sps:$4 sm:$0xff]   ;;  %v7416_v2 = vld [vmem:[#allocation12 + $0xb24] ss:$16 sps:$4 sm:$0xff]  }
 0x371   :  { %5777 = vmatpush1.bf16.msra.mxu1 %v7291_v12  ;;  %5450 = vmatprep.subr.bf16.mxu0 %v7296_v17  ;;  %v7354_v12 = vld [vmem:[#allocation12 + $0x9e0] ss:$16 sps:$4 sm:$0xff]   ;;  %v2158_v17 = vmax.f32 %v2021_v5, 0.0 }
 0x372   :  { %5778 = vmatprep.subr.bf16.mxu1 %v7299_v18  ;;  %v7357_v18 = vld [vmem:[#allocation12 + $0x9e8] ss:$16 sps:$4 sm:$0xff]   ;;  %v7414_v5 = vld [vmem:[#allocation12 + $0xb20] ss:$16 sps:$4 sm:$0xff]  }
 0x374   :  { %5451 = vmatpush1.bf16.msra.mxu0 %v7294_v46  ;;  %v7362_v46 = vld [vmem:[#allocation12 + $0xa04] ss:$16 sps:$4 sm:$0xff]  }
 0x375   :  { %5779 = vmatpush1.bf16.msra.mxu1 %v7297_v20  ;;  %5452 = vmatprep.subr.bf16.mxu0 %v7302_v21  ;;  %v7365_v20 = vld [vmem:[#allocation12 + $0xa0c] ss:$16 sps:$4 sm:$0xff]   ;;  %v2161_v21 = vmax.f32 %v2064_v11, 0.0  ;;  %v7420_v11 = vld [vmem:[#allocation12 + $0xb40] ss:$16 sps:$4 sm:$0xff]  }
 0x376   :  { %5780 = vmatprep.subr.bf16.mxu1 %v7305_v23  ;;  %v2174_v23 = vpack.c.bf16 %v2158_v17, %v2158_v17  ;;  %v7428_v17 = vld [vmem:[#allocation12 + $0xb64] ss:$16 sps:$4 sm:$0xff]  }
 0x378   :  { %5453 = vmatpush1.bf16.msra.mxu0 %v7300_v24  ;;  %v7363_v24 = vld [vmem:[#allocation12 + $0xa08] ss:$16 sps:$4 sm:$0xff]  }
 0x379   :  { %5781 = vmatpush1.bf16.msra.mxu1 %v7303_v25  ;;  %5454 = vmatprep.subr.bf16.mxu0 %v7308_v27  ;;  %v7368_v25 = vld [vmem:[#allocation12 + $0xa24] ss:$16 sps:$4 sm:$0xff]   ;;  %v2177_v27 = vpack.c.bf16 %v2161_v21, %v2161_v21 }
 0x37a   :  { %5782 = vmatprep.subr.bf16.mxu1 %v7311_v28  ;;  %v7366_v28 = vld [vmem:[#allocation12 + $0xa20] ss:$16 sps:$4 sm:$0xff]   ;;  %v7434_v21 = vld [vmem:[#allocation12 + $0xb84] ss:$16 sps:$4 sm:$0xff]  }
 0x37c   :  { %5455 = vmatpush1.bf16.msra.mxu0 %v7306_v29  ;;  %v7369_v29 = vld [vmem:[#allocation12 + $0xa28] ss:$16 sps:$4 sm:$0xff]  }
 0x37d   :  { %5783 = vmatpush1.bf16.msra.mxu1 %v7309_v30  ;;  %5456 = vmatprep.subr.bf16.mxu0 %v7314_v31  ;;  %v7374_v30 = vld [vmem:[#allocation12 + $0xa44] ss:$16 sps:$4 sm:$0xff]   ;;  %v7377_v31 = vld [vmem:[#allocation12 + $0xa4c] ss:$16 sps:$4 sm:$0xff]  }
 0x37e   :  { %5784 = vmatprep.subr.bf16.mxu1 %v7317_v32  ;;  %v7372_v32 = vld [vmem:[#allocation12 + $0xa40] ss:$16 sps:$4 sm:$0xff]  }
 0x380   :  { %5457 = vmatpush1.bf16.msra.mxu0 %v7312_v35  ;;  %v7375_v35 = vld [vmem:[#allocation12 + $0xa48] ss:$16 sps:$4 sm:$0xff]  }
 0x381   :  { %5785 = vmatpush1.bf16.msra.mxu1 %v7315_v36  ;;  %5458 = vmatprep.subr.bf16.mxu0 %v7320_v37  ;;  %v7380_v36 = vld [vmem:[#allocation12 + $0xa64] ss:$16 sps:$4 sm:$0xff]   ;;  %v7383_v37 = vld [vmem:[#allocation12 + $0xa6c] ss:$16 sps:$4 sm:$0xff]  }
 0x382   :  { %5786 = vmatprep.subr.bf16.mxu1 %v7323_v38  ;;  %v7378_v38 = vld [vmem:[#allocation12 + $0xa60] ss:$16 sps:$4 sm:$0xff]  }
 0x384   :  { %5459 = vmatpush1.bf16.msra.mxu0 %v7318_v39  ;;  %v7381_v39 = vld [vmem:[#allocation12 + $0xa68] ss:$16 sps:$4 sm:$0xff]  }
 0x385   :  { %5787 = vmatpush1.bf16.msra.mxu1 %v7321_v40  ;;  %5460 = vmatprep.subr.bf16.mxu0 %v7326_v41  ;;  %v7386_v40 = vld [vmem:[#allocation12 + $0xa84] ss:$16 sps:$4 sm:$0xff]   ;;  %v7389_v41 = vld [vmem:[#allocation12 + $0xa8c] ss:$16 sps:$4 sm:$0xff]  }
 0x386   :  { %5788 = vmatprep.subr.bf16.mxu1 %v7329_v49  ;;  %v7384_v49 = vld [vmem:[#allocation12 + $0xa80] ss:$16 sps:$4 sm:$0xff]  }
 0x388   :  { %5461 = vmatpush1.bf16.msra.mxu0 %v7324_v50  ;;  %v7387_v50 = vld [vmem:[#allocation12 + $0xa88] ss:$16 sps:$4 sm:$0xff]  }
 0x389   :  { %5789 = vmatpush1.bf16.msra.mxu1 %v7327_v51  ;;  %5462 = vmatprep.subr.bf16.mxu0 %v7332_v53  ;;  %v7392_v51 = vld [vmem:[#allocation12 + $0xaa4] ss:$16 sps:$4 sm:$0xff]   ;;  %v7395_v53 = vld [vmem:[#allocation12 + $0xaac] ss:$16 sps:$4 sm:$0xff]  }
 0x38a   :  { %5790 = vmatprep.subr.bf16.mxu1 %v7335_v54  ;;  %v7390_v54 = vld [vmem:[#allocation12 + $0xaa0] ss:$16 sps:$4 sm:$0xff]  }
 0x38c   :  { %5463 = vmatpush1.bf16.msra.mxu0 %v7330_v55  ;;  %v7393_v55 = vld [vmem:[#allocation12 + $0xaa8] ss:$16 sps:$4 sm:$0xff]  }
 0x38d   :  { %5791 = vmatpush1.bf16.msra.mxu1 %v7333_v43  ;;  %5464 = vmatprep.subr.bf16.mxu0 %v7338_v56  ;;  %v7398_v43 = vld [vmem:[#allocation12 + $0xac4] ss:$16 sps:$4 sm:$0xff]   ;;  %v7401_v56 = vld [vmem:[#allocation12 + $0xacc] ss:$16 sps:$4 sm:$0xff]  }
 0x38e   :  { %5792 = vmatprep.subr.bf16.mxu1 %v7341_v58  ;;  %v7396_v58 = vld [vmem:[#allocation12 + $0xac0] ss:$16 sps:$4 sm:$0xff]  }
 0x390   :  { %5465 = vmatpush1.bf16.msra.mxu0 %v7336_v59  ;;  %v7399_v59 = vld [vmem:[#allocation12 + $0xac8] ss:$16 sps:$4 sm:$0xff]  }
 0x391   :  { %5793 = vmatpush1.bf16.msra.mxu1 %v7339_v60  ;;  %5466 = vmatprep.subr.bf16.mxu0 %v7344_v8  ;;  %v7404_v60 = vld [vmem:[#allocation12 + $0xae4] ss:$16 sps:$4 sm:$0xff]   ;;  %v7407_v8 = vld [vmem:[#allocation12 + $0xaec] ss:$16 sps:$4 sm:$0xff]  }
 0x392   :  { %5794 = vmatprep.subr.bf16.mxu1 %v7347_v61  ;;  %v7402_v61 = vld [vmem:[#allocation12 + $0xae0] ss:$16 sps:$4 sm:$0xff]  }
 0x394   :  { %5467 = vmatpush1.bf16.msra.mxu0 %v7342_v62  ;;  %v7405_v62 = vld [vmem:[#allocation12 + $0xae8] ss:$16 sps:$4 sm:$0xff]  }
 0x395   :  { %5795 = vmatpush1.bf16.msra.mxu1 %v7345_v0  ;;  %5468 = vmatprep.subr.bf16.mxu0 %v7350_v1  ;;  %v7413_v0 = vld [vmem:[#allocation12 + $0xb0c] ss:$16 sps:$4 sm:$0xff]   ;;  %v7408_v1 = vld [vmem:[#allocation12 + $0xb00] ss:$16 sps:$4 sm:$0xff]  }
 0x396   :  { %5796 = vmatprep.subr.bf16.mxu1 %v7353_v33  ;;  %v7411_v33 = vld [vmem:[#allocation12 + $0xb08] ss:$16 sps:$4 sm:$0xff]  }
 0x398   :  { %5469 = vmatpush1.bf16.msra.mxu0 %v7348_v3  ;;  %v7419_v3 = vld [vmem:[#allocation12 + $0xb2c] ss:$16 sps:$4 sm:$0xff]  }
 0x399   :  { %5797 = vmatpush1.bf16.msra.mxu1 %v7351_v6  ;;  %5470 = vmatprep.subr.bf16.mxu0 %v7356_v10  ;;  %v7417_v6 = vld [vmem:[#allocation12 + $0xb28] ss:$16 sps:$4 sm:$0xff]   ;;  %v7422_v10 = vld [vmem:[#allocation12 + $0xb44] ss:$16 sps:$4 sm:$0xff]  }
 0x39a   :  { %5798 = vmatprep.subr.bf16.mxu1 %v7359_v42  ;;  %v7425_v42 = vld [vmem:[#allocation12 + $0xb4c] ss:$16 sps:$4 sm:$0xff]  }
 0x39c   :  { %5471 = vmatpush1.bf16.msra.mxu0 %v7354_v12  ;;  %v7423_v12 = vld [vmem:[#allocation12 + $0xb48] ss:$16 sps:$4 sm:$0xff]  }
 0x39d   :  { %5799 = vmatpush1.bf16.msra.mxu1 %v7357_v18  ;;  %5481 = vmatprep.subr.bf16.mxu0 %v7362_v46  ;;  %v7431_v18 = vld [vmem:[#allocation12 + $0xb6c] ss:$16 sps:$4 sm:$0xff]   ;;  %v7426_v46 = vld [vmem:[#allocation12 + $0xb60] ss:$16 sps:$4 sm:$0xff]  }
 0x39e   :  { %5809 = vmatprep.subr.bf16.mxu1 %v7365_v20  ;;  %v7429_v20 = vld [vmem:[#allocation12 + $0xb68] ss:$16 sps:$4 sm:$0xff]  }
 0x39f   :  { %5473 = vmatmul.mubr.bf16.vlgmr.msra.gmra.mrb[16].mxu0 %v2174_v23 }
 0x3a0   :  { %5801 = vmatmul.mubr.bf16.vlgmr.msra.gmra.mrb[16].mxu1 %v2174_v23  ;;  %5482 = vmatpush1.bf16.msra.mxu0 %v7360_v4  ;;  %v7437_v4 = vld [vmem:[#allocation12 + $0xb8c] ss:$16 sps:$4 sm:$0xff]   ;;  %v7432_v23 = vld [vmem:[#allocation12 + $0xb80] ss:$16 sps:$4 sm:$0xff]  }
 0x3a1   :  { %5513 = vmatprep.mubr.bf16.mxu0 %v2177_v27  ;;  %5810 = vmatpush1.bf16.msra.mxu1 %v7363_v24  ;;  %v7435_v24 = vld [vmem:[#allocation12 + $0xb88] ss:$16 sps:$4 sm:$0xff]  }
 0x3a2   :  { %5841 = vmatprep.mubr.bf16.mxu1 %v2177_v27  ;;  %5483 = vmatprep.subr.bf16.mxu0 %v7368_v25  ;;  %v7440_v25 = vld [vmem:[#allocation12 + $0xba4] ss:$16 sps:$4 sm:$0xff]   ;;  %v7443_v27 = vld [vmem:[#allocation12 + $0xbac] ss:$16 sps:$4 sm:$0xff]  }
 0x3a3   :  { %5811 = vmatprep.subr.bf16.mxu1 %v7371_v9  ;;  %v7438_v9 = vld [vmem:[#allocation12 + $0xba0] ss:$16 sps:$4 sm:$0xff]  }
 0x3a4   :  { %5484 = vmatpush1.bf16.msra.mxu0 %v7366_v28  ;;  %v505_v28 = vrot.slane %v8131_v26, %v8094_v34 }
 0x3a5   :  { %5812 = vmatpush1.bf16.msra.mxu1 %v7369_v29  ;;  %5485 = vmatprep.subr.bf16.mxu0 %v7374_v30  ;;  %v7441_v29 = vld [vmem:[#allocation12 + $0xba8] ss:$16 sps:$4 sm:$0xff]   ;;  %v7446_v30 = vld [vmem:[#allocation12 + $0xbc4] ss:$16 sps:$4 sm:$0xff]  }
 0x3a6   :  { %5813 = vmatprep.subr.bf16.mxu1 %v7377_v31  ;;  %v7449_v31 = vld [vmem:[#allocation12 + $0xbcc] ss:$16 sps:$4 sm:$0xff]  }
 0x3a8   :  { %5486 = vmatpush1.bf16.msra.mxu0 %v7372_v32  ;;  %v517_v32 = vrot.slane %v8131_v26, %v484_v19  ;;  %v7461_v19 = vld [vmem:[#allocation12 + $0xc0c] ss:$16 sps:$4 sm:$0xff]  }
 0x3a9   :  { %5814 = vmatpush1.bf16.msra.mxu1 %v7375_v35  ;;  %5487 = vmatprep.subr.bf16.mxu0 %v7380_v36  ;;  %v7444_v35 = vld [vmem:[#allocation12 + $0xbc0] ss:$16 sps:$4 sm:$0xff]   ;;  %v2062_v36 = vadd.f32 %v8106_v7, %v505_v28  ;;  %v7507_v28 = vld [vmem:[#allocation12 + $0xd08] ss:$16 sps:$4 sm:$0xff]  }
 0x3aa   :  { %5815 = vmatprep.subr.bf16.mxu1 %v7383_v37  ;;  %v7447_v37 = vld [vmem:[#allocation12 + $0xbc8] ss:$16 sps:$4 sm:$0xff]   ;;  %v7456_v7 = vld [vmem:[#allocation12 + $0xc00] ss:$16 sps:$4 sm:$0xff]  }
 0x3ac   :  { %5488 = vmatpush1.bf16.msra.mxu0 %v7378_v38  ;;  %v7452_v38 = vld [vmem:[#allocation12 + $0xbe4] ss:$16 sps:$4 sm:$0xff]  }
 0x3ad   :  { %5816 = vmatpush1.bf16.msra.mxu1 %v7381_v39  ;;  %5489 = vmatprep.subr.bf16.mxu0 %v7386_v40  ;;  %v7455_v39 = vld [vmem:[#allocation12 + $0xbec] ss:$16 sps:$4 sm:$0xff]   ;;  %v2105_v40 = vadd.f32 %v8126_v47, %v517_v32  ;;  %v7513_v32 = vld [vmem:[#allocation12 + $0xd28] ss:$16 sps:$4 sm:$0xff]  }
 0x3ae   :  { %5817 = vmatprep.subr.bf16.mxu1 %v7389_v41  ;;  %v7450_v41 = vld [vmem:[#allocation12 + $0xbe0] ss:$16 sps:$4 sm:$0xff]   ;;  %v7467_v47 = vld [vmem:[#allocation12 + $0xc2c] ss:$16 sps:$4 sm:$0xff]  }
 0x3b0   :  { %5490 = vmatpush1.bf16.msra.mxu0 %v7384_v49  ;;  %v2160_v49 = vmax.f32 %v2062_v36, 0.0  ;;  %v7521_v36 = vld [vmem:[#allocation12 + $0xd4c] ss:$16 sps:$4 sm:$0xff]  }
 0x3b1   :  { %5818 = vmatpush1.bf16.msra.mxu1 %v7387_v50  ;;  %5491 = vmatprep.subr.bf16.mxu0 %v7392_v51  ;;  %v7453_v50 = vld [vmem:[#allocation12 + $0xbe8] ss:$16 sps:$4 sm:$0xff]   ;;  %v7458_v51 = vld [vmem:[#allocation12 + $0xc04] ss:$16 sps:$4 sm:$0xff]  }
 0x3b2   :  { %5819 = vmatprep.subr.bf16.mxu1 %v7395_v53  ;;  %v2163_v53 = vmax.f32 %v2105_v40, 0.0  ;;  %v7527_v40 = vld [vmem:[#allocation12 + $0xd6c] ss:$16 sps:$4 sm:$0xff]  }
 0x3b4   :  { %5492 = vmatpush1.bf16.msra.mxu0 %v7390_v54  ;;  %v2176_v54 = vpack.c.bf16 %v2160_v49, %v2160_v49  ;;  %v7525_v49 = vld [vmem:[#allocation12 + $0xd68] ss:$16 sps:$4 sm:$0xff]  }
 0x3b5   :  { %5820 = vmatpush1.bf16.msra.mxu1 %v7393_v55  ;;  %5493 = vmatprep.subr.bf16.mxu0 %v7398_v43  ;;  %v7459_v55 = vld [vmem:[#allocation12 + $0xc08] ss:$16 sps:$4 sm:$0xff]   ;;  %v7464_v43 = vld [vmem:[#allocation12 + $0xc24] ss:$16 sps:$4 sm:$0xff]  }
 0x3b6   :  { %5821 = vmatprep.subr.bf16.mxu1 %v7401_v56  ;;  %v2179_v56 = vpack.c.bf16 %v2163_v53, %v2163_v53  ;;  %v7531_v53 = vld [vmem:[#allocation12 + $0xd88] ss:$16 sps:$4 sm:$0xff]  }
 0x3b8   :  { %5494 = vmatpush1.bf16.msra.mxu0 %v7396_v58  ;;  %v7462_v58 = vld [vmem:[#allocation12 + $0xc20] ss:$16 sps:$4 sm:$0xff]  }
 0x3b9   :  { %5822 = vmatpush1.bf16.msra.mxu1 %v7399_v59  ;;  %5495 = vmatprep.subr.bf16.mxu0 %v7404_v60  ;;  %v7465_v59 = vld [vmem:[#allocation12 + $0xc28] ss:$16 sps:$4 sm:$0xff]   ;;  %v7470_v60 = vld [vmem:[#allocation12 + $0xc44] ss:$16 sps:$4 sm:$0xff]  }
 0x3ba   :  { %5823 = vmatprep.subr.bf16.mxu1 %v7407_v8  ;;  %v7473_v8 = vld [vmem:[#allocation12 + $0xc4c] ss:$16 sps:$4 sm:$0xff]  }
 0x3bc   :  { %5496 = vmatpush1.bf16.msra.mxu0 %v7402_v61  ;;  %v7468_v61 = vld [vmem:[#allocation12 + $0xc40] ss:$16 sps:$4 sm:$0xff]  }
 0x3bd   :  { %5824 = vmatpush1.bf16.msra.mxu1 %v7405_v62  ;;  %5497 = vmatprep.subr.bf16.mxu0 %v7410_v63  ;;  %v7471_v62 = vld [vmem:[#allocation12 + $0xc48] ss:$16 sps:$4 sm:$0xff]   ;;  %v7476_v63 = vld [vmem:[#allocation12 + $0xc64] ss:$16 sps:$4 sm:$0xff]  }
 0x3be   :  { %5825 = vmatprep.subr.bf16.mxu1 %v7413_v0  ;;  %v7479_v0 = vld [vmem:[#allocation12 + $0xc6c] ss:$16 sps:$4 sm:$0xff]  }
 0x3c0   :  { %5498 = vmatpush1.bf16.msra.mxu0 %v7408_v1  ;;  %v7474_v1 = vld [vmem:[#allocation12 + $0xc60] ss:$16 sps:$4 sm:$0xff]  }
 0x3c1   :  { %5826 = vmatpush1.bf16.msra.mxu1 %v7411_v33  ;;  %5499 = vmatprep.subr.bf16.mxu0 %v7416_v2  ;;  %v7477_v33 = vld [vmem:[#allocation12 + $0xc68] ss:$16 sps:$4 sm:$0xff]   ;;  %v7482_v2 = vld [vmem:[#allocation12 + $0xc84] ss:$16 sps:$4 sm:$0xff]  }
 0x3c2   :  { %5827 = vmatprep.subr.bf16.mxu1 %v7419_v3  ;;  %v7485_v3 = vld [vmem:[#allocation12 + $0xc8c] ss:$16 sps:$4 sm:$0xff]  }
 0x3c4   :  { %5500 = vmatpush1.bf16.msra.mxu0 %v7414_v5  ;;  %v7480_v5 = vld [vmem:[#allocation12 + $0xc80] ss:$16 sps:$4 sm:$0xff]  }
 0x3c5   :  { %5828 = vmatpush1.bf16.msra.mxu1 %v7417_v6  ;;  %5501 = vmatprep.subr.bf16.mxu0 %v7422_v10  ;;  %v7483_v6 = vld [vmem:[#allocation12 + $0xc88] ss:$16 sps:$4 sm:$0xff]   ;;  %v7488_v10 = vld [vmem:[#allocation12 + $0xca4] ss:$16 sps:$4 sm:$0xff]  }
 0x3c6   :  { %5829 = vmatprep.subr.bf16.mxu1 %v7425_v42  ;;  %v7491_v42 = vld [vmem:[#allocation12 + $0xcac] ss:$16 sps:$4 sm:$0xff]  }
 0x3c8   :  { %5502 = vmatpush1.bf16.msra.mxu0 %v7420_v11  ;;  %v7486_v11 = vld [vmem:[#allocation12 + $0xca0] ss:$16 sps:$4 sm:$0xff]  }
 0x3c9   :  { %5830 = vmatpush1.bf16.msra.mxu1 %v7423_v12  ;;  %5503 = vmatprep.subr.bf16.mxu0 %v7428_v17  ;;  %v7489_v12 = vld [vmem:[#allocation12 + $0xca8] ss:$16 sps:$4 sm:$0xff]   ;;  %v7494_v17 = vld [vmem:[#allocation12 + $0xcc4] ss:$16 sps:$4 sm:$0xff]  }
 0x3ca   :  { %5831 = vmatprep.subr.bf16.mxu1 %v7431_v18  ;;  %v7497_v18 = vld [vmem:[#allocation12 + $0xccc] ss:$16 sps:$4 sm:$0xff]  }
 0x3cc   :  { %5504 = vmatpush1.bf16.msra.mxu0 %v7426_v46  ;;  %v7492_v46 = vld [vmem:[#allocation12 + $0xcc0] ss:$16 sps:$4 sm:$0xff]  }
 0x3cd   :  { %5832 = vmatpush1.bf16.msra.mxu1 %v7429_v20  ;;  %5505 = vmatprep.subr.bf16.mxu0 %v7434_v21  ;;  %v7495_v20 = vld [vmem:[#allocation12 + $0xcc8] ss:$16 sps:$4 sm:$0xff]   ;;  %v7500_v21 = vld [vmem:[#allocation12 + $0xce4] ss:$16 sps:$4 sm:$0xff]  }
 0x3ce   :  { %5833 = vmatprep.subr.bf16.mxu1 %v7437_v4  ;;  %v7503_v4 = vld [vmem:[#allocation12 + $0xcec] ss:$16 sps:$4 sm:$0xff]  }
 0x3d0   :  { %5506 = vmatpush1.bf16.msra.mxu0 %v7432_v23  ;;  %v7498_v23 = vld [vmem:[#allocation12 + $0xce0] ss:$16 sps:$4 sm:$0xff]  }
 0x3d1   :  { %5834 = vmatpush1.bf16.msra.mxu1 %v7435_v24  ;;  %5507 = vmatprep.subr.bf16.mxu0 %v7440_v25  ;;  %v7501_v24 = vld [vmem:[#allocation12 + $0xce8] ss:$16 sps:$4 sm:$0xff]   ;;  %v7506_v25 = vld [vmem:[#allocation12 + $0xd04] ss:$16 sps:$4 sm:$0xff]  }
 0x3d2   :  { %5835 = vmatprep.subr.bf16.mxu1 %v7443_v27  ;;  %v7509_v27 = vld [vmem:[#allocation12 + $0xd0c] ss:$16 sps:$4 sm:$0xff]  }
 0x3d4   :  { %5508 = vmatpush1.bf16.msra.mxu0 %v7438_v9  ;;  %v7504_v9 = vld [vmem:[#allocation12 + $0xd00] ss:$16 sps:$4 sm:$0xff]  }
 0x3d5   :  { %5836 = vmatpush1.bf16.msra.mxu1 %v7441_v29  ;;  %5509 = vmatprep.subr.bf16.mxu0 %v7446_v30  ;;  %v7512_v29 = vld [vmem:[#allocation12 + $0xd24] ss:$16 sps:$4 sm:$0xff]   ;;  %v7515_v30 = vld [vmem:[#allocation12 + $0xd2c] ss:$16 sps:$4 sm:$0xff]  }
 0x3d6   :  { %5837 = vmatprep.subr.bf16.mxu1 %v7449_v31  ;;  %v7510_v31 = vld [vmem:[#allocation12 + $0xd20] ss:$16 sps:$4 sm:$0xff]  }
 0x3d8   :  { %5510 = vmatpush1.bf16.msra.mxu0 %v7444_v35  ;;  %v7518_v35 = vld [vmem:[#allocation12 + $0xd44] ss:$16 sps:$4 sm:$0xff]  }
 0x3d9   :  { %5838 = vmatpush1.bf16.msra.mxu1 %v7447_v37  ;;  %5511 = vmatprep.subr.bf16.mxu0 %v7452_v38  ;;  %v7516_v37 = vld [vmem:[#allocation12 + $0xd40] ss:$16 sps:$4 sm:$0xff]   ;;  %v7519_v38 = vld [vmem:[#allocation12 + $0xd48] ss:$16 sps:$4 sm:$0xff]  }
 0x3da   :  { %5839 = vmatprep.subr.bf16.mxu1 %v7455_v39  ;;  %v7524_v39 = vld [vmem:[#allocation12 + $0xd64] ss:$16 sps:$4 sm:$0xff]  }
 0x3dc   :  { %5512 = vmatpush1.bf16.msra.mxu0 %v7450_v41  ;;  %v7522_v41 = vld [vmem:[#allocation12 + $0xd60] ss:$16 sps:$4 sm:$0xff]  }
 0x3dd   :  { %5840 = vmatpush1.bf16.msra.mxu1 %v7453_v50  ;;  %5522 = vmatprep.subr.bf16.mxu0 %v7458_v51  ;;  %v7530_v50 = vld [vmem:[#allocation12 + $0xd84] ss:$16 sps:$4 sm:$0xff]   ;;  %v7533_v51 = vld [vmem:[#allocation12 + $0xd8c] ss:$16 sps:$4 sm:$0xff]  }
 0x3de   :  { %5850 = vmatprep.subr.bf16.mxu1 %v7461_v19  ;;  %v7528_v19 = vld [vmem:[#allocation12 + $0xd80] ss:$16 sps:$4 sm:$0xff]  }
 0x3df   :  { %5514 = vmatmul.mubr.bf16.vlgmr.msra.gmra.mrb[16].mxu0 %v2176_v54 }
 0x3e0   :  { %5842 = vmatmul.mubr.bf16.vlgmr.msra.gmra.mrb[16].mxu1 %v2176_v54  ;;  %5523 = vmatpush1.bf16.msra.mxu0 %v7456_v7  ;;  %v7536_v7 = vld [vmem:[#allocation12 + $0xda4] ss:$16 sps:$4 sm:$0xff]   ;;  %v7539_v54 = vld [vmem:[#allocation12 + $0xdac] ss:$16 sps:$4 sm:$0xff]  }
 0x3e1   :  { %5554 = vmatprep.mubr.bf16.mxu0 %v2179_v56  ;;  %5851 = vmatpush1.bf16.msra.mxu1 %v7459_v55  ;;  %v7534_v55 = vld [vmem:[#allocation12 + $0xda0] ss:$16 sps:$4 sm:$0xff]  }
 0x3e2   :  { %5882 = vmatprep.mubr.bf16.mxu1 %v2179_v56  ;;  %5524 = vmatprep.subr.bf16.mxu0 %v7464_v43  ;;  %v513_v43 = vrot.slane %v8131_v26, %v480_v45  ;;  %v7537_v56 = vld [vmem:[#allocation12 + $0xda8] ss:$16 sps:$4 sm:$0xff]   ;;  %v7551_v45 = vld [vmem:[#allocation12 + $0xdec] ss:$16 sps:$4 sm:$0xff]  }
 0x3e3   :  { %5852 = vmatprep.subr.bf16.mxu1 %v7467_v47  ;;  %v7542_v47 = vld [vmem:[#allocation12 + $0xdc4] ss:$16 sps:$4 sm:$0xff]  }
 0x3e4   :  { %5525 = vmatpush1.bf16.msra.mxu0 %v7462_v58  ;;  %v7545_v58 = vld [vmem:[#allocation12 + $0xdcc] ss:$16 sps:$4 sm:$0xff]  }
 0x3e5   :  { %5853 = vmatpush1.bf16.msra.mxu1 %v7465_v59  ;;  %5526 = vmatprep.subr.bf16.mxu0 %v7470_v60  ;;  %v525_v59 = vrot.slane %v8131_v26, %v492_v52  ;;  %v7540_v60 = vld [vmem:[#allocation12 + $0xdc0] ss:$16 sps:$4 sm:$0xff]   ;;  %v7557_v52 = vld [vmem:[#allocation12 + $0xe0c] ss:$16 sps:$4 sm:$0xff]  }
 0x3e6   :  { %5854 = vmatprep.subr.bf16.mxu1 %v7473_v8  ;;  %v2103_v8 = vadd.f32 %v8122_v16, %v513_v43  ;;  %v7552_v16 = vld [vmem:[#allocation12 + $0xe00] ss:$16 sps:$4 sm:$0xff]   ;;  %v7614_v43 = vld [vmem:[#allocation12 + $0xf44] ss:$16 sps:$4 sm:$0xff]  }
 0x3e8   :  { %5527 = vmatpush1.bf16.msra.mxu0 %v7468_v61  ;;  %v7543_v61 = vld [vmem:[#allocation12 + $0xdc8] ss:$16 sps:$4 sm:$0xff]  }
 0x3e9   :  { %5855 = vmatpush1.bf16.msra.mxu1 %v7471_v62  ;;  %5528 = vmatprep.subr.bf16.mxu0 %v7476_v63  ;;  %v7548_v62 = vld [vmem:[#allocation12 + $0xde4] ss:$16 sps:$4 sm:$0xff]   ;;  %v2146_v63 = vadd.f32 %v8128_v48, %v525_v59  ;;  %v7563_v48 = vld [vmem:[#allocation12 + $0xe2c] ss:$16 sps:$4 sm:$0xff]  }
 0x3ea   :  { %5856 = vmatprep.subr.bf16.mxu1 %v7479_v0  ;;  %v7546_v0 = vld [vmem:[#allocation12 + $0xde0] ss:$16 sps:$4 sm:$0xff]   ;;  %v7620_v59 = vld [vmem:[#allocation12 + $0xf64] ss:$16 sps:$4 sm:$0xff]  }
 0x3eb   :  { %v2165_v26 = vmax.f32 %v2146_v63, 0.0  ;;  %v7624_v63 = vld [vmem:[#allocation12 + $0xf80] ss:$16 sps:$4 sm:$0xff]  }
 0x3ec   :  { %5529 = vmatpush1.bf16.msra.mxu0 %v7474_v1  ;;  %v2162_v1 = vmax.f32 %v2103_v8, 0.0  ;;  %v7618_v8 = vld [vmem:[#allocation12 + $0xf60] ss:$16 sps:$4 sm:$0xff]  }
 0x3ed   :  { %5857 = vmatpush1.bf16.msra.mxu1 %v7477_v33  ;;  %5530 = vmatprep.subr.bf16.mxu0 %v7482_v2  ;;  %v7549_v33 = vld [vmem:[#allocation12 + $0xde8] ss:$16 sps:$4 sm:$0xff]   ;;  %v7554_v2 = vld [vmem:[#allocation12 + $0xe04] ss:$16 sps:$4 sm:$0xff]  }
 0x3ee   :  { %5858 = vmatprep.subr.bf16.mxu1 %v7485_v3  ;;  %v2178_v3 = vpack.c.bf16 %v2162_v1, %v2162_v1  ;;  %v7632_v1 = vld [vmem:[#allocation12 + $0xfa4] ss:$16 sps:$4 sm:$0xff]  }
 0x3f0   :  { %5531 = vmatpush1.bf16.msra.mxu0 %v7480_v5  ;;  %v7555_v5 = vld [vmem:[#allocation12 + $0xe08] ss:$16 sps:$4 sm:$0xff]  }
 0x3f1   :  { %5859 = vmatpush1.bf16.msra.mxu1 %v7483_v6  ;;  %5532 = vmatprep.subr.bf16.mxu0 %v7488_v10  ;;  %v7560_v6 = vld [vmem:[#allocation12 + $0xe24] ss:$16 sps:$4 sm:$0xff]   ;;  %v2181_v10 = vpack.c.bf16 %v2165_v26, %v2165_v26 }
 0x3f2   :  { %5860 = vmatprep.subr.bf16.mxu1 %v7491_v42  ;;  %v7558_v42 = vld [vmem:[#allocation12 + $0xe20] ss:$16 sps:$4 sm:$0xff]  }
 0x3f4   :  { %5533 = vmatpush1.bf16.msra.mxu0 %v7486_v11  ;;  %v7561_v11 = vld [vmem:[#allocation12 + $0xe28] ss:$16 sps:$4 sm:$0xff]  }
 0x3f5   :  { %5861 = vmatpush1.bf16.msra.mxu1 %v7489_v12  ;;  %5534 = vmatprep.subr.bf16.mxu0 %v7494_v17  ;;  %v7566_v12 = vld [vmem:[#allocation12 + $0xe44] ss:$16 sps:$4 sm:$0xff]   ;;  %v7569_v17 = vld [vmem:[#allocation12 + $0xe4c] ss:$16 sps:$4 sm:$0xff]  }
 0x3f6   :  { %5862 = vmatprep.subr.bf16.mxu1 %v7497_v18  ;;  %v7564_v18 = vld [vmem:[#allocation12 + $0xe40] ss:$16 sps:$4 sm:$0xff]  }
 0x3f8   :  { %5535 = vmatpush1.bf16.msra.mxu0 %v7492_v46  ;;  %v7567_v46 = vld [vmem:[#allocation12 + $0xe48] ss:$16 sps:$4 sm:$0xff]  }
 0x3f9   :  { %5863 = vmatpush1.bf16.msra.mxu1 %v7495_v20  ;;  %5536 = vmatprep.subr.bf16.mxu0 %v7500_v21  ;;  %v7572_v20 = vld [vmem:[#allocation12 + $0xe64] ss:$16 sps:$4 sm:$0xff]   ;;  %v7575_v21 = vld [vmem:[#allocation12 + $0xe6c] ss:$16 sps:$4 sm:$0xff]  }
 0x3fa   :  { %5864 = vmatprep.subr.bf16.mxu1 %v7503_v4  ;;  %v7570_v4 = vld [vmem:[#allocation12 + $0xe60] ss:$16 sps:$4 sm:$0xff]  }
 0x3fc   :  { %5537 = vmatpush1.bf16.msra.mxu0 %v7498_v23  ;;  %v7573_v23 = vld [vmem:[#allocation12 + $0xe68] ss:$16 sps:$4 sm:$0xff]  }
 0x3fd   :  { %5865 = vmatpush1.bf16.msra.mxu1 %v7501_v24  ;;  %5538 = vmatprep.subr.bf16.mxu0 %v7506_v25  ;;  %v7578_v24 = vld [vmem:[#allocation12 + $0xe84] ss:$16 sps:$4 sm:$0xff]   ;;  %v7581_v25 = vld [vmem:[#allocation12 + $0xe8c] ss:$16 sps:$4 sm:$0xff]  }
 0x3fe   :  { %5866 = vmatprep.subr.bf16.mxu1 %v7509_v27  ;;  %v7576_v27 = vld [vmem:[#allocation12 + $0xe80] ss:$16 sps:$4 sm:$0xff]  }
 0x400   :  { %5539 = vmatpush1.bf16.msra.mxu0 %v7504_v9  ;;  %v7579_v9 = vld [vmem:[#allocation12 + $0xe88] ss:$16 sps:$4 sm:$0xff]  }
 0x401   :  { %5867 = vmatpush1.bf16.msra.mxu1 %v7507_v28  ;;  %5540 = vmatprep.subr.bf16.mxu0 %v7512_v29  ;;  %v7584_v28 = vld [vmem:[#allocation12 + $0xea4] ss:$16 sps:$4 sm:$0xff]   ;;  %v7587_v29 = vld [vmem:[#allocation12 + $0xeac] ss:$16 sps:$4 sm:$0xff]  }
 0x402   :  { %5868 = vmatprep.subr.bf16.mxu1 %v7515_v30  ;;  %v7582_v30 = vld [vmem:[#allocation12 + $0xea0] ss:$16 sps:$4 sm:$0xff]  }
 0x404   :  { %5541 = vmatpush1.bf16.msra.mxu0 %v7510_v31  ;;  %v7585_v31 = vld [vmem:[#allocation12 + $0xea8] ss:$16 sps:$4 sm:$0xff]  }
 0x405   :  { %5869 = vmatpush1.bf16.msra.mxu1 %v7513_v32  ;;  %5542 = vmatprep.subr.bf16.mxu0 %v7518_v35  ;;  %v7590_v32 = vld [vmem:[#allocation12 + $0xec4] ss:$16 sps:$4 sm:$0xff]   ;;  %v7593_v35 = vld [vmem:[#allocation12 + $0xecc] ss:$16 sps:$4 sm:$0xff]  }
 0x406   :  { %5870 = vmatprep.subr.bf16.mxu1 %v7521_v36  ;;  %v7588_v36 = vld [vmem:[#allocation12 + $0xec0] ss:$16 sps:$4 sm:$0xff]  }
 0x408   :  { %5543 = vmatpush1.bf16.msra.mxu0 %v7516_v37  ;;  %v7591_v37 = vld [vmem:[#allocation12 + $0xec8] ss:$16 sps:$4 sm:$0xff]  }
 0x409   :  { %5871 = vmatpush1.bf16.msra.mxu1 %v7519_v38  ;;  %5544 = vmatprep.subr.bf16.mxu0 %v7524_v39  ;;  %v7596_v38 = vld [vmem:[#allocation12 + $0xee4] ss:$16 sps:$4 sm:$0xff]   ;;  %v7599_v39 = vld [vmem:[#allocation12 + $0xeec] ss:$16 sps:$4 sm:$0xff]  }
 0x40a   :  { %5872 = vmatprep.subr.bf16.mxu1 %v7527_v40  ;;  %v7594_v40 = vld [vmem:[#allocation12 + $0xee0] ss:$16 sps:$4 sm:$0xff]  }
 0x40c   :  { %5545 = vmatpush1.bf16.msra.mxu0 %v7522_v41  ;;  %v7597_v41 = vld [vmem:[#allocation12 + $0xee8] ss:$16 sps:$4 sm:$0xff]  }
 0x40d   :  { %5873 = vmatpush1.bf16.msra.mxu1 %v7525_v49  ;;  %5546 = vmatprep.subr.bf16.mxu0 %v7530_v50  ;;  %v7602_v49 = vld [vmem:[#allocation12 + $0xf04] ss:$16 sps:$4 sm:$0xff]   ;;  %v7605_v50 = vld [vmem:[#allocation12 + $0xf0c] ss:$16 sps:$4 sm:$0xff]  }
 0x40e   :  { %5874 = vmatprep.subr.bf16.mxu1 %v7533_v51  ;;  %v7600_v51 = vld [vmem:[#allocation12 + $0xf00] ss:$16 sps:$4 sm:$0xff]  }
 0x410   :  { %5547 = vmatpush1.bf16.msra.mxu0 %v7528_v19  ;;  %v7603_v19 = vld [vmem:[#allocation12 + $0xf08] ss:$16 sps:$4 sm:$0xff]  }
 0x411   :  { %5875 = vmatpush1.bf16.msra.mxu1 %v7531_v53  ;;  %5548 = vmatprep.subr.bf16.mxu0 %v7536_v7  ;;  %v7608_v53 = vld [vmem:[#allocation12 + $0xf24] ss:$16 sps:$4 sm:$0xff]   ;;  %v7611_v7 = vld [vmem:[#allocation12 + $0xf2c] ss:$16 sps:$4 sm:$0xff]  }
 0x412   :  { %5876 = vmatprep.subr.bf16.mxu1 %v7539_v54  ;;  %v7606_v54 = vld [vmem:[#allocation12 + $0xf20] ss:$16 sps:$4 sm:$0xff]  }
 0x414   :  { %5549 = vmatpush1.bf16.msra.mxu0 %v7534_v55  ;;  %v7609_v55 = vld [vmem:[#allocation12 + $0xf28] ss:$16 sps:$4 sm:$0xff]  }
 0x415   :  { %5877 = vmatpush1.bf16.msra.mxu1 %v7537_v56  ;;  %5550 = vmatprep.subr.bf16.mxu0 %v7542_v47  ;;  %v7617_v56 = vld [vmem:[#allocation12 + $0xf4c] ss:$16 sps:$4 sm:$0xff]   ;;  %v7612_v47 = vld [vmem:[#allocation12 + $0xf40] ss:$16 sps:$4 sm:$0xff]  }
 0x416   :  { %5878 = vmatprep.subr.bf16.mxu1 %v7545_v58  ;;  %v7615_v58 = vld [vmem:[#allocation12 + $0xf48] ss:$16 sps:$4 sm:$0xff]  }
 0x418   :  { %5551 = vmatpush1.bf16.msra.mxu0 %v7540_v60  ;;  %v7623_v60 = vld [vmem:[#allocation12 + $0xf6c] ss:$16 sps:$4 sm:$0xff]  }
 0x419   :  { %5879 = vmatpush1.bf16.msra.mxu1 %v7543_v61  ;;  %5552 = vmatprep.subr.bf16.mxu0 %v7548_v62  ;;  %v7621_v61 = vld [vmem:[#allocation12 + $0xf68] ss:$16 sps:$4 sm:$0xff]   ;;  %v7626_v62 = vld [vmem:[#allocation12 + $0xf84] ss:$16 sps:$4 sm:$0xff]  }
 0x41a   :  { %5880 = vmatprep.subr.bf16.mxu1 %v7551_v45  ;;  %v7629_v45 = vld [vmem:[#allocation12 + $0xf8c] ss:$16 sps:$4 sm:$0xff]  }
 0x41c   :  { %5553 = vmatpush1.bf16.msra.mxu0 %v7546_v0  ;;  %v7627_v0 = vld [vmem:[#allocation12 + $0xf88] ss:$16 sps:$4 sm:$0xff]  }
 0x41d   :  { %5881 = vmatpush1.bf16.msra.mxu1 %v7549_v33  ;;  %5563 = vmatprep.subr.bf16.mxu0 %v7554_v2  ;;  %v7635_v33 = vld [vmem:[#allocation12 + $0xfac] ss:$16 sps:$4 sm:$0xff]   ;;  %v7630_v2 = vld [vmem:[#allocation12 + $0xfa0] ss:$16 sps:$4 sm:$0xff]  }
 0x41e   :  { %5891 = vmatprep.subr.bf16.mxu1 %v7557_v52  ;;  %v7653_v52 = vld [vmem:[#allocation11 + $0x8] sm:$0xff] }
 0x41f   :  { %5555 = vmatmul.mubr.bf16.vlgmr.msra.gmra.mrb[16].mxu0 %v2178_v3  ;;  %v521_v26 = vrot.slane %v7653_v52, %v488_v22  ;;  %v7645_v22 = vld [vmem:[#allocation12 + $0xfe8] ss:$16 sps:$4 sm:$0xff]  }
 0x420   :  { %5883 = vmatmul.mubr.bf16.vlgmr.msra.gmra.mrb[16].mxu1 %v2178_v3  ;;  %5564 = vmatpush1.bf16.msra.mxu0 %v7552_v16  ;;  %v7633_v16 = vld [vmem:[#allocation12 + $0xfa8] ss:$16 sps:$4 sm:$0xff]   ;;  %v7638_v3 = vld [vmem:[#allocation12 + $0xfc4] ss:$16 sps:$4 sm:$0xff]  }
 0x421   :  { %5595 = vmatprep.mubr.bf16.mxu0 %v2181_v10  ;;  %5892 = vmatpush1.bf16.msra.mxu1 %v7555_v5  ;;  %v7641_v5 = vld [vmem:[#allocation12 + $0xfcc] ss:$16 sps:$4 sm:$0xff]  }
 0x422   :  { %5923 = vmatprep.mubr.bf16.mxu1 %v2181_v10  ;;  %5565 = vmatprep.subr.bf16.mxu0 %v7560_v6  ;;  %v7636_v6 = vld [vmem:[#allocation12 + $0xfc0] ss:$16 sps:$4 sm:$0xff]   ;;  %v2144_v10 = vadd.f32 %v8124_v44, %v521_v26 }
 0x423   :  { %5893 = vmatprep.subr.bf16.mxu1 %v7563_v48  ;;  %v7639_v48 = vld [vmem:[#allocation12 + $0xfc8] ss:$16 sps:$4 sm:$0xff]  }
 0x424   :  { %5566 = vmatpush1.bf16.msra.mxu0 %v7558_v42  ;;  %v7644_v42 = vld [vmem:[#allocation12 + $0xfe4] ss:$16 sps:$4 sm:$0xff]   ;;  %v2164_v13 = vmax.f32 %v2144_v10, 0.0 }
 0x425   :  { %5894 = vmatpush1.bf16.msra.mxu1 %v7561_v11  ;;  %5567 = vmatprep.subr.bf16.mxu0 %v7566_v12  ;;  %v7647_v11 = vld [vmem:[#allocation12 + $0xfec] ss:$16 sps:$4 sm:$0xff]   ;;  %v7642_v12 = vld [vmem:[#allocation12 + $0xfe0] ss:$16 sps:$4 sm:$0xff]  }
 0x426   :  { %5895 = vmatprep.subr.bf16.mxu1 %v7569_v17  ;;  %v2180_v17 = vpack.c.bf16 %v2164_v13, %v2164_v13 }
 0x428   :  { %5568 = vmatpush1.bf16.msra.mxu0 %v7564_v18  ;;  %v2694_v18 = vld [vmem:[#allocation14] sm:$0xf] }
 0x429   :  { %5896 = vmatpush1.bf16.msra.mxu1 %v7567_v46  ;;  %5569 = vmatprep.subr.bf16.mxu0 %v7572_v20  ;;  %v2699_v44 = vrot.slane %v2694_v18, %v8037_v14  ;;  %v5936_v46 = vld [vmem:[#allocation15] sm:$0xf]  ;;  %v2707_v20 = vrot.slane %v2694_v18, %v8094_v34 }
 0x42a   :  { %5897 = vmatprep.subr.bf16.mxu1 %v7575_v21  ;;  %v2703_v21 = vrot.slane %v2694_v18, %v8040_v15 }
 0x42c   :  { %5570 = vmatpush1.bf16.msra.mxu0 %v7570_v4  ;;  %v2711_v4 = vrot.slane %v2694_v18, %v8077_v57 }
 0x42d   :  { %5898 = vmatpush1.bf16.msra.mxu1 %v7573_v23  ;;  %5571 = vmatprep.subr.bf16.mxu0 %v7578_v24 }
 0x42e   :  { %5899 = vmatprep.subr.bf16.mxu1 %v7581_v25  ;;  %v5941_v25 = vrot.slane %v5936_v46, %v8037_v14 }
 0x430   :  { %5572 = vmatpush1.bf16.msra.mxu0 %v7576_v27 }
 0x431   :  { %5900 = vmatpush1.bf16.msra.mxu1 %v7579_v9  ;;  %5573 = vmatprep.subr.bf16.mxu0 %v7584_v28 }
 0x432   :  { %5901 = vmatprep.subr.bf16.mxu1 %v7587_v29 }
 0x434   :  { %5574 = vmatpush1.bf16.msra.mxu0 %v7582_v30  ;;  %v5945_v30 = vrot.slane %v5936_v46, %v8040_v15 }
 0x435   :  { %5902 = vmatpush1.bf16.msra.mxu1 %v7585_v31  ;;  %5575 = vmatprep.subr.bf16.mxu0 %v7590_v32 }
 0x436   :  { %5903 = vmatprep.subr.bf16.mxu1 %v7593_v35 }
 0x438   :  { %5576 = vmatpush1.bf16.msra.mxu0 %v7588_v36 }
 0x439   :  { %5904 = vmatpush1.bf16.msra.mxu1 %v7591_v37  ;;  %5577 = vmatprep.subr.bf16.mxu0 %v7596_v38 }
 0x43a   :  { %5905 = vmatprep.subr.bf16.mxu1 %v7599_v39 }
 0x43c   :  { %5578 = vmatpush1.bf16.msra.mxu0 %v7594_v40  ;;  %v5949_v40 = vrot.slane %v5936_v46, %v8094_v34 }
 0x43d   :  { %5906 = vmatpush1.bf16.msra.mxu1 %v7597_v41  ;;  %5579 = vmatprep.subr.bf16.mxu0 %v7602_v49 }
 0x43e   :  { %5907 = vmatprep.subr.bf16.mxu1 %v7605_v50 }
 0x440   :  { %5580 = vmatpush1.bf16.msra.mxu0 %v7600_v51 }
 0x441   :  { %5908 = vmatpush1.bf16.msra.mxu1 %v7603_v19  ;;  %5581 = vmatprep.subr.bf16.mxu0 %v7608_v53  ;;  %v5953_v19 = vrot.slane %v5936_v46, %v8077_v57 }
 0x442   :  { %5909 = vmatprep.subr.bf16.mxu1 %v7611_v7 }
 0x444   :  { %5582 = vmatpush1.bf16.msra.mxu0 %v7606_v54 }
 0x445   :  { %5910 = vmatpush1.bf16.msra.mxu1 %v7609_v55  ;;  %5583 = vmatprep.subr.bf16.mxu0 %v7614_v43  ;;  %v6802_v43 = vld [vmem:[#allocation2] ss:$0 sm:$0xff] }
 0x446   :  { %5911 = vmatprep.subr.bf16.mxu1 %v7617_v56 }
 0x448   :  { %5584 = vmatpush1.bf16.msra.mxu0 %v7612_v47 }
 0x449   :  { %5912 = vmatpush1.bf16.msra.mxu1 %v7615_v58  ;;  %5585 = vmatprep.subr.bf16.mxu0 %v7620_v59 }
 0x44a   :  { %5913 = vmatprep.subr.bf16.mxu1 %v7623_v60 }
 0x44c   :  { %5586 = vmatpush1.bf16.msra.mxu0 %v7618_v8 }
 0x44d   :  { %5914 = vmatpush1.bf16.msra.mxu1 %v7621_v61  ;;  %5587 = vmatprep.subr.bf16.mxu0 %v7626_v62 }
 0x44e   :  { %5915 = vmatprep.subr.bf16.mxu1 %v7629_v45 }
 0x450   :  { %5588 = vmatpush1.bf16.msra.mxu0 %v7624_v63 }
 0x451   :  { %5916 = vmatpush1.bf16.msra.mxu1 %v7627_v0  ;;  %5589 = vmatprep.subr.bf16.mxu0 %v7632_v1 }
 0x452   :  { %5917 = vmatprep.subr.bf16.mxu1 %v7635_v33 }
 0x454   :  { %5590 = vmatpush1.bf16.msra.mxu0 %v7630_v2 }
 0x455   :  { %5918 = vmatpush1.bf16.msra.mxu1 %v7633_v16  ;;  %5591 = vmatprep.subr.bf16.mxu0 %v7638_v3 }
 0x456   :  { %5919 = vmatprep.subr.bf16.mxu1 %v7641_v5 }
 0x458   :  { %5592 = vmatpush1.bf16.msra.mxu0 %v7636_v6 }
 0x459   :  { %5920 = vmatpush1.bf16.msra.mxu1 %v7639_v48  ;;  %5593 = vmatprep.subr.bf16.mxu0 %v7644_v42 }
 0x45a   :  { %5921 = vmatprep.subr.bf16.mxu1 %v7647_v11 }
 0x45c   :  { %5594 = vmatpush1.bf16.msra.mxu0 %v7642_v12 }
 0x45d   :  { %5922 = vmatpush1.bf16.msra.mxu1 %v7645_v22 }
 0x45f   :  { %5596 = vmatmul.mubr.bf16.vlgmr.msra.gmra.mrb[16].mxu0 %v2180_v17 }
 0x460   :  { %5924 = vmatmul.mubr.bf16.vlgmr.msra.gmra.mrb[16].mxu1 %v2180_v17 }
 0x532   :  { %v5597_v23 = vpop.f32.mrb[16].mxu0 }
 0x533   :  { %v6804_v24 = vadd.f32 %v5597_v23, %v2699_v44  ;;  %v5925_v27 = vpop.f32.mrb[16].mxu1  ;;  %v5599_v9 = vpop.f32.mrb[17].mxu0 }
 0x534   :  { %v6806_v28 = vadd.f32 %v5925_v27, %v2707_v20  ;;  %v6805_v29 = vadd.f32 %v5599_v9, %v2703_v21  ;;  %v5927_v31 = vpop.f32.mrb[17].mxu1  ;;  %v5601_v32 = vpop.f32.mrb[18].mxu0 }
 0x535   :  { %v5932_v35 = vmax.f32 %v6804_v24, 0.0  ;;  %v6807_v36 = vadd.f32 %v5927_v31, %v2711_v4  ;;  %v5929_v37 = vpop.f32.mrb[18].mxu1  ;;  %v5602_v38 = vpop.f32.mrb[19].mxu0 }
 0x536   :  { %v5934_v39 = vmax.f32 %v6806_v28, 0.0  ;;  %v5933_v41 = vmax.f32 %v6805_v29, 0.0  ;;  %v5930_v49 = vpop.f32.mrb[19].mxu1 }
 0x537   :  { %v5958_v50 = vmul.f32 %v5941_v25, %v5932_v35  ;;  %v5935_v14 = vmax.f32 %v6807_v36, 0.0 }
 0x538   :  { %v5959_v51 = vmul.f32 %v5945_v30, %v5933_v41  ;;  %v5960_v53 = vmul.f32 %v5949_v40, %v5934_v39 }
 0x539   :  { %v5961_v54 = vmul.f32 %v5953_v19, %v5935_v14 }
 0x53a   :  { %v5962_v7 = vadd.f32 %v5959_v51, %v5958_v50 }
 0x53c   :  { %v5963_v15 = vadd.f32 %v5962_v7, %v5960_v53 }
 0x53e   :  { %v5964_v55 = vadd.f32 %v5963_v15, %v5961_v54 }
 0x540   :  { %5965 = vadd.xlane.f32.xlu1 %v5964_v55 }
 0x5cd   :  { %v5966_v56 = vpop.xlane.xlu1 %5965 }
 0x5ce   :  { %v5974_v47 = vadd.f32 %v6802_v43, %v5966_v56 }
 0x5d0   :  { %v6803_v58 = vmul.f32 -1.442695, %v5974_v47 }
 0x5d2   :  { %7648 = vpow2.f32 %v6803_v58 }
 0x5dc   :  { %v7649_v59 = vpop.eup %7648 }
 0x5dd   :  { %v5978_v34 = vadd.f32 1.0, %v7649_v59 }
 0x5df   :  { %7650 = vrcp.f32 %v5978_v34 }
 0x5e9   :  { %v7651_v60 = vpop.eup %7650 }
 0x5ea   :  { %5981 = vxpose.xlu1.b32.start.end [1/1] (short) (narrow) %v7651_v60, 8 }
 0x66a   :  { %v5997_v57 = vpop.trf.xlu1 }
 0x66b   :  { %6014 = vst.msk [vmem:[#allocation17] sm:$0x1] %vm6013_vm0, %v5997_v57 }
 0x66c   :  { %7841 = shalt.err (!%p7838_p12)
}
 0x66d   :  { %s7842_s29 = scalar_lea.hbm %s8192_s9, 16 }
 0x66e   :  { %p7843_p13 = scmp.ne.s32.totalorder %s8192_s9, %s7842_s29  ;;  %p7846_p0 = scmp.lt.u32.totalorder %s7842_s29, %s8192_s9 }
 0x670   :  { %p7848_p1 = pnand %p7846_p0, %p7843_p13 }
 0x672   :  { %7851 = shalt.err (!%p7848_p1)
}
 0x673   :  { %6024 = dma.vmem_to_hbm [thread:$0]  %s6022_s11, 16, %s8192_s9, [#allocation5]  }
 0x674   :  { %7862 = dma.done.wait [#allocation5], 16  }
 0x675   :  { %7863 = vsyncadd [#allocation5], 4294967280 }
 0x676   :  { %6028 = vsyncpa [#allocation4], 1 }
 0x677   :  { %6029 = vsyncpa [#allocation7], 1 }
 0x678   :  { %6030 = vsyncpa [#allocation10], 1 }
 0x679   :  { %6031 = vsyncpa [#allocation13], 1 }
 0x67a   :  { %6032 = vsyncpa [#allocation16], 1 }
 0x67b   :  { %6033 = vsyncpa [#allocation5], 1 }

</bundles_post_ra>
